<compile_context>
chip_gen: v7x
topology: tpu7x:2x2x1
jax: 0.10.0
libtpu: 0.0.40
codegen_flags: <defaults>
</compile_context>

<pallas_src>
import functools

import jax
import jax.numpy as jnp
from jax import lax
from jax.experimental import pallas as pl
from jax.experimental.pallas import tpu as pltpu

_VMEM_LIMIT = 32 * 1024 * 1024  # explicit scoped-VMEM limit (safe on v5e/v6e/v7x)


# ----------------------------------------------------------------------------
# Tiling helpers.
# ----------------------------------------------------------------------------
def _round_up(x, m):
    return ((x + m - 1) // m) * m


def _pick_tile(dim, target, granule=128):
    """Pick a tile size (multiple of `granule`, <= target) and the padded dim.

    Prefers a tile that divides the granule-rounded dim exactly (no padding);
    falls back to padding the dim up to a multiple of the tile.
    """
    padded_min = _round_up(dim, granule)
    tile = None
    for t in range(min(target, padded_min), granule - 1, -granule):
        if padded_min % t == 0:
            tile = t
            break
    if tile is None:
        tile = min(target, padded_min)
    return tile, _round_up(dim, tile)


# ----------------------------------------------------------------------------
# Pallas kernel 1: tiled matmul + bias (+ optional ReLU), bf16 operands,
# f32 accumulation, lane-dense (128-padded) output columns.
# Used for the grouped 3x3 conv (block-diagonal dense expansion — the 12x MXU
# FLOP waste of that expansion is ~1% of total FLOPs, kept for simplicity).
# ----------------------------------------------------------------------------
def _matmul_bias_kernel(a_ref, w_ref, b_ref, o_ref, acc_ref, *, relu):
    k = pl.program_id(1)

    @pl.when(k == 0)
    def _init():
        acc_ref[...] = jnp.zeros_like(acc_ref)

    acc_ref[...] += jnp.dot(a_ref[...], w_ref[...],
                            preferred_element_type=jnp.float32)

    @pl.when(k == pl.num_programs(1) - 1)
    def _fin():
        y = acc_ref[...] + b_ref[...]
        if relu:
            y = jnp.maximum(y, 0.0)
        o_ref[...] = y.astype(o_ref.dtype)


def matmul_bias_2d(a, w, b, *, relu=False, tm_target=512, tk_target=1024):
    # a: (M, K)  w: (K, Cout)  b: (Cout,)  ->  (M, Cout) f32
    M, K = a.shape
    Cout = w.shape[1]
    tm, Mp = _pick_tile(M, tm_target)
    tk, Kp = _pick_tile(K, tk_target)
    Cp = _round_up(Cout, 128)                         # lane-dense output

    a_p = jnp.pad(a.astype(jnp.bfloat16), ((0, Mp - M), (0, Kp - K)))
    w_p = jnp.pad(w.astype(jnp.bfloat16), ((0, Kp - K), (0, Cp - Cout)))
    b_p = jnp.pad(b.astype(jnp.float32), (0, Cp - Cout)).reshape(1, Cp)

    out = pl.pallas_call(
        functools.partial(_matmul_bias_kernel, relu=relu),
        out_shape=jax.ShapeDtypeStruct((Mp, Cp), jnp.float32),
        grid_spec=pltpu.PrefetchScalarGridSpec(
            num_scalar_prefetch=0,
            grid=(Mp // tm, Kp // tk),
            in_specs=[
                pl.BlockSpec((tm, tk), lambda i, k: (i, k)),
                pl.BlockSpec((tk, Cp), lambda i, k: (k, 0)),
                pl.BlockSpec((1, Cp), lambda i, k: (0, 0)),
            ],
            out_specs=pl.BlockSpec((tm, Cp), lambda i, k: (i, 0)),
            scratch_shapes=[pltpu.VMEM((tm, Cp), jnp.float32)],
        ),
        compiler_params=pltpu.CompilerParams(
            dimension_semantics=("parallel", "arbitrary"),
            vmem_limit_bytes=_VMEM_LIMIT),
    )(a_p, w_p, b_p)
    return out[:M, :Cout]


# ----------------------------------------------------------------------------
# Pallas kernel 2: fused (3x3 conv + folded BN + ReLU) -> (1x1 conv -> 96).
# The (M, C/2) intermediate h1 lives only in the VMEM accumulator.
# ----------------------------------------------------------------------------
def _fused_conv_kernel(cols_ref, wa_ref, ba_ref, wb_ref, bb_ref, o_ref, acc_ref):
    k = pl.program_id(1)

    @pl.when(k == 0)
    def _init():
        acc_ref[...] = jnp.zeros_like(acc_ref)

    acc_ref[...] += jnp.dot(cols_ref[...], wa_ref[...],
                            preferred_element_type=jnp.float32)

    @pl.when(k == pl.num_programs(1) - 1)
    def _fin():
        h1 = jnp.maximum(acc_ref[...] + ba_ref[...], 0.0)          # (tm, Ch) f32
        y = jnp.dot(h1.astype(jnp.bfloat16), wb_ref[...],
                    preferred_element_type=jnp.float32) + bb_ref[...]
        o_ref[...] = y.astype(o_ref.dtype)


def fused_conv3x3_relu_conv1x1(cols, wa_mat, ba, wb_mat, bb,
                               *, tm_target=512, tk_target=1024):
    # cols: (M, K=9*Cin)  wa_mat: (K, Ch)  ba: (Ch,)  wb_mat: (Ch, Cout)  bb: (Cout,)
    M, K = cols.shape
    Ch = wa_mat.shape[1]
    Cout = wb_mat.shape[1]
    tm, Mp = _pick_tile(M, tm_target)
    tk, Kp = _pick_tile(K, tk_target)
    Cp = _round_up(Cout, 128)

    cols_p = jnp.pad(cols.astype(jnp.bfloat16), ((0, Mp - M), (0, Kp - K)))
    wa_p = jnp.pad(wa_mat.astype(jnp.bfloat16), ((0, Kp - K), (0, 0)))
    ba_p = ba.astype(jnp.float32).reshape(1, Ch)
    wb_p = jnp.pad(wb_mat.astype(jnp.bfloat16), ((0, 0), (0, Cp - Cout)))
    bb_p = jnp.pad(bb.astype(jnp.float32), (0, Cp - Cout)).reshape(1, Cp)

    out = pl.pallas_call(
        _fused_conv_kernel,
        out_shape=jax.ShapeDtypeStruct((Mp, Cp), jnp.float32),
        grid_spec=pltpu.PrefetchScalarGridSpec(
            num_scalar_prefetch=0,
            grid=(Mp // tm, Kp // tk),
            in_specs=[
                pl.BlockSpec((tm, tk), lambda i, k: (i, k)),
                pl.BlockSpec((tk, Ch), lambda i, k: (k, 0)),
                pl.BlockSpec((1, Ch), lambda i, k: (0, 0)),
                pl.BlockSpec((Ch, Cp), lambda i, k: (0, 0)),
                pl.BlockSpec((1, Cp), lambda i, k: (0, 0)),
            ],
            out_specs=pl.BlockSpec((tm, Cp), lambda i, k: (i, 0)),
            scratch_shapes=[pltpu.VMEM((tm, Ch), jnp.float32)],
        ),
        compiler_params=pltpu.CompilerParams(
            dimension_semantics=("parallel", "arbitrary"),
            vmem_limit_bytes=_VMEM_LIMIT),
    )(cols_p, wa_p, ba_p, wb_p, bb_p)
    return out[:M, :Cout]


# ----------------------------------------------------------------------------
# Pallas kernels 3a/3b: dfe_module (acf) + residual, HW-tiled, two passes.
#   pass 1 (reduction over HW): feat = relu(BN(conv1(x))) per chunk,
#           energy += coarse @ feat^T  (D, C); softmax at the last chunk.
#   pass 2 (parallel over HW):  out = att^T @ coarse ; conv2 ; x += out.
# ----------------------------------------------------------------------------
def _dfe_att_kernel(x_ref, c_ref, w1_ref, b1_ref, att_ref, acc_ref):
    h = pl.program_id(1)

    @pl.when(h == 0)
    def _init():
        acc_ref[...] = jnp.zeros_like(acc_ref)

    x_bf = x_ref[0].astype(jnp.bfloat16)                         # (C, t)
    feat = jnp.dot(w1_ref[...], x_bf, preferred_element_type=jnp.float32)
    feat = jnp.maximum(feat + b1_ref[...], 0.0)                  # (C, t) f32

    # energy += coarse @ feat^T  -> (D, C), contracting the HW chunk directly
    acc_ref[...] += lax.dot_general(
        c_ref[0].astype(jnp.bfloat16), feat.astype(jnp.bfloat16),
        dimension_numbers=(((1,), (1,)), ((), ())),
        preferred_element_type=jnp.float32)

    @pl.when(h == pl.num_programs(1) - 1)
    def _fin():
        energy = acc_ref[...]
        # softmax(rowmax(energy) - energy) == softmax(-energy); shifting by the
        # row min keeps every exponent <= 0 with a single cross-lane reduction.
        e = jnp.min(energy, axis=-1, keepdims=True) - energy
        p = jnp.exp(e)
        inv = pl.reciprocal(jnp.sum(p, axis=-1, keepdims=True), approx=True)
        att_ref[0] = (p * inv).astype(att_ref.dtype)             # (D, C)


def _dfe_out_kernel(x_ref, c_ref, att_ref, w2_ref, b2_ref, o_ref):
    c_bf = c_ref[0].astype(jnp.bfloat16)                         # (D, t)
    att_bf = att_ref[0].astype(jnp.bfloat16)                     # (D, C)
    # out = attention^T @ proj_value -> (C, t), contracting D (no .T materialized)
    out = lax.dot_general(att_bf, c_bf,
                          dimension_numbers=(((0,), (0,)), ((), ())),
                          preferred_element_type=jnp.float32)
    y = jnp.dot(w2_ref[...], out.astype(jnp.bfloat16),
                preferred_element_type=jnp.float32) + b2_ref[...]
    o_ref[0] = (x_ref[0] + y).astype(o_ref.dtype)


def dfe_residual(x_flat, coarse, w1, b1, w2, b2, *, t_target=2048):
    # x_flat: (N, C, HW) f32   coarse: (N, D, HW) f32
    # w1, w2: (C, C) bf16      b1, b2: (C, 1) f32
    N, C, HW = x_flat.shape
    D = coarse.shape[1]
    t, HWp = _pick_tile(HW, t_target)
    nT = HWp // t

    xp = jnp.pad(x_flat.astype(jnp.float32), ((0, 0), (0, 0), (0, HWp - HW)))
    cp = jnp.pad(coarse.astype(jnp.float32), ((0, 0), (0, 0), (0, HWp - HW)))

    # pass 1: attention matrix (N, D, C)
    att = pl.pallas_call(
        _dfe_att_kernel,
        out_shape=jax.ShapeDtypeStruct((N, D, C), jnp.float32),
        grid_spec=pltpu.PrefetchScalarGridSpec(
            num_scalar_prefetch=0,
            grid=(N, nT),
            in_specs=[
                pl.BlockSpec((1, C, t), lambda n, h: (n, 0, h)),
                pl.BlockSpec((1, D, t), lambda n, h: (n, 0, h)),
                pl.BlockSpec((C, C), lambda n, h: (0, 0)),
                pl.BlockSpec((C, 1), lambda n, h: (0, 0)),
            ],
            out_specs=pl.BlockSpec((1, D, C), lambda n, h: (n, 0, 0)),
            scratch_shapes=[pltpu.VMEM((D, C), jnp.float32)],
        ),
        compiler_params=pltpu.CompilerParams(
            dimension_semantics=("parallel", "arbitrary"),
            vmem_limit_bytes=_VMEM_LIMIT),
    )(xp, cp, w1, b1)

    # pass 2: residual update, x aliased into the output (in-place in HBM)
    out = pl.pallas_call(
        _dfe_out_kernel,
        out_shape=jax.ShapeDtypeStruct((N, C, HWp), jnp.float32),
        grid_spec=pltpu.PrefetchScalarGridSpec(
            num_scalar_prefetch=0,
            grid=(N, nT),
            in_specs=[
                pl.BlockSpec((1, C, t), lambda n, h: (n, 0, h)),
                pl.BlockSpec((1, D, t), lambda n, h: (n, 0, h)),
                pl.BlockSpec((1, D, C), lambda n, h: (n, 0, 0)),
                pl.BlockSpec((C, C), lambda n, h: (0, 0)),
                pl.BlockSpec((C, 1), lambda n, h: (0, 0)),
            ],
            out_specs=pl.BlockSpec((1, C, t), lambda n, h: (n, 0, h)),
        ),
        input_output_aliases={0: 0},
        compiler_params=pltpu.CompilerParams(
            dimension_semantics=("parallel", "parallel"),
            vmem_limit_bytes=_VMEM_LIMIT),
    )(xp, cp, att, w2, b2)
    return out[:, :, :HW]


# ----------------------------------------------------------------------------
# Plain-JAX glue: bilinear resize (separable matrices) and im2col (NHWC).
# ----------------------------------------------------------------------------
def _resize_matrix(in_size, out_size, align_corners):
    d = jnp.arange(out_size, dtype=jnp.float32)
    if align_corners:
        if out_size == 1:
            src = jnp.zeros((out_size,), jnp.float32)
        else:
            src = d * (in_size - 1) / (out_size - 1)
    else:
        src = (d + 0.5) * (in_size / out_size) - 0.5
        src = jnp.maximum(src, 0.0)  # PyTorch clamps negative source coords to 0
    lo = jnp.clip(jnp.floor(src).astype(jnp.int32), 0, in_size - 1)
    hi = jnp.clip(lo + 1, 0, in_size - 1)
    frac = src - lo.astype(jnp.float32)
    rows = jnp.arange(out_size)
    m = jnp.zeros((out_size, in_size), jnp.float32)
    m = m.at[rows, lo].add(1.0 - frac)
    m = m.at[rows, hi].add(frac)
    return m


def bilinear_resize_nhwc(x, out_h, out_w, align_corners):
    # glue: separable bilinear interpolation (matches torch bilinear semantics)
    _, H, W, _ = x.shape
    mh = _resize_matrix(H, out_h, align_corners)
    mw = _resize_matrix(W, out_w, align_corners)
    y = jnp.einsum('oh,nhwc->nowc', mh, x)
    y = jnp.einsum('pw,nowc->nopc', mw, y)
    return y


def im2col_3x3_nhwc(x):
    # x: (N, H, W, C) -> (N*H*W, 9*C), zero pad=1, tap order (ki, kj, cin)
    N, H, W, C = x.shape
    xp = jnp.pad(x, ((0, 0), (1, 1), (1, 1), (0, 0)))
    taps = [xp[:, ki:ki + H, kj:kj + W, :] for ki in range(3) for kj in range(3)]
    cols = jnp.stack(taps, axis=3)            # (N, H, W, 9, C)
    return cols.reshape(N * H * W, 9 * C)


def _conv3x3_w_to_mat(w):
    # (Cout, Cin, 3, 3) -> (9*Cin, Cout), row order ((ki*3+kj)*Cin + cin)
    cout, cin = w.shape[0], w.shape[1]
    return w.transpose(2, 3, 1, 0).reshape(9 * cin, cout)


# ----------------------------------------------------------------------------
# Parameter init (deterministic, synthetic).
# ----------------------------------------------------------------------------
def init_params(key, C):
    Ch = C // 2
    ks = jax.random.split(key, 17)

    def nrm(k, shape, scale=0.1):
        return scale * jax.random.normal(k, shape, dtype=jnp.float32)

    p = {
        # depth_output: Conv3x3(C->C/2) + BN + ReLU + Conv1x1(C/2->96)
        'do_conv_a_w': nrm(ks[0], (Ch, C, 3, 3)),
        'do_conv_a_b': nrm(ks[1], (Ch,)),
        'do_bn_gamma': 1.0 + nrm(ks[2], (Ch,)),
        'do_bn_beta': nrm(ks[3], (Ch,)),
        'do_bn_mean': nrm(ks[4], (Ch,)),
        'do_bn_var': jnp.abs(1.0 + nrm(ks[5], (Ch,))),
        'do_conv_b_w': nrm(ks[6], (96, Ch, 1, 1)),
        'do_conv_b_b': nrm(ks[7], (96,)),
        # depth_down: grouped Conv3x3 96->12, groups=12 (8 in-ch per group)
        'dd_w': nrm(ks[8], (12, 8, 3, 3)),
        'dd_b': nrm(ks[9], (12,)),
        # acf (dfe_module(C, C)): conv1 1x1 (no bias) + BN ; conv2 1x1 (+bias)
        'acf_w1': nrm(ks[10], (C, C, 1, 1)),
        'acf_bn_gamma': 1.0 + nrm(ks[11], (C,)),
        'acf_bn_beta': nrm(ks[12], (C,)),
        'acf_bn_mean': nrm(ks[13], (C,)),
        'acf_bn_var': jnp.abs(1.0 + nrm(ks[14], (C,))),
        'acf_w2': nrm(ks[15], (C, C, 1, 1)),
        'acf_b2': nrm(ks[16], (C,)),
    }
    return p


# ----------------------------------------------------------------------------
# DepthAwareFE forward.
# ----------------------------------------------------------------------------
def depth_aware_fe(x, p):
    # x: NCHW (N, C, H, W) float32
    N, C, H, W = x.shape
    Ch = C // 2
    eps = 1e-5

    # ---- depth = depth_output(x) ----
    # Upsample(2x, align_corners=True) -> Conv3x3 -> BN -> ReLU -> Conv1x1(->96)
    x_nhwc = x.transpose(0, 2, 3, 1)
    x_up = bilinear_resize_nhwc(x_nhwc, 2 * H, 2 * W, align_corners=True)

    scale_a = p['do_bn_gamma'] / jnp.sqrt(p['do_bn_var'] + eps)      # fold BN (eval)
    w_a = p['do_conv_a_w'] * scale_a[:, None, None, None]
    b_a = (p['do_conv_a_b'] - p['do_bn_mean']) * scale_a + p['do_bn_beta']
    w_b_mat = p['do_conv_b_w'].reshape(96, Ch).T                     # (Ch, 96)

    cols = im2col_3x3_nhwc(x_up)                                     # (N*4HW, 9C)
    depth_flat = fused_conv3x3_relu_conv1x1(
        cols, _conv3x3_w_to_mat(w_a), b_a, w_b_mat, p['do_conv_b_b'])  # (N*4HW, 96)
    depth_nhwc = depth_flat.reshape(N, 2 * H, 2 * W, 96)
    depth = depth_nhwc.transpose(0, 3, 1, 2)                         # (N, 96, 2H, 2W)

    # ---- depth_guide ----
    dg_nhwc = bilinear_resize_nhwc(depth_nhwc, H, W, align_corners=False)  # (N,H,W,96)
    # grouped 3x3 conv 96->12 (groups=12), expanded to a block-diagonal dense
    # matmul (12x MXU FLOP waste, ~1% of total — kept for simplicity, output
    # lanes padded to 128 inside matmul_bias_2d).
    w_full = jnp.zeros((12, 96, 3, 3), jnp.float32)
    for j in range(12):
        w_full = w_full.at[j, 8 * j:8 * (j + 1)].set(p['dd_w'][j])
    cols_g = im2col_3x3_nhwc(dg_nhwc)                                # (N*HW, 864)
    dg_flat = matmul_bias_2d(cols_g, _conv3x3_w_to_mat(w_full), p['dd_b'])  # (N*HW, 12)
    depth_guide = dg_flat.reshape(N, H, W, 12).transpose(0, 3, 1, 2)  # (N,12,H,W)

    # ---- x = x + acf(x, depth_guide)  (two HW-tiled Pallas kernels) ----
    x_flat = x.reshape(N, C, H * W)
    coarse = depth_guide.reshape(N, 12, H * W)
    scale1 = p['acf_bn_gamma'] / jnp.sqrt(p['acf_bn_var'] + eps)
    w1f = (p['acf_w1'][:, :, 0, 0] * scale1[:, None]).astype(jnp.bfloat16)
    b1f = (p['acf_bn_beta'] - p['acf_bn_mean'] * scale1).reshape(C, 1)
    w2 = p['acf_w2'][:, :, 0, 0].astype(jnp.bfloat16)
    b2 = p['acf_b2'].reshape(C, 1)
    x_out = dfe_residual(x_flat, coarse, w1f, b1f, w2, b2).reshape(N, C, H, W)

    return depth, depth_guide, x_out


if __name__ == "__main__":
    key = jax.random.PRNGKey(0)
    k_x, k_p = jax.random.split(key)

    # Small shapes: output_channel_num = 32 (acf = dfe_module(32, 32) so the
    # residual add is well-typed; reference hard-codes 256).
    N, C, H, W = 2, 32, 16, 16
    x = jax.random.normal(k_x, (N, C, H, W), dtype=jnp.float32)
    params = init_params(k_p, C)

    fwd = jax.jit(depth_aware_fe)
    depth, depth_guide, x_out = fwd(x, params)
    jax.block_until_ready((depth, depth_guide, x_out))

    assert depth.shape == (N, 96, 2 * H, 2 * W)
    assert depth_guide.shape == (N, 12, H, W)
    assert x_out.shape == (N, C, H, W)
    assert depth.dtype == depth_guide.dtype == x_out.dtype == jnp.float32

    print("KERNEL_OK")
</pallas_src>

<mosaic_0001>
module attributes {stable_mosaic.version = 11 : i64} {
  func.func private @main(%arg0: i32) attributes {dimension_semantics = [#tpu.dimension_semantics<core_parallel>], iteration_bounds = array<i64: 2>, tpu.core_type = #tpu.core_type<sc_scalar_subcore>, window_params = []} {
    return
  }
}

module attributes {stable_mosaic.version = 11 : i64} {
  func.func private @main(%arg0: i32) attributes {dimension_semantics = [#tpu.dimension_semantics<core_parallel>], iteration_bounds = array<i64: 2>, tpu.core_type = #tpu.core_type<sc_scalar_subcore>, window_params = []} {
    return
  }
}

module attributes {stable_mosaic.version = 11 : i64} {
  func.func @_fused_conv_kernel(%arg0: i32, %arg1: i32, %arg2: memref<512x384xbf16, #tpu.memory_space<vmem>>, %arg3: memref<384x16xbf16, #tpu.memory_space<vmem>>, %arg4: memref<1x16xf32, #tpu.memory_space<vmem>>, %arg5: memref<16x128xbf16, #tpu.memory_space<vmem>>, %arg6: memref<1x128xf32, #tpu.memory_space<vmem>>, %arg7: memref<512x128xf32, #tpu.memory_space<vmem>>, %arg8: memref<512x16xf32, #tpu.memory_space<vmem>>) attributes {dimension_semantics = [#tpu.dimension_semantics<parallel>, #tpu.dimension_semantics<arbitrary>], iteration_bounds = array<i64: 4, 1>, scalar_prefetch = 0 : i64, scratch_operands = 1 : i64, tpu.core_type = #tpu.core_type<tc>, window_params = [{transform_indices = @transform_0, window_bounds = array<i64: 512, 384>}, {transform_indices = @transform_1, window_bounds = array<i64: 384, 16>}, {pipeline_mode = #tpu.pipeline_mode<synchronous>, transform_indices = @transform_2, window_bounds = array<i64: 1, 16>}, {pipeline_mode = #tpu.pipeline_mode<synchronous>, transform_indices = @transform_3, window_bounds = array<i64: 16, 128>}, {pipeline_mode = #tpu.pipeline_mode<synchronous>, transform_indices = @transform_4, window_bounds = array<i64: 1, 128>}, {transform_indices = @transform_5, window_bounds = array<i64: 512, 128>}]} {
    %c0_i32 = arith.constant 0 : i32
    %0 = arith.cmpi eq, %arg1, %c0_i32 : i32
    %1 = arith.extui %0 : i1 to i32
    %c0_i32_0 = arith.constant 0 : i32
    %2 = arith.cmpi ne, %1, %c0_i32_0 : i32
    scf.if %2 {
      %cst_10 = arith.constant 0.000000e+00 : f32
      %12 = vector.broadcast %cst_10 : f32 to vector<512x16xf32>
      %c0_11 = arith.constant 0 : index
      %c0_12 = arith.constant 0 : index
      %13 = vector.load %arg8[%c0_11, %c0_12] : memref<512x16xf32, #tpu.memory_space<vmem>>, vector<512x16xf32>
      tpu.vector_store %arg8[%c0_11, %c0_12], %12 {strides = array<i32>} : memref<512x16xf32, #tpu.memory_space<vmem>>, vector<512x16xf32>,
    } else {
    }
    %c0 = arith.constant 0 : index
    %c0_1 = arith.constant 0 : index
    %3 = vector.load %arg8[%c0, %c0_1] : memref<512x16xf32, #tpu.memory_space<vmem>>, vector<512x16xf32>
    %c0_2 = arith.constant 0 : index
    %c0_3 = arith.constant 0 : index
    %4 = vector.load %arg2[%c0_2, %c0_3] : memref<512x384xbf16, #tpu.memory_space<vmem>>, vector<512x384xbf16>
    %c0_4 = arith.constant 0 : index
    %c0_5 = arith.constant 0 : index
    %5 = vector.load %arg3[%c0_4, %c0_5] : memref<384x16xbf16, #tpu.memory_space<vmem>>, vector<384x16xbf16>
    %cst = arith.constant dense<0.000000e+00> : vector<512x16xf32>
    %6 = tpu.matmul %4, %5, %cst {dimension_numbers = #tpu.dot_dimension_numbers<[1], [0], [0], [1], [0, 0, 1, 1], [], []>} : vector<512x384xbf16>, vector<384x16xbf16>, vector<512x16xf32> -> vector<512x16xf32>
    %7 = arith.addf %3, %6 : vector<512x16xf32>
    %c0_6 = arith.constant 0 : index
    %c0_7 = arith.constant 0 : index
    %8 = vector.load %arg8[%c0_6, %c0_7] : memref<512x16xf32, #tpu.memory_space<vmem>>, vector<512x16xf32>
    tpu.vector_store %arg8[%c0_6, %c0_7], %7 {strides = array<i32>} : memref<512x16xf32, #tpu.memory_space<vmem>>, vector<512x16xf32>,
    %c0_i32_8 = arith.constant 0 : i32
    %9 = arith.cmpi eq, %arg1, %c0_i32_8 : i32
    %10 = arith.extui %9 : i1 to i32
    %c0_i32_9 = arith.constant 0 : i32
    %11 = arith.cmpi ne, %10, %c0_i32_9 : i32
    scf.if %11 {
      %c0_10 = arith.constant 0 : index
      %c0_11 = arith.constant 0 : index
      %12 = vector.load %arg8[%c0_10, %c0_11] : memref<512x16xf32, #tpu.memory_space<vmem>>, vector<512x16xf32>
      %c0_12 = arith.constant 0 : index
      %c0_13 = arith.constant 0 : index
      %13 = vector.load %arg4[%c0_12, %c0_13] : memref<1x16xf32, #tpu.memory_space<vmem>>, vector<1x16xf32>
      %14 = vector.broadcast %13 : vector<1x16xf32> to vector<512x16xf32>
      %15 = arith.addf %12, %14 : vector<512x16xf32>
      %cst_14 = arith.constant 0.000000e+00 : f32
      %16 = vector.broadcast %cst_14 : f32 to vector<512x16xf32>
      %17 = arith.maximumf %15, %16 : vector<512x16xf32>
      %18 = arith.truncf %17 : vector<512x16xf32> to vector<512x16xbf16>
      %c0_15 = arith.constant 0 : index
      %c0_16 = arith.constant 0 : index
      %19 = vector.load %arg5[%c0_15, %c0_16] : memref<16x128xbf16, #tpu.memory_space<vmem>>, vector<16x128xbf16>
      %cst_17 = arith.constant dense<0.000000e+00> : vector<512x128xf32>
      %20 = tpu.matmul %18, %19, %cst_17 {dimension_numbers = #tpu.dot_dimension_numbers<[1], [0], [0], [1], [0, 0, 1, 1], [], []>} : vector<512x16xbf16>, vector<16x128xbf16>, vector<512x128xf32> -> vector<512x128xf32>
      %c0_18 = arith.constant 0 : index
      %c0_19 = arith.constant 0 : index
      %21 = vector.load %arg6[%c0_18, %c0_19] : memref<1x128xf32, #tpu.memory_space<vmem>>, vector<1x128xf32>
      %22 = vector.broadcast %21 : vector<1x128xf32> to vector<512x128xf32>
      %23 = arith.addf %20, %22 : vector<512x128xf32>
      %c0_20 = arith.constant 0 : index
      %c0_21 = arith.constant 0 : index
      %24 = vector.load %arg7[%c0_20, %c0_21] : memref<512x128xf32, #tpu.memory_space<vmem>>, vector<512x128xf32>
      tpu.vector_store %arg7[%c0_20, %c0_21], %23 {strides = array<i32>} : memref<512x128xf32, #tpu.memory_space<vmem>>, vector<512x128xf32>,
    } else {
    }
    return
  }
  func.func @transform_0(%arg0: i32, %arg1: i32) -> (i32, i32) {
    %c0_i32 = arith.constant 0 : i32
    return %arg0, %arg1 : i32, i32
  }
  func.func @transform_1(%arg0: i32, %arg1: i32) -> (i32, i32) {
    %c0_i32 = arith.constant 0 : i32
    %c0_i32_0 = arith.constant 0 : i32
    return %arg1, %c0_i32 : i32, i32
  }
  func.func @transform_2(%arg0: i32, %arg1: i32) -> (i32, i32) {
    %c0_i32 = arith.constant 0 : i32
    %c0_i32_0 = arith.constant 0 : i32
    %c0_i32_1 = arith.constant 0 : i32
    return %c0_i32, %c0_i32_0 : i32, i32
  }
  func.func @transform_3(%arg0: i32, %arg1: i32) -> (i32, i32) {
    %c0_i32 = arith.constant 0 : i32
    %c0_i32_0 = arith.constant 0 : i32
    %c0_i32_1 = arith.constant 0 : i32
    return %c0_i32, %c0_i32_0 : i32, i32
  }
  func.func @transform_4(%arg0: i32, %arg1: i32) -> (i32, i32) {
    %c0_i32 = arith.constant 0 : i32
    %c0_i32_0 = arith.constant 0 : i32
    %c0_i32_1 = arith.constant 0 : i32
    return %c0_i32, %c0_i32_0 : i32, i32
  }
  func.func @transform_5(%arg0: i32, %arg1: i32) -> (i32, i32) {
    %c0_i32 = arith.constant 0 : i32
    %c0_i32_0 = arith.constant 0 : i32
    return %arg0, %c0_i32 : i32, i32
  }
}

module attributes {stable_mosaic.version = 11 : i64} {
  func.func @_matmul_bias_kernel(%arg0: i32, %arg1: i32, %arg2: memref<512x896xbf16, #tpu.memory_space<vmem>>, %arg3: memref<896x128xbf16, #tpu.memory_space<vmem>>, %arg4: memref<1x128xf32, #tpu.memory_space<vmem>>, %arg5: memref<512x128xf32, #tpu.memory_space<vmem>>, %arg6: memref<512x128xf32, #tpu.memory_space<vmem>>) attributes {dimension_semantics = [#tpu.dimension_semantics<parallel>, #tpu.dimension_semantics<arbitrary>], iteration_bounds = array<i64: 1, 1>, scalar_prefetch = 0 : i64, scratch_operands = 1 : i64, tpu.core_type = #tpu.core_type<tc>, window_params = [{transform_indices = @transform_0, window_bounds = array<i64: 512, 896>}, {transform_indices = @transform_1, window_bounds = array<i64: 896, 128>}, {pipeline_mode = #tpu.pipeline_mode<synchronous>, transform_indices = @transform_2, window_bounds = array<i64: 1, 128>}, {transform_indices = @transform_3, window_bounds = array<i64: 512, 128>}]} {
    %c0_i32 = arith.constant 0 : i32
    %0 = arith.cmpi eq, %arg1, %c0_i32 : i32
    %1 = arith.extui %0 : i1 to i32
    %c0_i32_0 = arith.constant 0 : i32
    %2 = arith.cmpi ne, %1, %c0_i32_0 : i32
    scf.if %2 {
      %cst_10 = arith.constant 0.000000e+00 : f32
      %12 = vector.broadcast %cst_10 : f32 to vector<512x128xf32>
      %c0_11 = arith.constant 0 : index
      %c0_12 = arith.constant 0 : index
      %13 = vector.load %arg6[%c0_11, %c0_12] : memref<512x128xf32, #tpu.memory_space<vmem>>, vector<512x128xf32>
      tpu.vector_store %arg6[%c0_11, %c0_12], %12 {strides = array<i32>} : memref<512x128xf32, #tpu.memory_space<vmem>>, vector<512x128xf32>,
    } else {
    }
    %c0 = arith.constant 0 : index
    %c0_1 = arith.constant 0 : index
    %3 = vector.load %arg6[%c0, %c0_1] : memref<512x128xf32, #tpu.memory_space<vmem>>, vector<512x128xf32>
    %c0_2 = arith.constant 0 : index
    %c0_3 = arith.constant 0 : index
    %4 = vector.load %arg2[%c0_2, %c0_3] : memref<512x896xbf16, #tpu.memory_space<vmem>>, vector<512x896xbf16>
    %c0_4 = arith.constant 0 : index
    %c0_5 = arith.constant 0 : index
    %5 = vector.load %arg3[%c0_4, %c0_5] : memref<896x128xbf16, #tpu.memory_space<vmem>>, vector<896x128xbf16>
    %cst = arith.constant dense<0.000000e+00> : vector<512x128xf32>
    %6 = tpu.matmul %4, %5, %cst {dimension_numbers = #tpu.dot_dimension_numbers<[1], [0], [0], [1], [0, 0, 1, 1], [], []>} : vector<512x896xbf16>, vector<896x128xbf16>, vector<512x128xf32> -> vector<512x128xf32>
    %7 = arith.addf %3, %6 : vector<512x128xf32>
    %c0_6 = arith.constant 0 : index
    %c0_7 = arith.constant 0 : index
    %8 = vector.load %arg6[%c0_6, %c0_7] : memref<512x128xf32, #tpu.memory_space<vmem>>, vector<512x128xf32>
    tpu.vector_store %arg6[%c0_6, %c0_7], %7 {strides = array<i32>} : memref<512x128xf32, #tpu.memory_space<vmem>>, vector<512x128xf32>,
    %c0_i32_8 = arith.constant 0 : i32
    %9 = arith.cmpi eq, %arg1, %c0_i32_8 : i32
    %10 = arith.extui %9 : i1 to i32
    %c0_i32_9 = arith.constant 0 : i32
    %11 = arith.cmpi ne, %10, %c0_i32_9 : i32
    scf.if %11 {
      %c0_10 = arith.constant 0 : index
      %c0_11 = arith.constant 0 : index
      %12 = vector.load %arg6[%c0_10, %c0_11] : memref<512x128xf32, #tpu.memory_space<vmem>>, vector<512x128xf32>
      %c0_12 = arith.constant 0 : index
      %c0_13 = arith.constant 0 : index
      %13 = vector.load %arg4[%c0_12, %c0_13] : memref<1x128xf32, #tpu.memory_space<vmem>>, vector<1x128xf32>
      %14 = vector.broadcast %13 : vector<1x128xf32> to vector<512x128xf32>
      %15 = arith.addf %12, %14 : vector<512x128xf32>
      %c0_14 = arith.constant 0 : index
      %c0_15 = arith.constant 0 : index
      %16 = vector.load %arg5[%c0_14, %c0_15] : memref<512x128xf32, #tpu.memory_space<vmem>>, vector<512x128xf32>
      tpu.vector_store %arg5[%c0_14, %c0_15], %15 {strides = array<i32>} : memref<512x128xf32, #tpu.memory_space<vmem>>, vector<512x128xf32>,
    } else {
    }
    return
  }
  func.func @transform_0(%arg0: i32, %arg1: i32) -> (i32, i32) {
    %c0_i32 = arith.constant 0 : i32
    return %arg0, %arg1 : i32, i32
  }
  func.func @transform_1(%arg0: i32, %arg1: i32) -> (i32, i32) {
    %c0_i32 = arith.constant 0 : i32
    %c0_i32_0 = arith.constant 0 : i32
    return %arg1, %c0_i32 : i32, i32
  }
  func.func @transform_2(%arg0: i32, %arg1: i32) -> (i32, i32) {
    %c0_i32 = arith.constant 0 : i32
    %c0_i32_0 = arith.constant 0 : i32
    %c0_i32_1 = arith.constant 0 : i32
    return %c0_i32, %c0_i32_0 : i32, i32
  }
  func.func @transform_3(%arg0: i32, %arg1: i32) -> (i32, i32) {
    %c0_i32 = arith.constant 0 : i32
    %c0_i32_0 = arith.constant 0 : i32
    return %arg0, %c0_i32 : i32, i32
  }
}

module attributes {stable_mosaic.version = 11 : i64} {
  func.func @_dfe_att_kernel(%arg0: i32, %arg1: i32, %arg2: memref<1x32x256xf32, #tpu.memory_space<vmem>>, %arg3: memref<1x12x256xf32, #tpu.memory_space<vmem>>, %arg4: memref<32x32xbf16, #tpu.memory_space<vmem>>, %arg5: memref<32x1xf32, #tpu.memory_space<vmem>>, %arg6: memref<1x12x32xf32, #tpu.memory_space<vmem>>, %arg7: memref<12x32xf32, #tpu.memory_space<vmem>>) attributes {dimension_semantics = [#tpu.dimension_semantics<parallel>, #tpu.dimension_semantics<arbitrary>], iteration_bounds = array<i64: 2, 1>, scalar_prefetch = 0 : i64, scratch_operands = 1 : i64, tpu.core_type = #tpu.core_type<tc>, window_params = [{transform_indices = @transform_0, window_bounds = array<i64: 1, 32, 256>}, {transform_indices = @transform_1, window_bounds = array<i64: 1, 12, 256>}, {pipeline_mode = #tpu.pipeline_mode<synchronous>, transform_indices = @transform_2, window_bounds = array<i64: 32, 32>}, {pipeline_mode = #tpu.pipeline_mode<synchronous>, transform_indices = @transform_3, window_bounds = array<i64: 32, 1>}, {transform_indices = @transform_4, window_bounds = array<i64: 1, 12, 32>}]} {
    %c0_i32 = arith.constant 0 : i32
    %0 = arith.cmpi eq, %arg1, %c0_i32 : i32
    %1 = arith.extui %0 : i1 to i32
    %c0_i32_0 = arith.constant 0 : i32
    %2 = arith.cmpi ne, %1, %c0_i32_0 : i32
    scf.if %2 {
      %cst_18 = arith.constant 0.000000e+00 : f32
      %24 = vector.broadcast %cst_18 : f32 to vector<12x32xf32>
      %c0_19 = arith.constant 0 : index
      %c0_20 = arith.constant 0 : index
      %25 = vector.load %arg7[%c0_19, %c0_20] : memref<12x32xf32, #tpu.memory_space<vmem>>, vector<12x32xf32>
      tpu.vector_store %arg7[%c0_19, %c0_20], %24 {strides = array<i32>} : memref<12x32xf32, #tpu.memory_space<vmem>>, vector<12x32xf32>,
    } else {
    }
    %c0 = arith.constant 0 : index
    %c0_1 = arith.constant 0 : index
    %c0_2 = arith.constant 0 : index
    %3 = vector.load %arg2[%c0, %c0_1, %c0_2] : memref<1x32x256xf32, #tpu.memory_space<vmem>>, vector<1x32x256xf32>
    %4 = vector.shape_cast %3 : vector<1x32x256xf32> to vector<32x256xf32>
    %5 = arith.truncf %4 : vector<32x256xf32> to vector<32x256xbf16>
    %c0_3 = arith.constant 0 : index
    %c0_4 = arith.constant 0 : index
    %6 = vector.load %arg4[%c0_3, %c0_4] : memref<32x32xbf16, #tpu.memory_space<vmem>>, vector<32x32xbf16>
    %cst = arith.constant dense<0.000000e+00> : vector<32x256xf32>
    %7 = tpu.matmul %6, %5, %cst {dimension_numbers = #tpu.dot_dimension_numbers<[1], [0], [0], [1], [0, 0, 1, 1], [], []>} : vector<32x32xbf16>, vector<32x256xbf16>, vector<32x256xf32> -> vector<32x256xf32>
    %c0_5 = arith.constant 0 : index
    %c0_6 = arith.constant 0 : index
    %8 = vector.load %arg5[%c0_5, %c0_6] : memref<32x1xf32, #tpu.memory_space<vmem>>, vector<32x1xf32>
    %9 = vector.broadcast %8 : vector<32x1xf32> to vector<32x256xf32>
    %10 = arith.addf %7, %9 : vector<32x256xf32>
    %cst_7 = arith.constant 0.000000e+00 : f32
    %11 = vector.broadcast %cst_7 : f32 to vector<32x256xf32>
    %12 = arith.maximumf %10, %11 : vector<32x256xf32>
    %c0_8 = arith.constant 0 : index
    %c0_9 = arith.constant 0 : index
    %13 = vector.load %arg7[%c0_8, %c0_9] : memref<12x32xf32, #tpu.memory_space<vmem>>, vector<12x32xf32>
    %c0_10 = arith.constant 0 : index
    %c0_11 = arith.constant 0 : index
    %c0_12 = arith.constant 0 : index
    %14 = vector.load %arg3[%c0_10, %c0_11, %c0_12] : memref<1x12x256xf32, #tpu.memory_space<vmem>>, vector<1x12x256xf32>
    %15 = vector.shape_cast %14 : vector<1x12x256xf32> to vector<12x256xf32>
    %16 = arith.truncf %15 : vector<12x256xf32> to vector<12x256xbf16>
    %17 = arith.truncf %12 : vector<32x256xf32> to vector<32x256xbf16>
    %cst_13 = arith.constant dense<0.000000e+00> : vector<12x32xf32>
    %18 = tpu.matmul %16, %17, %cst_13 {dimension_numbers = #tpu.dot_dimension_numbers<[1], [1], [0], [0], [0, 0, 1, 0], [], []>} : vector<12x256xbf16>, vector<32x256xbf16>, vector<12x32xf32> -> vector<12x32xf32>
    %19 = arith.addf %13, %18 : vector<12x32xf32>
    %c0_14 = arith.constant 0 : index
    %c0_15 = arith.constant 0 : index
    %20 = vector.load %arg7[%c0_14, %c0_15] : memref<12x32xf32, #tpu.memory_space<vmem>>, vector<12x32xf32>
    tpu.vector_store %arg7[%c0_14, %c0_15], %19 {strides = array<i32>} : memref<12x32xf32, #tpu.memory_space<vmem>>, vector<12x32xf32>,
    %c0_i32_16 = arith.constant 0 : i32
    %21 = arith.cmpi eq, %arg1, %c0_i32_16 : i32
    %22 = arith.extui %21 : i1 to i32
    %c0_i32_17 = arith.constant 0 : i32
    %23 = arith.cmpi ne, %22, %c0_i32_17 : i32
    scf.if %23 {
      %c0_18 = arith.constant 0 : index
      %c0_19 = arith.constant 0 : index
      %24 = vector.load %arg7[%c0_18, %c0_19] : memref<12x32xf32, #tpu.memory_space<vmem>>, vector<12x32xf32>
      %cst_20 = arith.constant dense<0x7F800000> : vector<12xf32>
      %25 = vector.multi_reduction <minimumf>, %24, %cst_20 [1] : vector<12x32xf32> to vector<12xf32>
      %26 = vector.shape_cast %25 : vector<12xf32> to vector<12x1xf32>
      %27 = vector.broadcast %26 : vector<12x1xf32> to vector<12x32xf32>
      %28 = arith.subf %27, %24 : vector<12x32xf32>
      %29 = math.exp %28 : vector<12x32xf32>
      %cst_21 = arith.constant dense<0.000000e+00> : vector<12xf32>
      %30 = vector.multi_reduction <add>, %29, %cst_21 [1] : vector<12x32xf32> to vector<12xf32>
      %31 = vector.shape_cast %30 : vector<12xf32> to vector<12x1xf32>
      %32 = tpu.reciprocal %31 {approx = true} : vector<12x1xf32> -> vector<12x1xf32>
      %33 = vector.broadcast %32 : vector<12x1xf32> to vector<12x32xf32>
      %34 = arith.mulf %29, %33 : vector<12x32xf32>
      %c0_22 = arith.constant 0 : index
      %c0_23 = arith.constant 0 : index
      %c0_24 = arith.constant 0 : index
      %35 = vector.load %arg6[%c0_22, %c0_23, %c0_24] : memref<1x12x32xf32, #tpu.memory_space<vmem>>, vector<1x12x32xf32>
      %36 = vector.shape_cast %35 : vector<1x12x32xf32> to vector<12x32xf32>
      %37 = vector.shape_cast %34 : vector<12x32xf32> to vector<1x12x32xf32>
      tpu.vector_store %arg6[%c0_22, %c0_23, %c0_24], %37 {strides = array<i32>} : memref<1x12x32xf32, #tpu.memory_space<vmem>>, vector<1x12x32xf32>,
    } else {
    }
    return
  }
  func.func @transform_0(%arg0: i32, %arg1: i32) -> (i32, i32, i32) {
    %c0_i32 = arith.constant 0 : i32
    %c0_i32_0 = arith.constant 0 : i32
    return %arg0, %c0_i32, %arg1 : i32, i32, i32
  }
  func.func @transform_1(%arg0: i32, %arg1: i32) -> (i32, i32, i32) {
    %c0_i32 = arith.constant 0 : i32
    %c0_i32_0 = arith.constant 0 : i32
    return %arg0, %c0_i32, %arg1 : i32, i32, i32
  }
  func.func @transform_2(%arg0: i32, %arg1: i32) -> (i32, i32) {
    %c0_i32 = arith.constant 0 : i32
    %c0_i32_0 = arith.constant 0 : i32
    %c0_i32_1 = arith.constant 0 : i32
    return %c0_i32, %c0_i32_0 : i32, i32
  }
  func.func @transform_3(%arg0: i32, %arg1: i32) -> (i32, i32) {
    %c0_i32 = arith.constant 0 : i32
    %c0_i32_0 = arith.constant 0 : i32
    %c0_i32_1 = arith.constant 0 : i32
    return %c0_i32, %c0_i32_0 : i32, i32
  }
  func.func @transform_4(%arg0: i32, %arg1: i32) -> (i32, i32, i32) {
    %c0_i32 = arith.constant 0 : i32
    %c0_i32_0 = arith.constant 0 : i32
    %c0_i32_1 = arith.constant 0 : i32
    return %arg0, %c0_i32, %c0_i32_0 : i32, i32, i32
  }
}

module attributes {stable_mosaic.version = 11 : i64} {
  func.func @_dfe_out_kernel(%arg0: i32, %arg1: i32, %arg2: memref<1x32x256xf32, #tpu.memory_space<vmem>>, %arg3: memref<1x12x256xf32, #tpu.memory_space<vmem>>, %arg4: memref<1x12x32xf32, #tpu.memory_space<vmem>>, %arg5: memref<32x32xbf16, #tpu.memory_space<vmem>>, %arg6: memref<32x1xf32, #tpu.memory_space<vmem>>, %arg7: memref<1x32x256xf32, #tpu.memory_space<vmem>>) attributes {dimension_semantics = [#tpu.dimension_semantics<parallel>, #tpu.dimension_semantics<parallel>], iteration_bounds = array<i64: 2, 1>, scalar_prefetch = 0 : i64, scratch_operands = 0 : i64, tpu.core_type = #tpu.core_type<tc>, window_params = [{transform_indices = @transform_0, window_bounds = array<i64: 1, 32, 256>}, {transform_indices = @transform_1, window_bounds = array<i64: 1, 12, 256>}, {transform_indices = @transform_2, window_bounds = array<i64: 1, 12, 32>}, {pipeline_mode = #tpu.pipeline_mode<synchronous>, transform_indices = @transform_3, window_bounds = array<i64: 32, 32>}, {pipeline_mode = #tpu.pipeline_mode<synchronous>, transform_indices = @transform_4, window_bounds = array<i64: 32, 1>}, {transform_indices = @transform_5, window_bounds = array<i64: 1, 32, 256>}]} {
    %c0 = arith.constant 0 : index
    %c0_0 = arith.constant 0 : index
    %c0_1 = arith.constant 0 : index
    %0 = vector.load %arg3[%c0, %c0_0, %c0_1] : memref<1x12x256xf32, #tpu.memory_space<vmem>>, vector<1x12x256xf32>
    %1 = vector.shape_cast %0 : vector<1x12x256xf32> to vector<12x256xf32>
    %2 = arith.truncf %1 : vector<12x256xf32> to vector<12x256xbf16>
    %c0_2 = arith.constant 0 : index
    %c0_3 = arith.constant 0 : index
    %c0_4 = arith.constant 0 : index
    %3 = vector.load %arg4[%c0_2, %c0_3, %c0_4] : memref<1x12x32xf32, #tpu.memory_space<vmem>>, vector<1x12x32xf32>
    %4 = vector.shape_cast %3 : vector<1x12x32xf32> to vector<12x32xf32>
    %5 = arith.truncf %4 : vector<12x32xf32> to vector<12x32xbf16>
    %cst = arith.constant dense<0.000000e+00> : vector<32x256xf32>
    %6 = tpu.matmul %5, %2, %cst {dimension_numbers = #tpu.dot_dimension_numbers<[0], [0], [1], [1], [0, 1, 1, 1], [], []>} : vector<12x32xbf16>, vector<12x256xbf16>, vector<32x256xf32> -> vector<32x256xf32>
    %c0_5 = arith.constant 0 : index
    %c0_6 = arith.constant 0 : index
    %7 = vector.load %arg5[%c0_5, %c0_6] : memref<32x32xbf16, #tpu.memory_space<vmem>>, vector<32x32xbf16>
    %8 = arith.truncf %6 : vector<32x256xf32> to vector<32x256xbf16>
    %cst_7 = arith.constant dense<0.000000e+00> : vector<32x256xf32>
    %9 = tpu.matmul %7, %8, %cst_7 {dimension_numbers = #tpu.dot_dimension_numbers<[1], [0], [0], [1], [0, 0, 1, 1], [], []>} : vector<32x32xbf16>, vector<32x256xbf16>, vector<32x256xf32> -> vector<32x256xf32>
    %c0_8 = arith.constant 0 : index
    %c0_9 = arith.constant 0 : index
    %10 = vector.load %arg6[%c0_8, %c0_9] : memref<32x1xf32, #tpu.memory_space<vmem>>, vector<32x1xf32>
    %11 = vector.broadcast %10 : vector<32x1xf32> to vector<32x256xf32>
    %12 = arith.addf %9, %11 : vector<32x256xf32>
    %c0_10 = arith.constant 0 : index
    %c0_11 = arith.constant 0 : index
    %c0_12 = arith.constant 0 : index
    %13 = vector.load %arg2[%c0_10, %c0_11, %c0_12] : memref<1x32x256xf32, #tpu.memory_space<vmem>>, vector<1x32x256xf32>
    %14 = vector.shape_cast %13 : vector<1x32x256xf32> to vector<32x256xf32>
    %15 = arith.addf %14, %12 : vector<32x256xf32>
    %c0_13 = arith.constant 0 : index
    %c0_14 = arith.constant 0 : index
    %c0_15 = arith.constant 0 : index
    %16 = vector.load %arg7[%c0_13, %c0_14, %c0_15] : memref<1x32x256xf32, #tpu.memory_space<vmem>>, vector<1x32x256xf32>
    %17 = vector.shape_cast %16 : vector<1x32x256xf32> to vector<32x256xf32>
    %18 = vector.shape_cast %15 : vector<32x256xf32> to vector<1x32x256xf32>
    tpu.vector_store %arg7[%c0_13, %c0_14, %c0_15], %18 {strides = array<i32>} : memref<1x32x256xf32, #tpu.memory_space<vmem>>, vector<1x32x256xf32>,
    return
  }
  func.func @transform_0(%arg0: i32, %arg1: i32) -> (i32, i32, i32) {
    %c0_i32 = arith.constant 0 : i32
    %c0_i32_0 = arith.constant 0 : i32
    return %arg0, %c0_i32, %arg1 : i32, i32, i32
  }
  func.func @transform_1(%arg0: i32, %arg1: i32) -> (i32, i32, i32) {
    %c0_i32 = arith.constant 0 : i32
    %c0_i32_0 = arith.constant 0 : i32
    return %arg0, %c0_i32, %arg1 : i32, i32, i32
  }
  func.func @transform_2(%arg0: i32, %arg1: i32) -> (i32, i32, i32) {
    %c0_i32 = arith.constant 0 : i32
    %c0_i32_0 = arith.constant 0 : i32
    %c0_i32_1 = arith.constant 0 : i32
    return %arg0, %c0_i32, %c0_i32_0 : i32, i32, i32
  }
  func.func @transform_3(%arg0: i32, %arg1: i32) -> (i32, i32) {
    %c0_i32 = arith.constant 0 : i32
    %c0_i32_0 = arith.constant 0 : i32
    %c0_i32_1 = arith.constant 0 : i32
    return %c0_i32, %c0_i32_0 : i32, i32
  }
  func.func @transform_4(%arg0: i32, %arg1: i32) -> (i32, i32) {
    %c0_i32 = arith.constant 0 : i32
    %c0_i32_0 = arith.constant 0 : i32
    %c0_i32_1 = arith.constant 0 : i32
    return %c0_i32, %c0_i32_0 : i32, i32
  }
  func.func @transform_5(%arg0: i32, %arg1: i32) -> (i32, i32, i32) {
    %c0_i32 = arith.constant 0 : i32
    %c0_i32_0 = arith.constant 0 : i32
    return %arg0, %c0_i32, %arg1 : i32, i32, i32
  }
}

</mosaic_0001>

<bundles_post_ra>
// kernel: depth_aware_fe.4
= control target key start
LH: loop header
LB: loop body
LE: loop exit
PB: predicated region body
PF: predicated region fallthrough
CT: control target
= control target key end

     0   :  { %s3361_s18 = smov 0   ;;  %s3363_s19 = smov 0   ;;  %s4209_s0 = inlined_call_operand.vmem [shape: bf16[2048,384], index: 0, kind: input, shape index: {}]   ;;  %s4210_s1 = inlined_call_operand.vmem [shape: bf16[384,16], index: 1, kind: input, shape index: {}]   ;;  %s4211_s2 = inlined_call_operand.vmem [shape: f32[1,16], index: 2, kind: input, shape index: {}]   ;;  %s4212_s3 = inlined_call_operand.vmem [shape: bf16[16,128], index: 3, kind: input, shape index: {}]   ;;  %s4213_s4 = inlined_call_operand.vmem [shape: f32[1,128], index: 4, kind: input, shape index: {}]   ;;  %s4214_s5 = inlined_call_operand.vmem [shape: f32[2048,128], index: 5, kind: output, shape index: {}]  }
   0x1   :  { %s3365_s20 = smov 0  }
   0x2 LB: > { %s27_s21 = sadd.s32 1, %s3323_s19  ;;  %p2743_p0 = scmp.ge.s32.totalorder %s3327_s20, 1  ;;  %s3327_s20 = sphi %s3365_s20, %s15_s20   ;;  %s3323_s19 = sphi %s3363_s19, %s4216_s19   ;;  %s3319_s18 = sphi %s3361_s18, %s4215_s18  }
   0x3   : > { %p29_p1 = scmp.ge.s32.totalorder %s27_s21, 4  ;;  %p219_p2 = scmp.lt.s32.totalorder %s3327_s20, 5 }
   0x5   : > { %s4218_s21 = smov (%p29_p1, %s27_s21), 0  ;;  %p220_p3 = pnand %p2743_p0, %p219_p2 }
   0x6   : > { %v3151_v0 = vld [vmem:[%s4210_s1] sm:$0xff] (!%p220_p3)   ;;  %v3329_v1 = vmov (!%p220_p3), 0   ;;  %v3152_v2 = vld [vmem:[%s4210_s1 + $0x8] sm:$0xff] (!%p220_p3)   ;;  %v3153_v3 = vld [vmem:[%s4210_s1 + $0x10] sm:$0xff] (!%p220_p3)   ;;  %s2744_s28 = sshll.u32 (!%p220_p3), %s3319_s18, 6  ;;  %vm286_vm0 = vcmask (!%p220_p3), 130048  }
   0x7   : > { %223 = sbr.rel (%p220_p3) target bundleno = 769 (0x301), region = 40  ;;  %1247 = vmatprep.subr.bf16.mxu0 (!%p220_p3), %v3329_v1  ;;  %v3159_v4 = vld [vmem:[%s4210_s1 + $0x80] sm:$0xff] (!%p220_p3)   ;;  %v3154_v5 = vld [vmem:[%s4210_s1 + $0x18] sm:$0xff] (!%p220_p3)   ;;  %p259_p4 = scmp.lt.s32.totalorder (!%p220_p3), %s2744_s28, 255  ;;  %v3161_v6 = vld [vmem:[%s4210_s1 + $0x88] sm:$0xff] (!%p220_p3)  }
   0x8   : > { %1248 = vmatpush1.bf16.msra.mxu0 (!%p220_p3), %v3151_v0  ;;  %2978 = vmatprep.subr.bf16.mxu1 (!%p220_p3), %v3159_v4  ;;  %v3163_v7 = vld [vmem:[%s4210_s1 + $0x90] sm:$0xff] (!%p220_p3)   ;;  %v3155_v8 = vld [vmem:[%s4210_s1 + $0x20] sm:$0xff] (!%p220_p3)   ;;  %v3165_v9 = vld [vmem:[%s4210_s1 + $0x98] sm:$0xff] (!%p220_p3)  }
   0x9   : > { %1249 = vmatprep.subr.bf16.mxu0 (!%p220_p3), %v3329_v1  ;;  %2979 = vmatpush3.bf16.msra.mxu1 (!%p220_p3), %v3159_v4  ;;  %v3156_v10 = vld [vmem:[%s4210_s1 + $0x28] sm:$0xff] (!%p220_p3)   ;;  %v3167_v11 = vld [vmem:[%s4210_s1 + $0xa0] sm:$0xff] (!%p220_p3)   ;;  %v3157_v12 = vld [vmem:[%s4210_s1 + $0x30] sm:$0xff] (!%p220_p3)  }
   0xa   : > { %2980 = vmatprep.subr.bf16.mxu1 (!%p220_p3), %v3161_v6  ;;  %v3169_v13 = vld [vmem:[%s4210_s1 + $0xa8] sm:$0xff] (!%p220_p3)   ;;  %v3158_v15 = vld [vmem:[%s4210_s1 + $0x38] sm:$0xff] (!%p220_p3)   ;;  %v3171_v17 = vld [vmem:[%s4210_s1 + $0xb0] sm:$0xff] (!%p220_p3)  }
   0xb   : > { %v3160_v18 = vld [vmem:[%s4210_s1 + $0x40] sm:$0xff] (!%p220_p3)   ;;  %v3173_v19 = vld [vmem:[%s4210_s1 + $0xb8] sm:$0xff] (!%p220_p3)   ;;  %v3162_v20 = vld [vmem:[%s4210_s1 + $0x48] sm:$0xff] (!%p220_p3)  }
   0xc   : > { %1250 = vmatpush1.bf16.msra.mxu0 (!%p220_p3), %v3152_v2  ;;  %v3164_v21 = vld [vmem:[%s4210_s1 + $0x50] sm:$0xff] (!%p220_p3)   ;;  %v3166_v24 = vld [vmem:[%s4210_s1 + $0x58] sm:$0xff] (!%p220_p3)   ;;  %v3168_v25 = vld [vmem:[%s4210_s1 + $0x60] sm:$0xff] (!%p220_p3)  }
   0xd   : > { %1251 = vmatprep.subr.bf16.mxu0 (!%p220_p3), %v3329_v1  ;;  %2981 = vmatpush3.bf16.msra.mxu1 (!%p220_p3), %v3161_v6  ;;  %v3170_v28 = vld [vmem:[%s4210_s1 + $0x68] sm:$0xff] (!%p220_p3)   ;;  %v3172_v29 = vld [vmem:[%s4210_s1 + $0x70] sm:$0xff] (!%p220_p3)   ;;  %v3174_v32 = vld [vmem:[%s4210_s1 + $0x78] sm:$0xff] (!%p220_p3)  }
   0xe   : > { %s4220_s28 = smov (!%p259_p4, %s2744_s28), 255  ;;  %2982 = vmatprep.subr.bf16.mxu1 %v3163_v7 }
   0xf   : > { %s3124_s16 = smul.u32 12, %s4220_s28  ;;  %s2747_s14 = sshll.u32 %s4220_s28, 3 }
  0x10   : > { %1252 = vmatpush1.bf16.msra.mxu0 %v3153_v3  ;;  %s4052_s22 = scalar_lea.vmem %s4214_s5, %s2747_s14 }
  0x11   : > { %1253 = vmatprep.subr.bf16.mxu0 %v3329_v1  ;;  %2983 = vmatpush3.bf16.msra.mxu1 %v3163_v7  ;;  %s3427_s26 = scalar_lea.vmem %s4209_s0, %s3124_s16 }
  0x12   : > { %2984 = vmatprep.subr.bf16.mxu1 %v3165_v9  ;;  %v3175_v14 = vld [vmem:[%s3427_s26 + $0x8] ss:$12 sps:$4 sm:$0xff]   ;;  %v3178_v16 = vld [vmem:[%s3427_s26 + $0x4] ss:$12 sps:$4 sm:$0xff]   ;;  %v3179_v22 = vld [vmem:[%s3427_s26 + $0x20] ss:$12 sps:$4 sm:$0xff]  }
  0x13   : > { %2994 = vmatprep.mubr.bf16.mxu1 %v3175_v14  ;;  %1279 = vmatprep.mubr.bf16.mxu0 %v3178_v16  ;;  %v3183_v23 = vld [vmem:[%s3427_s26 + $0x38] ss:$12 sps:$4 sm:$0xff]   ;;  %v3186_v26 = vld [vmem:[%s3427_s26 + $0x50] ss:$12 sps:$4 sm:$0xff]   ;;  %v3191_v27 = vld [vmem:[%s3427_s26 + $0x68] ss:$12 sps:$4 sm:$0xff]  }
  0x14   : > { %1254 = vmatpush1.bf16.msra.mxu0 %v3154_v5  ;;  %v3194_v30 = vld [vmem:[%s3427_s26 + $0x80] ss:$12 sps:$4 sm:$0xff]   ;;  %v3199_v31 = vld [vmem:[%s3427_s26 + $0x98] ss:$12 sps:$4 sm:$0xff]   ;;  %v3180_v34 = vld [vmem:[%s3427_s26 + $0x1c] ss:$12 sps:$4 sm:$0xff]  }
  0x15   : > { %1255 = vmatprep.subr.bf16.mxu0 %v3329_v1  ;;  %2985 = vmatpush3.bf16.msra.mxu1 %v3165_v9  ;;  %v3176_v33 = vld [vmem:[%s3427_s26] ss:$12 sps:$4 sm:$0xff]   ;;  %v3202_v35 = vld [vmem:[%s3427_s26 + $0xb0] ss:$12 sps:$4 sm:$0xff]   ;;  %v3207_v36 = vld [vmem:[%s3427_s26 + $0xc8] ss:$12 sps:$4 sm:$0xff]  }
  0x16   : > { %2986 = vmatprep.subr.bf16.mxu1 %v3167_v11  ;;  %v3182_v37 = vld [vmem:[%s3427_s26 + $0x18] ss:$12 sps:$4 sm:$0xff]   ;;  %v3184_v38 = vld [vmem:[%s3427_s26 + $0x34] ss:$12 sps:$4 sm:$0xff]   ;;  %v3187_v41 = vld [vmem:[%s3427_s26 + $0x30] ss:$12 sps:$4 sm:$0xff]  }
  0x17   : > { %v3210_v39 = vld [vmem:[%s3427_s26 + $0xe0] ss:$12 sps:$4 sm:$0xff]   ;;  %v3215_v40 = vld [vmem:[%s3427_s26 + $0xf8] ss:$12 sps:$4 sm:$0xff]   ;;  %v3218_v43 = vld [vmem:[%s3427_s26 + $0x110] ss:$12 sps:$4 sm:$0xff]  }
  0x18   : > { %1256 = vmatpush1.bf16.msra.mxu0 %v3155_v8  ;;  %v3188_v42 = vld [vmem:[%s3427_s26 + $0x4c] ss:$12 sps:$4 sm:$0xff]   ;;  %v3223_v44 = vld [vmem:[%s3427_s26 + $0x128] ss:$12 sps:$4 sm:$0xff]   ;;  %v3192_v46 = vld [vmem:[%s3427_s26 + $0x64] ss:$12 sps:$4 sm:$0xff]  }
  0x19   : > { %1257 = vmatprep.subr.bf16.mxu0 %v3329_v1  ;;  %2987 = vmatpush3.bf16.msra.mxu1 %v3167_v11  ;;  %v3190_v45 = vld [vmem:[%s3427_s26 + $0x48] ss:$12 sps:$4 sm:$0xff]   ;;  %v3226_v47 = vld [vmem:[%s3427_s26 + $0x140] ss:$12 sps:$4 sm:$0xff]   ;;  %v3231_v48 = vld [vmem:[%s3427_s26 + $0x158] ss:$12 sps:$4 sm:$0xff]  }
  0x1a   : > { %2988 = vmatprep.subr.bf16.mxu1 %v3169_v13  ;;  %v3195_v49 = vld [vmem:[%s3427_s26 + $0x60] ss:$12 sps:$4 sm:$0xff]   ;;  %v3196_v50 = vld [vmem:[%s3427_s26 + $0x7c] ss:$12 sps:$4 sm:$0xff]   ;;  %v3198_v53 = vld [vmem:[%s3427_s26 + $0x78] ss:$12 sps:$4 sm:$0xff]  }
  0x1b   : > { %v3234_v51 = vld [vmem:[%s3427_s26 + $0x170] ss:$12 sps:$4 sm:$0xff]   ;;  %v3239_v52 = vld [vmem:[%s3427_s26 + $0x188] ss:$12 sps:$4 sm:$0xff]   ;;  %v3242_v55 = vld [vmem:[%s3427_s26 + $0x1a0] ss:$12 sps:$4 sm:$0xff]  }
  0x1c   : > { %1258 = vmatpush1.bf16.msra.mxu0 %v3156_v10  ;;  %v3200_v54 = vld [vmem:[%s3427_s26 + $0x94] ss:$12 sps:$4 sm:$0xff]   ;;  %v3247_v56 = vld [vmem:[%s3427_s26 + $0x1b8] ss:$12 sps:$4 sm:$0xff]   ;;  %v3203_v57 = vld [vmem:[%s3427_s26 + $0x90] ss:$12 sps:$4 sm:$0xff]  }
  0x1d   : > { %1259 = vmatprep.subr.bf16.mxu0 %v3329_v1  ;;  %2989 = vmatpush3.bf16.msra.mxu1 %v3169_v13  ;;  %v3204_v58 = vld [vmem:[%s3427_s26 + $0xac] ss:$12 sps:$4 sm:$0xff]   ;;  %v3250_v59 = vld [vmem:[%s3427_s26 + $0x1d0] ss:$12 sps:$4 sm:$0xff]   ;;  %v3255_v60 = vld [vmem:[%s3427_s26 + $0x1e8] ss:$12 sps:$4 sm:$0xff]  }
  0x1e   : > { %2990 = vmatprep.subr.bf16.mxu1 %v3171_v17  ;;  %v3206_v61 = vld [vmem:[%s3427_s26 + $0xa8] ss:$12 sps:$4 sm:$0xff]   ;;  %v3208_v62 = vld [vmem:[%s3427_s26 + $0xc4] ss:$12 sps:$4 sm:$0xff]   ;;  %v3258_v63 = vld [vmem:[%s3427_s26 + $0x200] ss:$12 sps:$4 sm:$0xff]  }
  0x1f   : > { %v3263_v0 = vld [vmem:[%s3427_s26 + $0x218] ss:$12 sps:$4 sm:$0xff]   ;;  %v3212_v2 = vld [vmem:[%s3427_s26 + $0xdc] ss:$12 sps:$4 sm:$0xff]   ;;  %v3216_v6 = vld [vmem:[%s3427_s26 + $0xf4] ss:$12 sps:$4 sm:$0xff]  }
  0x20   : > { %1260 = vmatpush1.bf16.msra.mxu0 %v3157_v12  ;;  %v3266_v3 = vld [vmem:[%s3427_s26 + $0x230] ss:$12 sps:$4 sm:$0xff]   ;;  %v3271_v4 = vld [vmem:[%s3427_s26 + $0x248] ss:$12 sps:$4 sm:$0xff]   ;;  %v3214_v5 = vld [vmem:[%s3427_s26 + $0xd8] ss:$12 sps:$4 sm:$0xff]  }
  0x21   : > { %1261 = vmatprep.subr.bf16.mxu0 %v3329_v1  ;;  %2991 = vmatpush3.bf16.msra.mxu1 %v3171_v17  ;;  %v3274_v7 = vld [vmem:[%s3427_s26 + $0x260] ss:$12 sps:$4 sm:$0xff]   ;;  %v3279_v8 = vld [vmem:[%s3427_s26 + $0x278] ss:$12 sps:$4 sm:$0xff]   ;;  %v3527_v9 = vld [vmem:[%s3427_s26 + $0xf0] ss:$12 sps:$4 sm:$0xff]  }
  0x22   : > { %2992 = vmatprep.subr.bf16.mxu1 %v3173_v19  ;;  %v3530_v10 = vld [vmem:[%s3427_s26 + $0x10c] ss:$12 sps:$4 sm:$0xff]   ;;  %v3533_v11 = vld [vmem:[%s3427_s26 + $0x290] ss:$12 sps:$4 sm:$0xff]   ;;  %v3330_v12 = vmov 0.0  }
  0x23   : > { %287 = vst.msk [vmem:[#allocation2] sm:$0xff] %vm286_vm0, %v3330_v12  ;;  %288 = vst.msk [vmem:[#allocation2 + $0x8] sm:$0xff] %vm286_vm0, %v3330_v12  ;;  %v3222_v13 = vld [vmem:[%s3427_s26 + $0x108] ss:$12 sps:$4 sm:$0xff]   ;;  %v3224_v14 = vld [vmem:[%s3427_s26 + $0x124] ss:$12 sps:$4 sm:$0xff]  }
  0x24   : > { %1262 = vmatpush1.bf16.msra.mxu0 %v3158_v15  ;;  %289 = vst.msk [vmem:[#allocation2 + $0x10] sm:$0xff] %vm286_vm0, %v3330_v12  ;;  %290 = vst.msk [vmem:[#allocation2 + $0x18] sm:$0xff] %vm286_vm0, %v3330_v12  ;;  %v3227_v15 = vld [vmem:[%s3427_s26 + $0x120] ss:$12 sps:$4 sm:$0xff]   ;;  %v3287_v16 = vld [vmem:[%s3427_s26 + $0x2a8] ss:$12 sps:$4 sm:$0xff]  }
  0x25   : > { %1263 = vmatprep.subr.bf16.mxu0 %v3329_v1  ;;  %2993 = vmatpush3.bf16.msra.mxu1 %v3173_v19  ;;  %291 = vst.msk [vmem:[#allocation2 + $0x20] sm:$0xff] %vm286_vm0, %v3330_v12  ;;  %292 = vst.msk [vmem:[#allocation2 + $0x28] sm:$0xff] %vm286_vm0, %v3330_v12  ;;  %v3228_v17 = vld [vmem:[%s3427_s26 + $0x13c] ss:$12 sps:$4 sm:$0xff]   ;;  %v3230_v19 = vld [vmem:[%s3427_s26 + $0x138] ss:$12 sps:$4 sm:$0xff]  }
  0x26   : > { %293 = vst.msk [vmem:[#allocation2 + $0x30] sm:$0xff] %vm286_vm0, %v3330_v12  ;;  %294 = vst.msk [vmem:[#allocation2 + $0x38] sm:$0xff] %vm286_vm0, %v3330_v12 }
  0x27   : > { %295 = vst.msk [vmem:[#allocation2 + $0x40] sm:$0xff] %vm286_vm0, %v3330_v12  ;;  %296 = vst.msk [vmem:[#allocation2 + $0x48] sm:$0xff] %vm286_vm0, %v3330_v12 }
  0x28   : > { %1264 = vmatpush1.bf16.msra.mxu0 %v3160_v18  ;;  %2995 = vmatmul.mubr.bf16.vlgmr.msra.gmra.mrb[0].mxu1 %v3179_v22  ;;  %297 = vst.msk [vmem:[#allocation2 + $0x50] sm:$0xff] %vm286_vm0, %v3330_v12  ;;  %298 = vst.msk [vmem:[#allocation2 + $0x58] sm:$0xff] %vm286_vm0, %v3330_v12  ;;  %v3290_v18 = vld [vmem:[%s3427_s26 + $0x2c0] ss:$12 sps:$4 sm:$0xff]   ;;  %v3295_v22 = vld [vmem:[%s3427_s26 + $0x2f0] ss:$12 sps:$4 sm:$0xff]  }
  0x29   : > { %1265 = vmatprep.subr.bf16.mxu0 %v3329_v1  ;;  %2998 = vmatprep.mubr.bf16.mxu1 %v3183_v23  ;;  %299 = vst.msk [vmem:[#allocation2 + $0x60] sm:$0xff] %vm286_vm0, %v3330_v12  ;;  %300 = vst.msk [vmem:[#allocation2 + $0x68] sm:$0xff] %vm286_vm0, %v3330_v12  ;;  %v3296_v23 = vld [vmem:[%s4212_s3] sm:$0xff]  }
  0x2a   : > { %301 = vst.msk [vmem:[#allocation2 + $0x70] sm:$0xff] %vm286_vm0, %v3330_v12  ;;  %302 = vst.msk [vmem:[#allocation2 + $0x78] sm:$0xff] %vm286_vm0, %v3330_v12  ;;  %3058 = vmatprep.subr.bf16.mxu1 %v3296_v23 }
  0x2b   : > { %303 = vst.msk [vmem:[#allocation2 + $0x80] sm:$0xff] %vm286_vm0, %v3330_v12  ;;  %304 = vst.msk [vmem:[#allocation2 + $0x88] sm:$0xff] %vm286_vm0, %v3330_v12  ;;  %3059 = vmatpush3.bf16.msra.mxu1 %v3296_v23  ;;  %v3738_v23 = vld [vmem:[%s4211_s2] ss:$0 sm:$0xff] }
  0x2c   : > { %1266 = vmatpush1.bf16.msra.mxu0 %v3162_v20  ;;  %305 = vst.msk [vmem:[#allocation2 + $0x90] sm:$0xff] %vm286_vm0, %v3330_v12  ;;  %306 = vst.msk [vmem:[#allocation2 + $0x98] sm:$0xff] %vm286_vm0, %v3330_v12  ;;  %v3292_v20 = vld [vmem:[%s3427_s26 + $0x2d8] ss:$12 sps:$4 sm:$0xff]  }
  0x2d   : > { %1267 = vmatprep.subr.bf16.mxu0 %v3329_v1  ;;  %307 = vst.msk [vmem:[#allocation2 + $0xa0] sm:$0xff] %vm286_vm0, %v3330_v12  ;;  %308 = vst.msk [vmem:[#allocation2 + $0xa8] sm:$0xff] %vm286_vm0, %v3330_v12 }
  0x2e   : > { %309 = vst.msk [vmem:[#allocation2 + $0xb0] sm:$0xff] %vm286_vm0, %v3330_v12  ;;  %310 = vst.msk [vmem:[#allocation2 + $0xb8] sm:$0xff] %vm286_vm0, %v3330_v12 }
  0x2f   : > { %311 = vst.msk [vmem:[#allocation2 + $0xc0] sm:$0xff] %vm286_vm0, %v3330_v12  ;;  %312 = vst.msk [vmem:[#allocation2 + $0xc8] sm:$0xff] %vm286_vm0, %v3330_v12 }
  0x30   : > { %1268 = vmatpush1.bf16.msra.mxu0 %v3164_v21  ;;  %2999 = vmatmul.mubr.bf16.gmra.mrb[4].mxu1 %v3186_v26  ;;  %313 = vst.msk [vmem:[#allocation2 + $0xd0] sm:$0xff] %vm286_vm0, %v3330_v12  ;;  %314 = vst.msk [vmem:[#allocation2 + $0xd8] sm:$0xff] %vm286_vm0, %v3330_v12  ;;  %v3232_v21 = vld [vmem:[%s3427_s26 + $0x154] ss:$12 sps:$4 sm:$0xff]  }
  0x31   : > { %1269 = vmatprep.subr.bf16.mxu0 %v3329_v1  ;;  %3002 = vmatprep.mubr.bf16.mxu1 %v3191_v27  ;;  %315 = vst.msk [vmem:[#allocation2 + $0xe0] sm:$0xff] %vm286_vm0, %v3330_v12  ;;  %316 = vst.msk [vmem:[#allocation2 + $0xe8] sm:$0xff] %vm286_vm0, %v3330_v12  ;;  %v3238_v26 = vld [vmem:[%s3427_s26 + $0x168] ss:$12 sps:$4 sm:$0xff]   ;;  %v3240_v27 = vld [vmem:[%s3427_s26 + $0x184] ss:$12 sps:$4 sm:$0xff]  }
  0x32   : > { %317 = vst.msk [vmem:[#allocation2 + $0xf0] sm:$0xff] %vm286_vm0, %v3330_v12  ;;  %318 = vst.msk [vmem:[#allocation2 + $0xf8] sm:$0xff] %vm286_vm0, %v3330_v12 }
  0x33   : > { %319 = vst.msk [vmem:[#allocation2 + $0x100] sm:$0xff] %vm286_vm0, %v3330_v12  ;;  %320 = vst.msk [vmem:[#allocation2 + $0x108] sm:$0xff] %vm286_vm0, %v3330_v12 }
  0x34   : > { %1270 = vmatpush1.bf16.msra.mxu0 %v3166_v24  ;;  %321 = vst.msk [vmem:[#allocation2 + $0x110] sm:$0xff] %vm286_vm0, %v3330_v12  ;;  %322 = vst.msk [vmem:[#allocation2 + $0x118] sm:$0xff] %vm286_vm0, %v3330_v12  ;;  %v3235_v24 = vld [vmem:[%s3427_s26 + $0x150] ss:$12 sps:$4 sm:$0xff]  }
  0x35   : > { %1271 = vmatprep.subr.bf16.mxu0 %v3329_v1  ;;  %323 = vst.msk [vmem:[#allocation2 + $0x120] sm:$0xff] %vm286_vm0, %v3330_v12  ;;  %324 = vst.msk [vmem:[#allocation2 + $0x128] sm:$0xff] %vm286_vm0, %v3330_v12 }
  0x36   : > { %325 = vst.msk [vmem:[#allocation2 + $0x130] sm:$0xff] %vm286_vm0, %v3330_v12  ;;  %326 = vst.msk [vmem:[#allocation2 + $0x138] sm:$0xff] %vm286_vm0, %v3330_v12 }
  0x37   : > { %327 = vst.msk [vmem:[#allocation2 + $0x140] sm:$0xff] %vm286_vm0, %v3330_v12  ;;  %328 = vst.msk [vmem:[#allocation2 + $0x148] sm:$0xff] %vm286_vm0, %v3330_v12 }
  0x38   : > { %1272 = vmatpush1.bf16.msra.mxu0 %v3168_v25  ;;  %3003 = vmatmul.mubr.bf16.gmra.mrb[8].mxu1 %v3194_v30  ;;  %329 = vst.msk [vmem:[#allocation2 + $0x150] sm:$0xff] %vm286_vm0, %v3330_v12  ;;  %330 = vst.msk [vmem:[#allocation2 + $0x158] sm:$0xff] %vm286_vm0, %v3330_v12  ;;  %v3236_v25 = vld [vmem:[%s3427_s26 + $0x16c] ss:$12 sps:$4 sm:$0xff]  }
  0x39   : > { %1273 = vmatprep.subr.bf16.mxu0 %v3329_v1  ;;  %3006 = vmatprep.mubr.bf16.mxu1 %v3199_v31  ;;  %331 = vst.msk [vmem:[#allocation2 + $0x160] sm:$0xff] %vm286_vm0, %v3330_v12  ;;  %332 = vst.msk [vmem:[#allocation2 + $0x168] sm:$0xff] %vm286_vm0, %v3330_v12  ;;  %v3246_v30 = vld [vmem:[%s3427_s26 + $0x198] ss:$12 sps:$4 sm:$0xff]   ;;  %v3248_v31 = vld [vmem:[%s3427_s26 + $0x1b4] ss:$12 sps:$4 sm:$0xff]  }
  0x3a   : > { %333 = vst.msk [vmem:[#allocation2 + $0x170] sm:$0xff] %vm286_vm0, %v3330_v12  ;;  %334 = vst.msk [vmem:[#allocation2 + $0x178] sm:$0xff] %vm286_vm0, %v3330_v12 }
  0x3b   : > { %335 = vst.msk [vmem:[#allocation2 + $0x180] sm:$0xff] %vm286_vm0, %v3330_v12  ;;  %336 = vst.msk [vmem:[#allocation2 + $0x188] sm:$0xff] %vm286_vm0, %v3330_v12 }
  0x3c   : > { %1274 = vmatpush1.bf16.msra.mxu0 %v3170_v28  ;;  %337 = vst.msk [vmem:[#allocation2 + $0x190] sm:$0xff] %vm286_vm0, %v3330_v12  ;;  %338 = vst.msk [vmem:[#allocation2 + $0x198] sm:$0xff] %vm286_vm0, %v3330_v12  ;;  %v3243_v28 = vld [vmem:[%s3427_s26 + $0x180] ss:$12 sps:$4 sm:$0xff]  }
  0x3d   : > { %1275 = vmatprep.subr.bf16.mxu0 %v3329_v1  ;;  %339 = vst.msk [vmem:[#allocation2 + $0x1a0] sm:$0xff] %vm286_vm0, %v3330_v12  ;;  %340 = vst.msk [vmem:[#allocation2 + $0x1a8] sm:$0xff] %vm286_vm0, %v3330_v12 }
  0x3e   : > { %341 = vst.msk [vmem:[#allocation2 + $0x1b0] sm:$0xff] %vm286_vm0, %v3330_v12  ;;  %342 = vst.msk [vmem:[#allocation2 + $0x1b8] sm:$0xff] %vm286_vm0, %v3330_v12 }
  0x3f   : > { %343 = vst.msk [vmem:[#allocation2 + $0x1c0] sm:$0xff] %vm286_vm0, %v3330_v12  ;;  %344 = vst.msk [vmem:[#allocation2 + $0x1c8] sm:$0xff] %vm286_vm0, %v3330_v12 }
  0x40   : > { %1276 = vmatpush1.bf16.msra.mxu0 %v3172_v29  ;;  %3007 = vmatmul.mubr.bf16.gmra.mrb[12].mxu1 %v3202_v35  ;;  %345 = vst.msk [vmem:[#allocation2 + $0x1d0] sm:$0xff] %vm286_vm0, %v3330_v12  ;;  %346 = vst.msk [vmem:[#allocation2 + $0x1d8] sm:$0xff] %vm286_vm0, %v3330_v12  ;;  %v3244_v29 = vld [vmem:[%s3427_s26 + $0x19c] ss:$12 sps:$4 sm:$0xff]   ;;  %v3256_v35 = vld [vmem:[%s3427_s26 + $0x1e4] ss:$12 sps:$4 sm:$0xff]  }
  0x41   : > { %1277 = vmatprep.subr.bf16.mxu0 %v3329_v1  ;;  %3010 = vmatprep.mubr.bf16.mxu1 %v3207_v36  ;;  %v3211_v1 = vld [vmem:[%s3427_s26 + $0xc0] ss:$12 sps:$4 sm:$0xff]   ;;  %347 = vst.msk [vmem:[#allocation2 + $0x1e0] sm:$0xff] %vm286_vm0, %v3330_v12  ;;  %348 = vst.msk [vmem:[#allocation2 + $0x1e8] sm:$0xff] %vm286_vm0, %v3330_v12 }
  0x42   : > { %349 = vst.msk [vmem:[#allocation2 + $0x1f0] sm:$0xff] %vm286_vm0, %v3330_v12  ;;  %350 = vst.msk [vmem:[#allocation2 + $0x1f8] sm:$0xff] %vm286_vm0, %v3330_v12  ;;  %v3259_v36 = vld [vmem:[%s3427_s26 + $0x1e0] ss:$12 sps:$4 sm:$0xff]  }
  0x44   : > { %1278 = vmatpush1.bf16.msra.mxu0 %v3174_v32  ;;  %v3251_v32 = vld [vmem:[%s3427_s26 + $0x1b0] ss:$12 sps:$4 sm:$0xff]  }
  0x47   : > { %1280 = vmatmul.mubr.bf16.vlgmr.msra.gmra.mrb[0].mxu0 %v3176_v33  ;;  %v3252_v33 = vld [vmem:[%s3427_s26 + $0x1cc] ss:$12 sps:$4 sm:$0xff]  }
  0x48   : > { %1287 = vmatprep.mubr.bf16.mxu0 %v3180_v34  ;;  %3011 = vmatmul.mubr.bf16.gmra.mrb[16].mxu1 %v3210_v39  ;;  %v3254_v34 = vld [vmem:[%s3427_s26 + $0x1c8] ss:$12 sps:$4 sm:$0xff]  }
  0x49   : > { %3014 = vmatprep.mubr.bf16.mxu1 %v3215_v40  ;;  %v3264_v39 = vld [vmem:[%s3427_s26 + $0x214] ss:$12 sps:$4 sm:$0xff]   ;;  %v3267_v40 = vld [vmem:[%s3427_s26 + $0x210] ss:$12 sps:$4 sm:$0xff]  }
  0x4f   : > { %1288 = vmatmul.mubr.bf16.gmra.mrb[4].mxu0 %v3182_v37  ;;  %v3260_v37 = vld [vmem:[%s3427_s26 + $0x1fc] ss:$12 sps:$4 sm:$0xff]  }
  0x50   : > { %1295 = vmatprep.mubr.bf16.mxu0 %v3184_v38  ;;  %3015 = vmatmul.mubr.bf16.gmra.mrb[20].mxu1 %v3218_v43  ;;  %v3262_v38 = vld [vmem:[%s3427_s26 + $0x1f8] ss:$12 sps:$4 sm:$0xff]  }
  0x51   : > { %3018 = vmatprep.mubr.bf16.mxu1 %v3223_v44  ;;  %v3272_v43 = vld [vmem:[%s3427_s26 + $0x244] ss:$12 sps:$4 sm:$0xff]   ;;  %v3275_v44 = vld [vmem:[%s3427_s26 + $0x240] ss:$12 sps:$4 sm:$0xff]  }
  0x57   : > { %1296 = vmatmul.mubr.bf16.gmra.mrb[8].mxu0 %v3187_v41  ;;  %v3268_v41 = vld [vmem:[%s3427_s26 + $0x22c] ss:$12 sps:$4 sm:$0xff]  }
  0x58   : > { %1303 = vmatprep.mubr.bf16.mxu0 %v3188_v42  ;;  %3019 = vmatmul.mubr.bf16.gmra.mrb[24].mxu1 %v3226_v47  ;;  %v3270_v42 = vld [vmem:[%s3427_s26 + $0x228] ss:$12 sps:$4 sm:$0xff]  }
  0x59   : > { %3022 = vmatprep.mubr.bf16.mxu1 %v3231_v48 }
  0x5f   : > { %1304 = vmatmul.mubr.bf16.gmra.mrb[12].mxu0 %v3190_v45 }
  0x60   : > { %1311 = vmatprep.mubr.bf16.mxu0 %v3192_v46  ;;  %3023 = vmatmul.mubr.bf16.gmra.mrb[28].mxu1 %v3234_v51  ;;  %v3276_v46 = vld [vmem:[%s3427_s26 + $0x25c] ss:$12 sps:$4 sm:$0xff]  }
  0x61   : > { %3026 = vmatprep.mubr.bf16.mxu1 %v3239_v52  ;;  %v3280_v52 = vld [vmem:[%s3427_s26 + $0x274] ss:$12 sps:$4 sm:$0xff]  }
  0x67   : > { %1312 = vmatmul.mubr.bf16.gmra.mrb[16].mxu0 %v3195_v49 }
  0x68   : > { %1319 = vmatprep.mubr.bf16.mxu0 %v3196_v50  ;;  %3027 = vmatmul.mubr.bf16.gmra.mrb[32].mxu1 %v3242_v55  ;;  %v3278_v50 = vld [vmem:[%s3427_s26 + $0x258] ss:$12 sps:$4 sm:$0xff]  }
  0x69   : > { %3030 = vmatprep.mubr.bf16.mxu1 %v3247_v56  ;;  %v3283_v56 = vld [vmem:[%s3427_s26 + $0x270] ss:$12 sps:$4 sm:$0xff]  }
  0x6f   : > { %1320 = vmatmul.mubr.bf16.gmra.mrb[20].mxu0 %v3198_v53 }
  0x70   : > { %1327 = vmatprep.mubr.bf16.mxu0 %v3200_v54  ;;  %3031 = vmatmul.mubr.bf16.gmra.mrb[36].mxu1 %v3250_v59 }
  0x71   : > { %3034 = vmatprep.mubr.bf16.mxu1 %v3255_v60 }
  0x77   : > { %1328 = vmatmul.mubr.bf16.gmra.mrb[24].mxu0 %v3203_v57 }
  0x78   : > { %1335 = vmatprep.mubr.bf16.mxu0 %v3204_v58  ;;  %3035 = vmatmul.mubr.bf16.gmra.mrb[40].mxu1 %v3258_v63  ;;  %v3284_v58 = vld [vmem:[%s3427_s26 + $0x28c] ss:$12 sps:$4 sm:$0xff]   ;;  %v351_v63 = vld [vmem:[#allocation2] sm:$0xff] }
  0x79   : > { %3038 = vmatprep.mubr.bf16.mxu1 %v3263_v0 }
  0x7f   : > { %1336 = vmatmul.mubr.bf16.gmra.mrb[28].mxu0 %v3206_v61 }
  0x80   : > { %1343 = vmatprep.mubr.bf16.mxu0 %v3208_v62  ;;  %3039 = vmatmul.mubr.bf16.gmra.mrb[44].mxu1 %v3266_v3 }
  0x81   : > { %3042 = vmatprep.mubr.bf16.mxu1 %v3271_v4 }
  0x87   : > { %1344 = vmatmul.mubr.bf16.gmra.mrb[32].mxu0 %v3211_v1 }
  0x88   : > { %1351 = vmatprep.mubr.bf16.mxu0 %v3212_v2  ;;  %3043 = vmatmul.mubr.bf16.gmra.mrb[48].mxu1 %v3274_v7  ;;  %v3286_v2 = vld [vmem:[%s3427_s26 + $0x288] ss:$12 sps:$4 sm:$0xff]  }
  0x89   : > { %3046 = vmatprep.mubr.bf16.mxu1 %v3279_v8 }
  0x8f   : > { %1352 = vmatmul.mubr.bf16.gmra.mrb[36].mxu0 %v3214_v5  ;;  %v352_v5 = vld [vmem:[#allocation2 + $0x8] sm:$0xff] }
  0x90   : > { %1359 = vmatprep.mubr.bf16.mxu0 %v3216_v6  ;;  %3047 = vmatmul.mubr.bf16.gmra.mrb[52].mxu1 %v3533_v11  ;;  %v3288_v6 = vld [vmem:[%s3427_s26 + $0x2a4] ss:$12 sps:$4 sm:$0xff]  }
  0x91   : > { %3050 = vmatprep.mubr.bf16.mxu1 %v3287_v16 }
  0x97   : > { %1360 = vmatmul.mubr.bf16.gmra.mrb[40].mxu0 %v3527_v9 }
  0x98   : > { %1367 = vmatprep.mubr.bf16.mxu0 %v3530_v10  ;;  %3051 = vmatmul.mubr.bf16.gmra.mrb[56].mxu1 %v3290_v18  ;;  %v354_v18 = vld [vmem:[#allocation2 + $0x18] sm:$0xff] }
  0x99   : > { %3054 = vmatprep.mubr.bf16.mxu1 %v3292_v20 }
  0x9f   : > { %1368 = vmatmul.mubr.bf16.gmra.mrb[44].mxu0 %v3222_v13 }
  0xa0   : > { %1375 = vmatprep.mubr.bf16.mxu0 %v3224_v14  ;;  %3055 = vmatmul.mubr.bf16.gmra.mrb[60].mxu1 %v3295_v22  ;;  %v353_v14 = vld [vmem:[#allocation2 + $0x10] sm:$0xff]  ;;  %v3293_v22 = vld [vmem:[%s3427_s26 + $0x2bc] ss:$12 sps:$4 sm:$0xff]  }
  0xa7   : > { %1376 = vmatmul.mubr.bf16.gmra.mrb[48].mxu0 %v3227_v15 }
  0xa8   : > { %1383 = vmatprep.mubr.bf16.mxu0 %v3228_v17 }
  0xaf   : > { %1384 = vmatmul.mubr.bf16.gmra.mrb[52].mxu0 %v3230_v19  ;;  %v3291_v19 = vld [vmem:[%s3427_s26 + $0x2a0] ss:$12 sps:$4 sm:$0xff]  }
  0xb0   : > { %1391 = vmatprep.mubr.bf16.mxu0 %v3232_v21 }
  0xb7   : > { %1392 = vmatmul.mubr.bf16.gmra.mrb[56].mxu0 %v3235_v24 }
  0xb8   : > { %1399 = vmatprep.mubr.bf16.mxu0 %v3236_v25 }
  0xbf   : > { %1400 = vmatmul.mubr.bf16.gmra.mrb[60].mxu0 %v3238_v26 }
  0xc0   : > { %1407 = vmatprep.mubr.bf16.mxu0 %v3240_v27 }
  0xc7   : > { %1408 = vmatmul.mubr.bf16.gmra.mrb[64].mxu0 %v3243_v28 }
  0xc8   : > { %1415 = vmatprep.mubr.bf16.mxu0 %v3244_v29 }
  0xcf   : > { %1416 = vmatmul.mubr.bf16.gmra.mrb[68].mxu0 %v3246_v30 }
  0xd0   : > { %1423 = vmatprep.mubr.bf16.mxu0 %v3248_v31 }
  0xd7   : > { %1424 = vmatmul.mubr.bf16.gmra.mrb[72].mxu0 %v3251_v32 }
  0xd8   : > { %1431 = vmatprep.mubr.bf16.mxu0 %v3252_v33 }
  0xdf   : > { %1432 = vmatmul.mubr.bf16.gmra.mrb[76].mxu0 %v3254_v34 }
  0xe0   : > { %1439 = vmatprep.mubr.bf16.mxu0 %v3256_v35 }
  0xe7   : > { %1440 = vmatmul.mubr.bf16.gmra.mrb[80].mxu0 %v3259_v36  ;;  %v355_v36 = vld [vmem:[#allocation2 + $0x20] sm:$0xff] }
  0xe8   : > { %1447 = vmatprep.mubr.bf16.mxu0 %v3260_v37 }
  0xef   : > { %1448 = vmatmul.mubr.bf16.gmra.mrb[84].mxu0 %v3262_v38 }
  0xf0   : > { %1455 = vmatprep.mubr.bf16.mxu0 %v3264_v39  ;;  %v3297_v39 = vld [vmem:[%s3427_s26 + $0x2b8] ss:$12 sps:$4 sm:$0xff]  }
  0xf7   : > { %1456 = vmatmul.mubr.bf16.gmra.mrb[88].mxu0 %v3267_v40 }
  0xf8   : > { %1463 = vmatprep.mubr.bf16.mxu0 %v3268_v41 }
  0xfb   : > { %v2996_v45 = vpop.f32.mrb[0].mxu1 }
  0xfc   : > { %v1570_v47 = vpop.f32.mrb[1].mxu1 }
  0xfd   : > { %v2997_v48 = vpop.f32.mrb[2].mxu1 }
  0xfe   : > { %v1573_v49 = vpop.f32.mrb[3].mxu1 }
  0xff   : > { %1464 = vmatmul.mubr.bf16.gmra.mrb[92].mxu0 %v3270_v42 }
 0x100   : > { %1471 = vmatprep.mubr.bf16.mxu0 %v3272_v43 }
 0x103   : > { %v3702_v51 = vpop.f32.mrb[4].mxu1 }
 0x104   : > { %v1586_v53 = vpop.f32.mrb[5].mxu1 }
 0x105   : > { %v3705_v54 = vpop.f32.mrb[6].mxu1 }
 0x106   : > { %v3707_v55 = vpop.f32.mrb[7].mxu1 }
 0x107   : > { %1472 = vmatmul.mubr.bf16.gmra.mrb[96].mxu0 %v3275_v44  ;;  %v356_v44 = vld [vmem:[#allocation2 + $0x28] sm:$0xff] }
 0x108   : > { %1479 = vmatprep.mubr.bf16.mxu0 %v3276_v46 }
 0x10b   : > { %v3710_v57 = vpop.f32.mrb[8].mxu1 }
 0x10c   : > { %v3713_v59 = vpop.f32.mrb[9].mxu1 }
 0x10d   : > { %v3715_v60 = vpop.f32.mrb[10].mxu1 }
 0x10e   : > { %v3717_v61 = vpop.f32.mrb[11].mxu1 }
 0x10f   : > { %1480 = vmatmul.mubr.bf16.gmra.mrb[100].mxu0 %v3278_v50 }
 0x110   : > { %1487 = vmatprep.mubr.bf16.mxu0 %v3280_v52 }
 0x113   : > { %v3720_v3 = vpop.f32.mrb[12].mxu1 }
 0x114   : > { %v3723_v7 = vpop.f32.mrb[13].mxu1 }
 0x115   : > { %v3725_v11 = vpop.f32.mrb[14].mxu1 }
 0x116   : > { %v3727_v12 = vpop.f32.mrb[15].mxu1 }
 0x117   : > { %1488 = vmatmul.mubr.bf16.gmra.mrb[104].mxu0 %v3283_v56 }
 0x118   : > { %1495 = vmatprep.mubr.bf16.mxu0 %v3284_v58 }
 0x11a   : > { %v1281_v62 = vpop.f32.mrb[0].mxu0 }
 0x11b   : > { %v1571_v0 = vadd.f32 %v1570_v47, %v1281_v62  ;;  %v1283_v1 = vpop.f32.mrb[1].mxu0  ;;  %v3732_v20 = vpop.f32.mrb[16].mxu1 }
 0x11c   : > { %v1284_v4 = vpop.f32.mrb[2].mxu0  ;;  %v3740_v24 = vpop.f32.mrb[17].mxu1 }
 0x11d   : > { %v1825_v8 = vadd.f32 %v1571_v0, %v351_v63  ;;  %v1574_v9 = vadd.f32 %v1573_v49, %v1284_v4  ;;  %v1286_v10 = vpop.f32.mrb[3].mxu0  ;;  %v3742_v28 = vpop.f32.mrb[18].mxu1  ;;  %v357_v0 = vld [vmem:[#allocation2 + $0x30] sm:$0xff] }
 0x11e   : > { %v3744_v30 = vpop.f32.mrb[19].mxu1  ;;  %v358_v10 = vld [vmem:[#allocation2 + $0x38] sm:$0xff] }
 0x11f   : > { %1890 = vst.msk [vmem:[#allocation2] sm:$0xff] %vm286_vm0, %v1825_v8  ;;  %v1826_v13 = vadd.f32 %v1574_v9, %v352_v5  ;;  %1496 = vmatmul.mubr.bf16.gmra.mrb[108].mxu0 %v3286_v2  ;;  %v3300_v5 = vld [vmem:[%s3427_s26 + $0x2d0] ss:$12 sps:$4 sm:$0xff]  }
 0x120   : > { %1503 = vmatprep.mubr.bf16.mxu0 %v3288_v6 }
 0x121   : > { %1891 = vst.msk [vmem:[#allocation2 + $0x8] sm:$0xff] %vm286_vm0, %v1826_v13 }
 0x122   : > { %v1289_v15 = vpop.f32.mrb[4].mxu0 }
 0x123   : > { %v1579_v16 = vadd.f32 %v2996_v45, %v1289_v15  ;;  %v1291_v17 = vpop.f32.mrb[5].mxu0  ;;  %v3751_v42 = vpop.f32.mrb[20].mxu1  ;;  %v3298_v45 = vld [vmem:[%s3427_s26 + $0x2d4] ss:$12 sps:$4 sm:$0xff]  }
 0x124   : > { %v1292_v21 = vpop.f32.mrb[6].mxu0  ;;  %v3754_v46 = vpop.f32.mrb[21].mxu1 }
 0x125   : > { %v1827_v25 = vadd.f32 %v1579_v16, %v353_v14  ;;  %v1582_v26 = vadd.f32 %v2997_v48, %v1292_v21  ;;  %v1294_v27 = vpop.f32.mrb[7].mxu0  ;;  %v3757_v52 = vpop.f32.mrb[22].mxu1  ;;  %v3301_v14 = vld [vmem:[%s3427_s26 + $0x2ec] ss:$12 sps:$4 sm:$0xff]  }
 0x126   : > { %v1957_v29 = vld [vmem:[#allocation2] sm:$0xff]  ;;  %v3759_v56 = vpop.f32.mrb[23].mxu1 }
 0x127   : > { %1892 = vst.msk [vmem:[#allocation2 + $0x10] sm:$0xff] %vm286_vm0, %v1827_v25  ;;  %v1828_v31 = vadd.f32 %v1582_v26, %v354_v18  ;;  %1504 = vmatmul.mubr.bf16.gmra.mrb[112].mxu0 %v3291_v19  ;;  %v2028_v32 = vadd.f32 %v3738_v23, %v1957_v29 }
 0x128   : > { %1511 = vmatprep.mubr.bf16.mxu0 %v3293_v22  ;;  %v1958_v33 = vld [vmem:[#allocation2 + $0x8] sm:$0xff] }
 0x129   : > { %1893 = vst.msk [vmem:[#allocation2 + $0x18] sm:$0xff] %vm286_vm0, %v1828_v31  ;;  %v2029_v34 = vadd.f32 %v3738_v23, %v1958_v33  ;;  %v2092_v40 = vmax.f32 %v2028_v32, 0.0  ;;  %v359_v31 = vld [vmem:[#allocation2 + $0x40] sm:$0xff] }
 0x12a   : > { %v1297_v35 = vpop.f32.mrb[8].mxu0 }
 0x12b   : > { %v1587_v37 = vadd.f32 %v1586_v53, %v1297_v35  ;;  %v1299_v38 = vpop.f32.mrb[9].mxu0  ;;  %v2093_v41 = vmax.f32 %v2029_v34, 0.0  ;;  %v3768_v9 = vpop.f32.mrb[24].mxu1  ;;  %v3303_v34 = vld [vmem:[%s3427_s26 + $0x2e8] ss:$12 sps:$4 sm:$0xff]  }
 0x12c   : > { %v1300_v43 = vpop.f32.mrb[10].mxu0  ;;  %v3771_v15 = vpop.f32.mrb[25].mxu1 }
 0x12d   : > { %v1829_v47 = vadd.f32 %v1587_v37, %v355_v36  ;;  %v1590_v48 = vadd.f32 %v3707_v55, %v1300_v43  ;;  %v1302_v49 = vpop.f32.mrb[11].mxu0  ;;  %v2156_v50 = vpack.c.bf16 %v2093_v41, %v2092_v40  ;;  %v3774_v21 = vpop.f32.mrb[26].mxu1 }
 0x12e   : > { %v1959_v53 = vld [vmem:[#allocation2 + $0x10] sm:$0xff]  ;;  %v3776_v22 = vpop.f32.mrb[27].mxu1 }
 0x12f   : > { %1894 = vst.msk [vmem:[#allocation2 + $0x20] sm:$0xff] %vm286_vm0, %v1829_v47  ;;  %v1830_v58 = vadd.f32 %v1590_v48, %v356_v44  ;;  %1512 = vmatmul.mubr.bf16.gmra.mrb[116].mxu0 %v3297_v39  ;;  %3060 = vmatprep.mubr.msk.bf16.mxu1 %vm286_vm0, %v2156_v50  ;;  %v2030_v62 = vadd.f32 %v3738_v23, %v1959_v53  ;;  %v360_v39 = vld [vmem:[#allocation2 + $0x48] sm:$0xff] }
 0x130   : > { %1519 = vmatprep.mubr.bf16.mxu0 %v3298_v45  ;;  %v1960_v63 = vld [vmem:[#allocation2 + $0x18] sm:$0xff] }
 0x131   : > { %1895 = vst.msk [vmem:[#allocation2 + $0x28] sm:$0xff] %vm286_vm0, %v1830_v58  ;;  %v2031_v55 = vadd.f32 %v3738_v23, %v1960_v63  ;;  %v2094_v6 = vmax.f32 %v2030_v62, 0.0  ;;  %v361_v58 = vld [vmem:[#allocation2 + $0x50] sm:$0xff] }
 0x132   : > { %v1305_v1 = vpop.f32.mrb[12].mxu0 }
 0x133   : > { %v1595_v2 = vadd.f32 %v3702_v51, %v1305_v1  ;;  %v1307_v4 = vpop.f32.mrb[13].mxu0  ;;  %v2095_v8 = vmax.f32 %v2031_v55, 0.0  ;;  %v3785_v37 = vpop.f32.mrb[28].mxu1 }
 0x134   : > { %v1308_v13 = vpop.f32.mrb[14].mxu0  ;;  %v3787_v40 = vpop.f32.mrb[29].mxu1  ;;  %v362_v4 = vld [vmem:[#allocation2 + $0x58] sm:$0xff] }
 0x135   : > { %v1831_v16 = vadd.f32 %v1595_v2, %v357_v0  ;;  %v1598_v17 = vadd.f32 %v3705_v54, %v1308_v13  ;;  %v1310_v18 = vpop.f32.mrb[15].mxu0  ;;  %v2157_v19 = vpack.c.bf16 %v2095_v8, %v2094_v6  ;;  %v3790_v47 = vpop.f32.mrb[30].mxu1 }
 0x136   : > { %v1961_v51 = vld [vmem:[#allocation2 + $0x20] sm:$0xff]  ;;  %v3792_v49 = vpop.f32.mrb[31].mxu1 }
 0x137   : > { %1896 = vst.msk [vmem:[#allocation2 + $0x30] sm:$0xff] %vm286_vm0, %v1831_v16  ;;  %v1832_v25 = vadd.f32 %v1598_v17, %v358_v10  ;;  %1520 = vmatmul.mubr.bf16.gmra.mrb[120].mxu0 %v3300_v5  ;;  %3061 = vmatmul.mubr.msk.bf16.vlgmr.msra.gmra.mrb[64].mxu1 %vm286_vm0, %v2157_v19  ;;  %v2032_v26 = vadd.f32 %v3738_v23, %v1961_v51 }
 0x138   : > { %1527 = vmatprep.mubr.bf16.mxu0 %v3301_v14  ;;  %v1962_v27 = vld [vmem:[#allocation2 + $0x28] sm:$0xff] }
 0x139   : > { %1897 = vst.msk [vmem:[#allocation2 + $0x38] sm:$0xff] %vm286_vm0, %v1832_v25  ;;  %v2033_v54 = vadd.f32 %v3738_v23, %v1962_v27  ;;  %v2096_v35 = vmax.f32 %v2032_v26, 0.0  ;;  %v363_v26 = vld [vmem:[#allocation2 + $0x60] sm:$0xff] }
 0x13a   : > { %v1313_v29 = vpop.f32.mrb[16].mxu0 }
 0x13b   : > { %v1603_v32 = vadd.f32 %v3713_v59, %v1313_v29  ;;  %v1315_v33 = vpop.f32.mrb[17].mxu0  ;;  %v2097_v36 = vmax.f32 %v2033_v54, 0.0  ;;  %v3800_v2 = vpop.f32.mrb[32].mxu1 }
 0x13c   : > { %v1316_v38 = vpop.f32.mrb[18].mxu0  ;;  %v3802_v6 = vpop.f32.mrb[33].mxu1 }
 0x13d   : > { %v1833_v41 = vadd.f32 %v1603_v32, %v359_v31  ;;  %v1606_v43 = vadd.f32 %v3717_v61, %v1316_v38  ;;  %v1318_v44 = vpop.f32.mrb[19].mxu0  ;;  %v2158_v45 = vpack.c.bf16 %v2097_v36, %v2096_v35  ;;  %v3805_v16 = vpop.f32.mrb[34].mxu1 }
 0x13e   : > { %v1963_v48 = vld [vmem:[#allocation2 + $0x30] sm:$0xff]  ;;  %v3807_v18 = vpop.f32.mrb[35].mxu1 }
 0x13f   : > { %1898 = vst.msk [vmem:[#allocation2 + $0x40] sm:$0xff] %vm286_vm0, %v1833_v41  ;;  %v1834_v59 = vadd.f32 %v1606_v43, %v360_v39  ;;  %1528 = vmatmul.mubr.bf16.gmra.mrb[124].mxu0 %v3303_v34  ;;  %3064 = vmatprep.mubr.msk.bf16.mxu1 %vm286_vm0, %v2158_v45  ;;  %v2034_v50 = vadd.f32 %v3738_v23, %v1963_v48  ;;  %v364_v34 = vld [vmem:[#allocation2 + $0x68] sm:$0xff] }
 0x140   : > { %v1964_v53 = vld [vmem:[#allocation2 + $0x38] sm:$0xff] }
 0x141   : > { %1899 = vst.msk [vmem:[#allocation2 + $0x48] sm:$0xff] %vm286_vm0, %v1834_v59  ;;  %v2035_v61 = vadd.f32 %v3738_v23, %v1964_v53  ;;  %v2098_v0 = vmax.f32 %v2034_v50, 0.0 }
 0x142   : > { %v1321_v62 = vpop.f32.mrb[20].mxu0 }
 0x143   : > { %v1611_v63 = vadd.f32 %v3710_v57, %v1321_v62  ;;  %v1323_v55 = vpop.f32.mrb[21].mxu0  ;;  %v2099_v1 = vmax.f32 %v2035_v61, 0.0  ;;  %v3815_v32 = vpop.f32.mrb[36].mxu1 }
 0x144   : > { %v1324_v5 = vpop.f32.mrb[22].mxu0  ;;  %v3817_v35 = vpop.f32.mrb[37].mxu1 }
 0x145   : > { %v1835_v8 = vadd.f32 %v1611_v63, %v361_v58  ;;  %v1614_v10 = vadd.f32 %v3715_v60, %v1324_v5  ;;  %v1326_v13 = vpop.f32.mrb[23].mxu0  ;;  %v2159_v14 = vpack.c.bf16 %v2099_v1, %v2098_v0  ;;  %v3820_v43 = vpop.f32.mrb[38].mxu1  ;;  %v366_v0 = vld [vmem:[#allocation2 + $0x78] sm:$0xff] }
 0x146   : > { %v1965_v17 = vld [vmem:[#allocation2 + $0x40] sm:$0xff]  ;;  %v3822_v45 = vpop.f32.mrb[39].mxu1 }
 0x147   : > { %1900 = vst.msk [vmem:[#allocation2 + $0x50] sm:$0xff] %vm286_vm0, %v1835_v8  ;;  %v1836_v57 = vadd.f32 %v1614_v10, %v362_v4  ;;  %3065 = vmatmul.mubr.msk.bf16.gmra.mrb[68].mxu1 %vm286_vm0, %v2159_v14  ;;  %v2036_v19 = vadd.f32 %v3738_v23, %v1965_v17 }
 0x148   : > { %v1966_v51 = vld [vmem:[#allocation2 + $0x48] sm:$0xff] }
 0x149   : > { %1901 = vst.msk [vmem:[#allocation2 + $0x58] sm:$0xff] %vm286_vm0, %v1836_v57  ;;  %v2037_v25 = vadd.f32 %v3738_v23, %v1966_v51  ;;  %v2100_v29 = vmax.f32 %v2036_v19, 0.0 }
 0x14a   : > { %v1329_v60 = vpop.f32.mrb[24].mxu0 }
 0x14b   : > { %v1619_v27 = vadd.f32 %v3723_v7, %v1329_v60  ;;  %v1331_v54 = vpop.f32.mrb[25].mxu0  ;;  %v2101_v31 = vmax.f32 %v2037_v25, 0.0  ;;  %v3830_v55 = vpop.f32.mrb[40].mxu1  ;;  %v367_v60 = vld [vmem:[#allocation2 + $0x80] sm:$0xff] }
 0x14c   : > { %v1332_v33 = vpop.f32.mrb[26].mxu0  ;;  %v3832_v4 = vpop.f32.mrb[41].mxu1 }
 0x14d   : > { %v1837_v36 = vadd.f32 %v1619_v27, %v363_v26  ;;  %v1622_v38 = vadd.f32 %v3727_v12, %v1332_v33  ;;  %v1334_v39 = vpop.f32.mrb[27].mxu0  ;;  %v2160_v41 = vpack.c.bf16 %v2101_v31, %v2100_v29  ;;  %v365_v12 = vld [vmem:[#allocation2 + $0x70] sm:$0xff]  ;;  %v3835_v14 = vpop.f32.mrb[42].mxu1 }
 0x14e   : > { %v1967_v44 = vld [vmem:[#allocation2 + $0x50] sm:$0xff]  ;;  %v3837_v57 = vpop.f32.mrb[43].mxu1 }
 0x14f   : > { %1902 = vst.msk [vmem:[#allocation2 + $0x60] sm:$0xff] %vm286_vm0, %v1837_v36  ;;  %v1838_v7 = vadd.f32 %v1622_v38, %v364_v34  ;;  %3068 = vmatprep.mubr.msk.bf16.mxu1 %vm286_vm0, %v2160_v41  ;;  %v2038_v48 = vadd.f32 %v3738_v23, %v1967_v44  ;;  %v368_v34 = vld [vmem:[#allocation2 + $0x88] sm:$0xff] }
 0x150   : > { %v1968_v59 = vld [vmem:[#allocation2 + $0x58] sm:$0xff] }
 0x151   : > { %1903 = vst.msk [vmem:[#allocation2 + $0x68] sm:$0xff] %vm286_vm0, %v1838_v7  ;;  %v2039_v50 = vadd.f32 %v3738_v23, %v1968_v59  ;;  %v2102_v62 = vmax.f32 %v2038_v48, 0.0 }
 0x152   : > { %v1337_v53 = vpop.f32.mrb[28].mxu0 }
 0x153   : > { %v1627_v61 = vadd.f32 %v3720_v3, %v1337_v53  ;;  %v1339_v58 = vpop.f32.mrb[29].mxu0  ;;  %v2103_v63 = vmax.f32 %v2039_v50, 0.0  ;;  %v3845_v31 = vpop.f32.mrb[44].mxu1 }
 0x154   : > { %v1340_v1 = vpop.f32.mrb[30].mxu0  ;;  %v3847_v36 = vpop.f32.mrb[45].mxu1 }
 0x155   : > { %v1839_v5 = vadd.f32 %v1627_v61, %v365_v12  ;;  %v1630_v8 = vadd.f32 %v3725_v11, %v1340_v1  ;;  %v1342_v10 = vpop.f32.mrb[31].mxu0  ;;  %v2161_v13 = vpack.c.bf16 %v2103_v63, %v2102_v62  ;;  %v3850_v7 = vpop.f32.mrb[46].mxu1 }
 0x156   : > { %v1969_v17 = vld [vmem:[#allocation2 + $0x60] sm:$0xff]  ;;  %v3852_v59 = vpop.f32.mrb[47].mxu1 }
 0x157   : > { %1904 = vst.msk [vmem:[#allocation2 + $0x70] sm:$0xff] %vm286_vm0, %v1839_v5  ;;  %v1840_v3 = vadd.f32 %v1630_v8, %v366_v0  ;;  %3069 = vmatmul.mubr.msk.bf16.gmra.mrb[72].mxu1 %vm286_vm0, %v2161_v13  ;;  %v2040_v19 = vadd.f32 %v3738_v23, %v1969_v17  ;;  %v370_v5 = vld [vmem:[#allocation2 + $0x98] sm:$0xff] }
 0x158   : > { %v1970_v51 = vld [vmem:[#allocation2 + $0x68] sm:$0xff] }
 0x159   : > { %1905 = vst.msk [vmem:[#allocation2 + $0x78] sm:$0xff] %vm286_vm0, %v1840_v3  ;;  %v2041_v25 = vadd.f32 %v3738_v23, %v1970_v51  ;;  %v2104_v54 = vmax.f32 %v2040_v19, 0.0 }
 0x15a   : > { %v1345_v11 = vpop.f32.mrb[32].mxu0 }
 0x15b   : > { %v1635_v26 = vadd.f32 %v3740_v24, %v1345_v11  ;;  %v1347_v27 = vpop.f32.mrb[33].mxu0  ;;  %v2105_v29 = vmax.f32 %v2041_v25, 0.0  ;;  %v3860_v1 = vpop.f32.mrb[48].mxu1 }
 0x15c   : > { %v1348_v33 = vpop.f32.mrb[34].mxu0  ;;  %v3862_v10 = vpop.f32.mrb[49].mxu1 }
 0x15d   : > { %v1841_v38 = vadd.f32 %v1635_v26, %v367_v60  ;;  %v1638_v39 = vadd.f32 %v3744_v30, %v1348_v33  ;;  %v1350_v41 = vpop.f32.mrb[35].mxu0  ;;  %v2162_v44 = vpack.c.bf16 %v2105_v29, %v2104_v54  ;;  %v369_v30 = vld [vmem:[#allocation2 + $0x90] sm:$0xff]  ;;  %v3865_v51 = vpop.f32.mrb[50].mxu1  ;;  %v371_v54 = vld [vmem:[#allocation2 + $0xa0] sm:$0xff] }
 0x15e   : > { %v1971_v48 = vld [vmem:[#allocation2 + $0x70] sm:$0xff]  ;;  %v3867_v11 = vpop.f32.mrb[51].mxu1 }
 0x15f   : > { %1906 = vst.msk [vmem:[#allocation2 + $0x80] sm:$0xff] %vm286_vm0, %v1841_v38  ;;  %v1842_v24 = vadd.f32 %v1638_v39, %v368_v34  ;;  %3072 = vmatprep.mubr.msk.bf16.mxu1 %vm286_vm0, %v2162_v44  ;;  %v2042_v50 = vadd.f32 %v3738_v23, %v1971_v48  ;;  %v372_v44 = vld [vmem:[#allocation2 + $0xa8] sm:$0xff] }
 0x160   : > { %v1972_v12 = vld [vmem:[#allocation2 + $0x78] sm:$0xff] }
 0x161   : > { %1907 = vst.msk [vmem:[#allocation2 + $0x88] sm:$0xff] %vm286_vm0, %v1842_v24  ;;  %v2043_v53 = vadd.f32 %v3738_v23, %v1972_v12  ;;  %v2106_v63 = vmax.f32 %v2042_v50, 0.0 }
 0x162   : > { %v1353_v61 = vpop.f32.mrb[36].mxu0 }
 0x163   : > { %v1643_v58 = vadd.f32 %v3732_v20, %v1353_v61  ;;  %v1355_v62 = vpop.f32.mrb[37].mxu0  ;;  %v2107_v0 = vmax.f32 %v2043_v53, 0.0  ;;  %v3875_v39 = vpop.f32.mrb[52].mxu1 }
 0x164   : > { %v1356_v8 = vpop.f32.mrb[38].mxu0  ;;  %v3877_v48 = vpop.f32.mrb[53].mxu1 }
 0x165   : > { %v1843_v13 = vadd.f32 %v1643_v58, %v369_v30  ;;  %v1646_v17 = vadd.f32 %v3742_v28, %v1356_v8  ;;  %v1358_v3 = vpop.f32.mrb[39].mxu0  ;;  %v2163_v19 = vpack.c.bf16 %v2107_v0, %v2106_v63  ;;  %v3880_v30 = vpop.f32.mrb[54].mxu1 }
 0x166   : > { %v1973_v25 = vld [vmem:[#allocation2 + $0x80] sm:$0xff]  ;;  %v3882_v58 = vpop.f32.mrb[55].mxu1 }
 0x167   : > { %1908 = vst.msk [vmem:[#allocation2 + $0x90] sm:$0xff] %vm286_vm0, %v1843_v13  ;;  %v1844_v20 = vadd.f32 %v1646_v17, %v370_v5  ;;  %3073 = vmatmul.mubr.msk.bf16.gmra.mrb[76].mxu1 %vm286_vm0, %v2163_v19  ;;  %v2044_v60 = vadd.f32 %v3738_v23, %v1973_v25  ;;  %v374_v19 = vld [vmem:[#allocation2 + $0xb8] sm:$0xff] }
 0x168   : > { %v1974_v26 = vld [vmem:[#allocation2 + $0x88] sm:$0xff] }
 0x169   : > { %1909 = vst.msk [vmem:[#allocation2 + $0x98] sm:$0xff] %vm286_vm0, %v1844_v20  ;;  %v2045_v27 = vadd.f32 %v3738_v23, %v1974_v26  ;;  %v2108_v34 = vmax.f32 %v2044_v60, 0.0 }
 0x16a   : > { %v1361_v28 = vpop.f32.mrb[40].mxu0 }
 0x16b   : > { %v1651_v29 = vadd.f32 %v3754_v46, %v1361_v28  ;;  %v1363_v33 = vpop.f32.mrb[41].mxu0  ;;  %v2109_v38 = vmax.f32 %v2045_v27, 0.0 }
 0x16c   : > { %v1364_v41 = vpop.f32.mrb[42].mxu0 }
 0x16d   : > { %v1845_v24 = vadd.f32 %v1651_v29, %v371_v54  ;;  %v1654_v50 = vadd.f32 %v3759_v56, %v1364_v41  ;;  %v1366_v12 = vpop.f32.mrb[43].mxu0  ;;  %v2164_v53 = vpack.c.bf16 %v2109_v38, %v2108_v34  ;;  %v373_v56 = vld [vmem:[#allocation2 + $0xb0] sm:$0xff]  ;;  %v3896_v34 = vpop.f32.mrb[56].mxu1  ;;  %v375_v41 = vld [vmem:[#allocation2 + $0xc0] sm:$0xff] }
 0x16e   : > { %v1975_v61 = vld [vmem:[#allocation2 + $0x90] sm:$0xff] }
 0x16f   : > { %1910 = vst.msk [vmem:[#allocation2 + $0xa0] sm:$0xff] %vm286_vm0, %v1845_v24  ;;  %v1846_v46 = vadd.f32 %v1654_v50, %v372_v44  ;;  %3076 = vmatprep.mubr.msk.bf16.mxu1 %vm286_vm0, %v2164_v53  ;;  %v2046_v62 = vadd.f32 %v3738_v23, %v1975_v61 }
 0x170   : > { %v1976_v63 = vld [vmem:[#allocation2 + $0x98] sm:$0xff] }
 0x171   : > { %1911 = vst.msk [vmem:[#allocation2 + $0xa8] sm:$0xff] %vm286_vm0, %v1846_v46  ;;  %v2047_v0 = vadd.f32 %v3738_v23, %v1976_v63  ;;  %v2110_v17 = vmax.f32 %v2046_v62, 0.0  ;;  %v376_v46 = vld [vmem:[#allocation2 + $0xc8] sm:$0xff] }
 0x172   : > { %v1369_v5 = vpop.f32.mrb[44].mxu0 }
 0x173   : > { %v1659_v8 = vadd.f32 %v3751_v42, %v1369_v5  ;;  %v1371_v13 = vpop.f32.mrb[45].mxu0  ;;  %v2111_v3 = vmax.f32 %v2047_v0, 0.0 }
 0x174   : > { %v1372_v25 = vpop.f32.mrb[46].mxu0 }
 0x175   : > { %v1847_v20 = vadd.f32 %v1659_v8, %v373_v56  ;;  %v1662_v60 = vadd.f32 %v3757_v52, %v1372_v25  ;;  %v1374_v26 = vpop.f32.mrb[47].mxu0  ;;  %v2165_v27 = vpack.c.bf16 %v2111_v3, %v2110_v17  ;;  %v3898_v52 = vpop.f32.mrb[57].mxu1 }
 0x176   : > { %v1977_v28 = vld [vmem:[#allocation2 + $0xa0] sm:$0xff]  ;;  %v3901_v53 = vpop.f32.mrb[58].mxu1 }
 0x177   : > { %1912 = vst.msk [vmem:[#allocation2 + $0xb0] sm:$0xff] %vm286_vm0, %v1847_v20  ;;  %v1848_v54 = vadd.f32 %v1662_v60, %v374_v19  ;;  %3077 = vmatmul.mubr.msk.bf16.gmra.mrb[80].mxu1 %vm286_vm0, %v2165_v27  ;;  %v2048_v29 = vadd.f32 %v3738_v23, %v1977_v28  ;;  %v3903_v62 = vpop.f32.mrb[59].mxu1  ;;  %v377_v19 = vld [vmem:[#allocation2 + $0xd0] sm:$0xff]  ;;  %v378_v27 = vld [vmem:[#allocation2 + $0xd8] sm:$0xff] }
 0x178   : > { %v1978_v33 = vld [vmem:[#allocation2 + $0xa8] sm:$0xff] }
 0x179   : > { %1913 = vst.msk [vmem:[#allocation2 + $0xb8] sm:$0xff] %vm286_vm0, %v1848_v54  ;;  %v2049_v42 = vadd.f32 %v3738_v23, %v1978_v33  ;;  %v2112_v50 = vmax.f32 %v2048_v29, 0.0 }
 0x17a   : > { %v1377_v38 = vpop.f32.mrb[48].mxu0 }
 0x17b   : > { %v1667_v44 = vadd.f32 %v3771_v15, %v1377_v38  ;;  %v1379_v24 = vpop.f32.mrb[49].mxu0  ;;  %v2113_v12 = vmax.f32 %v2049_v42, 0.0 }
 0x17c   : > { %v1380_v61 = vpop.f32.mrb[50].mxu0 }
 0x17d   : > { %v1849_v63 = vadd.f32 %v1667_v44, %v375_v41  ;;  %v1670_v0 = vadd.f32 %v3776_v22, %v1380_v61  ;;  %v1382_v56 = vpop.f32.mrb[51].mxu0  ;;  %v2166_v5 = vpack.c.bf16 %v2113_v12, %v2112_v50  ;;  %v3913_v41 = vpop.f32.mrb[60].mxu1 }
 0x17e   : > { %v1979_v8 = vld [vmem:[#allocation2 + $0xb0] sm:$0xff]  ;;  %v3918_v24 = vpop.f32.mrb[61].mxu1 }
 0x17f   : > { %1914 = vst.msk [vmem:[#allocation2 + $0xc0] sm:$0xff] %vm286_vm0, %v1849_v63  ;;  %v1850_v13 = vadd.f32 %v1670_v0, %v376_v46  ;;  %3080 = vmatprep.mubr.msk.bf16.mxu1 %vm286_vm0, %v2166_v5  ;;  %v2050_v15 = vadd.f32 %v3738_v23, %v1979_v8  ;;  %v3920_v12 = vpop.f32.mrb[62].mxu1  ;;  %v379_v63 = vld [vmem:[#allocation2 + $0xe0] sm:$0xff] }
 0x180   : > { %v1980_v17 = vld [vmem:[#allocation2 + $0xb8] sm:$0xff]  ;;  %v3924_v61 = vpop.f32.mrb[63].mxu1 }
 0x181   : > { %1915 = vst.msk [vmem:[#allocation2 + $0xc8] sm:$0xff] %vm286_vm0, %v1850_v13  ;;  %v2051_v3 = vadd.f32 %v3738_v23, %v1980_v17  ;;  %v2114_v60 = vmax.f32 %v2050_v15, 0.0  ;;  %v380_v15 = vld [vmem:[#allocation2 + $0xe8] sm:$0xff] }
 0x182   : > { %v1385_v25 = vpop.f32.mrb[52].mxu0 }
 0x183   : > { %v1675_v20 = vadd.f32 %v3768_v9, %v1385_v25  ;;  %v1387_v22 = vpop.f32.mrb[53].mxu0  ;;  %v2115_v26 = vmax.f32 %v2051_v3, 0.0 }
 0x184   : > { %v1388_v28 = vpop.f32.mrb[54].mxu0 }
 0x185   : > { %v1851_v54 = vadd.f32 %v1675_v20, %v377_v19  ;;  %v1678_v29 = vadd.f32 %v3774_v21, %v1388_v28  ;;  %v1390_v33 = vpop.f32.mrb[55].mxu0  ;;  %v2167_v42 = vpack.c.bf16 %v2115_v26, %v2114_v60 }
 0x186   : > { %v1981_v38 = vld [vmem:[#allocation2 + $0xc0] sm:$0xff] }
 0x187   : > { %1916 = vst.msk [vmem:[#allocation2 + $0xd0] sm:$0xff] %vm286_vm0, %v1851_v54  ;;  %v1852_v44 = vadd.f32 %v1678_v29, %v378_v27  ;;  %3081 = vmatmul.mubr.msk.bf16.gmra.mrb[84].mxu1 %vm286_vm0, %v2167_v42  ;;  %v2052_v9 = vadd.f32 %v3738_v23, %v1981_v38  ;;  %v381_v27 = vld [vmem:[#allocation2 + $0xf0] sm:$0xff]  ;;  %v382_v42 = vld [vmem:[#allocation2 + $0xf8] sm:$0xff] }
 0x188   : > { %v1982_v50 = vld [vmem:[#allocation2 + $0xc8] sm:$0xff] }
 0x189   : > { %1917 = vst.msk [vmem:[#allocation2 + $0xd8] sm:$0xff] %vm286_vm0, %v1852_v44  ;;  %v2053_v21 = vadd.f32 %v3738_v23, %v1982_v50  ;;  %v2116_v5 = vmax.f32 %v2052_v9, 0.0 }
 0x18a   : > { %v1393_v46 = vpop.f32.mrb[56].mxu0 }
 0x18b   : > { %v1683_v0 = vadd.f32 %v3787_v40, %v1393_v46  ;;  %v1395_v56 = vpop.f32.mrb[57].mxu0  ;;  %v2117_v8 = vmax.f32 %v2053_v21, 0.0 }
 0x18c   : > { %v1396_v13 = vpop.f32.mrb[58].mxu0 }
 0x18d   : > { %v1853_v17 = vadd.f32 %v1683_v0, %v379_v63  ;;  %v1686_v3 = vadd.f32 %v3792_v49, %v1396_v13  ;;  %v1398_v19 = vpop.f32.mrb[59].mxu0  ;;  %v2168_v25 = vpack.c.bf16 %v2117_v8, %v2116_v5  ;;  %v383_v8 = vld [vmem:[#allocation2 + $0x100] sm:$0xff] }
 0x18e   : > { %v1983_v20 = vld [vmem:[#allocation2 + $0xd0] sm:$0xff]  ;;  %v384_v19 = vld [vmem:[#allocation2 + $0x108] sm:$0xff] }
 0x18f   : > { %1918 = vst.msk [vmem:[#allocation2 + $0xe0] sm:$0xff] %vm286_vm0, %v1853_v17  ;;  %v1854_v22 = vadd.f32 %v1686_v3, %v380_v15  ;;  %3084 = vmatprep.mubr.msk.bf16.mxu1 %vm286_vm0, %v2168_v25  ;;  %v2054_v60 = vadd.f32 %v3738_v23, %v1983_v20 }
 0x190   : > { %v1984_v26 = vld [vmem:[#allocation2 + $0xd8] sm:$0xff] }
 0x191   : > { %1919 = vst.msk [vmem:[#allocation2 + $0xe8] sm:$0xff] %vm286_vm0, %v1854_v22  ;;  %v2055_v40 = vadd.f32 %v3738_v23, %v1984_v26  ;;  %v2118_v29 = vmax.f32 %v2054_v60, 0.0 }
 0x192   : > { %v1401_v28 = vpop.f32.mrb[60].mxu0 }
 0x193   : > { %v1691_v54 = vadd.f32 %v3785_v37, %v1401_v28  ;;  %v1403_v49 = vpop.f32.mrb[61].mxu0  ;;  %v2119_v33 = vmax.f32 %v2055_v40, 0.0 }
 0x194   : > { %v1404_v38 = vpop.f32.mrb[62].mxu0 }
 0x195   : > { %v1855_v44 = vadd.f32 %v1691_v54, %v381_v27  ;;  %v1694_v9 = vadd.f32 %v3790_v47, %v1404_v38  ;;  %v1406_v50 = vpop.f32.mrb[63].mxu0  ;;  %v2169_v21 = vpack.c.bf16 %v2119_v33, %v2118_v29  ;;  %v385_v54 = vld [vmem:[#allocation2 + $0x110] sm:$0xff]  ;;  %v386_v38 = vld [vmem:[#allocation2 + $0x118] sm:$0xff] }
 0x196   : > { %v1985_v46 = vld [vmem:[#allocation2 + $0xe0] sm:$0xff] }
 0x197   : > { %1920 = vst.msk [vmem:[#allocation2 + $0xf0] sm:$0xff] %vm286_vm0, %v1855_v44  ;;  %v1856_v63 = vadd.f32 %v1694_v9, %v382_v42  ;;  %3085 = vmatmul.mubr.msk.bf16.gmra.mrb[88].mxu1 %vm286_vm0, %v2169_v21  ;;  %v2056_v0 = vadd.f32 %v3738_v23, %v1985_v46 }
 0x198   : > { %v1986_v56 = vld [vmem:[#allocation2 + $0xe8] sm:$0xff] }
 0x199   : > { %1921 = vst.msk [vmem:[#allocation2 + $0xf8] sm:$0xff] %vm286_vm0, %v1856_v63  ;;  %v2057_v37 = vadd.f32 %v3738_v23, %v1986_v56  ;;  %v2120_v15 = vmax.f32 %v2056_v0, 0.0 }
 0x19a   : > { %v1409_v5 = vpop.f32.mrb[64].mxu0 }
 0x19b   : > { %v1699_v13 = vadd.f32 %v3802_v6, %v1409_v5  ;;  %v1411_v47 = vpop.f32.mrb[65].mxu0  ;;  %v2121_v17 = vmax.f32 %v2057_v37, 0.0 }
 0x19c   : > { %v1412_v3 = vpop.f32.mrb[66].mxu0 }
 0x19d   : > { %v1857_v25 = vadd.f32 %v1699_v13, %v383_v8  ;;  %v1702_v20 = vadd.f32 %v3807_v18, %v1412_v3  ;;  %v1414_v22 = vpop.f32.mrb[67].mxu0  ;;  %v2170_v60 = vpack.c.bf16 %v2121_v17, %v2120_v15  ;;  %v387_v8 = vld [vmem:[#allocation2 + $0x120] sm:$0xff]  ;;  %v388_v3 = vld [vmem:[#allocation2 + $0x128] sm:$0xff] }
 0x19e   : > { %v1987_v26 = vld [vmem:[#allocation2 + $0xf0] sm:$0xff] }
 0x19f   : > { %1922 = vst.msk [vmem:[#allocation2 + $0x100] sm:$0xff] %vm286_vm0, %v1857_v25  ;;  %v1858_v40 = vadd.f32 %v1702_v20, %v384_v19  ;;  %3088 = vmatprep.mubr.msk.bf16.mxu1 %vm286_vm0, %v2170_v60  ;;  %v2058_v27 = vadd.f32 %v3738_v23, %v1987_v26 }
 0x1a0   : > { %v1988_v28 = vld [vmem:[#allocation2 + $0xf8] sm:$0xff] }
 0x1a1   : > { %1923 = vst.msk [vmem:[#allocation2 + $0x108] sm:$0xff] %vm286_vm0, %v1858_v40  ;;  %v2059_v6 = vadd.f32 %v3738_v23, %v1988_v28  ;;  %v2122_v33 = vmax.f32 %v2058_v27, 0.0  ;;  %v389_v28 = vld [vmem:[#allocation2 + $0x130] sm:$0xff] }
 0x1a2   : > { %v1417_v49 = vpop.f32.mrb[68].mxu0 }
 0x1a3   : > { %v1707_v29 = vadd.f32 %v3800_v2, %v1417_v49  ;;  %v1419_v18 = vpop.f32.mrb[69].mxu0  ;;  %v2123_v42 = vmax.f32 %v2059_v6, 0.0 }
 0x1a4   : > { %v1420_v44 = vpop.f32.mrb[70].mxu0  ;;  %v390_v18 = vld [vmem:[#allocation2 + $0x138] sm:$0xff] }
 0x1a5   : > { %v1859_v9 = vadd.f32 %v1707_v29, %v385_v54  ;;  %v1710_v50 = vadd.f32 %v3805_v16, %v1420_v44  ;;  %v1422_v21 = vpop.f32.mrb[71].mxu0  ;;  %v2171_v46 = vpack.c.bf16 %v2123_v42, %v2122_v33 }
 0x1a6   : > { %v1989_v63 = vld [vmem:[#allocation2 + $0x100] sm:$0xff] }
 0x1a7   : > { %1924 = vst.msk [vmem:[#allocation2 + $0x110] sm:$0xff] %vm286_vm0, %v1859_v9  ;;  %v1860_v0 = vadd.f32 %v1710_v50, %v386_v38  ;;  %3089 = vmatmul.mubr.msk.bf16.gmra.mrb[92].mxu1 %vm286_vm0, %v2171_v46  ;;  %v2060_v56 = vadd.f32 %v3738_v23, %v1989_v63 }
 0x1a8   : > { %v1990_v37 = vld [vmem:[#allocation2 + $0x108] sm:$0xff] }
 0x1a9   : > { %1925 = vst.msk [vmem:[#allocation2 + $0x118] sm:$0xff] %vm286_vm0, %v1860_v0  ;;  %v2061_v2 = vadd.f32 %v3738_v23, %v1990_v37  ;;  %v2124_v47 = vmax.f32 %v2060_v56, 0.0  ;;  %v391_v56 = vld [vmem:[#allocation2 + $0x140] sm:$0xff] }
 0x1aa   : > { %v1425_v5 = vpop.f32.mrb[72].mxu0 }
 0x1ab   : > { %v1715_v13 = vadd.f32 %v3817_v35, %v1425_v5  ;;  %v1427_v16 = vpop.f32.mrb[73].mxu0  ;;  %v2125_v15 = vmax.f32 %v2061_v2, 0.0 }
 0x1ac   : > { %v1428_v17 = vpop.f32.mrb[74].mxu0 }
 0x1ad   : > { %v1861_v19 = vadd.f32 %v1715_v13, %v387_v8  ;;  %v1718_v25 = vadd.f32 %v3822_v45, %v1428_v17  ;;  %v1430_v20 = vpop.f32.mrb[75].mxu0  ;;  %v2172_v22 = vpack.c.bf16 %v2125_v15, %v2124_v47  ;;  %v392_v13 = vld [vmem:[#allocation2 + $0x148] sm:$0xff] }
 0x1ae   : > { %v1991_v60 = vld [vmem:[#allocation2 + $0x110] sm:$0xff] }
 0x1af   : > { %1926 = vst.msk [vmem:[#allocation2 + $0x120] sm:$0xff] %vm286_vm0, %v1861_v19  ;;  %v1862_v26 = vadd.f32 %v1718_v25, %v388_v3  ;;  %3092 = vmatprep.mubr.msk.bf16.mxu1 %vm286_vm0, %v2172_v22  ;;  %v2062_v40 = vadd.f32 %v3738_v23, %v1991_v60  ;;  %v393_v22 = vld [vmem:[#allocation2 + $0x150] sm:$0xff] }
 0x1b0   : > { %v1992_v27 = vld [vmem:[#allocation2 + $0x118] sm:$0xff] }
 0x1b1   : > { %1927 = vst.msk [vmem:[#allocation2 + $0x128] sm:$0xff] %vm286_vm0, %v1862_v26  ;;  %v2063_v35 = vadd.f32 %v3738_v23, %v1992_v27  ;;  %v2126_v49 = vmax.f32 %v2062_v40, 0.0 }
 0x1b2   : > { %v1433_v6 = vpop.f32.mrb[76].mxu0 }
 0x1b3   : > { %v1723_v54 = vadd.f32 %v3815_v32, %v1433_v6  ;;  %v1435_v45 = vpop.f32.mrb[77].mxu0  ;;  %v2127_v29 = vmax.f32 %v2063_v35, 0.0  ;;  %v394_v35 = vld [vmem:[#allocation2 + $0x158] sm:$0xff] }
 0x1b4   : > { %v1436_v33 = vpop.f32.mrb[78].mxu0 }
 0x1b5   : > { %v1863_v42 = vadd.f32 %v1723_v54, %v389_v28  ;;  %v1726_v38 = vadd.f32 %v3820_v43, %v1436_v33  ;;  %v1438_v44 = vpop.f32.mrb[79].mxu0  ;;  %v2173_v9 = vpack.c.bf16 %v2127_v29, %v2126_v49 }
 0x1b6   : > { %v1993_v50 = vld [vmem:[#allocation2 + $0x120] sm:$0xff] }
 0x1b7   : > { %1928 = vst.msk [vmem:[#allocation2 + $0x130] sm:$0xff] %vm286_vm0, %v1863_v42  ;;  %v1864_v21 = vadd.f32 %v1726_v38, %v390_v18  ;;  %3093 = vmatmul.mubr.msk.bf16.gmra.mrb[96].mxu1 %vm286_vm0, %v2173_v9  ;;  %v2064_v46 = vadd.f32 %v3738_v23, %v1993_v50  ;;  %v395_v44 = vld [vmem:[#allocation2 + $0x160] sm:$0xff] }
 0x1b8   : > { %v1994_v63 = vld [vmem:[#allocation2 + $0x128] sm:$0xff] }
 0x1b9   : > { %1929 = vst.msk [vmem:[#allocation2 + $0x138] sm:$0xff] %vm286_vm0, %v1864_v21  ;;  %v2065_v32 = vadd.f32 %v3738_v23, %v1994_v63  ;;  %v2128_v2 = vmax.f32 %v2064_v46, 0.0  ;;  %v396_v63 = vld [vmem:[#allocation2 + $0x168] sm:$0xff] }
 0x1ba   : > { %v1441_v0 = vpop.f32.mrb[80].mxu0 }
 0x1bb   : > { %v1731_v37 = vadd.f32 %v3832_v4, %v1441_v0  ;;  %v1443_v43 = vpop.f32.mrb[81].mxu0  ;;  %v2129_v5 = vmax.f32 %v2065_v32, 0.0 }
 0x1bc   : > { %v1444_v8 = vpop.f32.mrb[82].mxu0 }
 0x1bd   : > { %v1865_v16 = vadd.f32 %v1731_v37, %v391_v56  ;;  %v1734_v47 = vadd.f32 %v3837_v57, %v1444_v8  ;;  %v1446_v15 = vpop.f32.mrb[83].mxu0  ;;  %v2174_v17 = vpack.c.bf16 %v2129_v5, %v2128_v2 }
 0x1be   : > { %v1995_v3 = vld [vmem:[#allocation2 + $0x130] sm:$0xff] }
 0x1bf   : > { %1930 = vst.msk [vmem:[#allocation2 + $0x140] sm:$0xff] %vm286_vm0, %v1865_v16  ;;  %v1866_v19 = vadd.f32 %v1734_v47, %v392_v13  ;;  %3096 = vmatprep.mubr.msk.bf16.mxu1 %vm286_vm0, %v2174_v17  ;;  %v2066_v25 = vadd.f32 %v3738_v23, %v1995_v3  ;;  %v397_v13 = vld [vmem:[#allocation2 + $0x170] sm:$0xff]  ;;  %v398_v3 = vld [vmem:[#allocation2 + $0x178] sm:$0xff] }
 0x1c0   : > { %v1996_v20 = vld [vmem:[#allocation2 + $0x138] sm:$0xff] }
 0x1c1   : > { %1931 = vst.msk [vmem:[#allocation2 + $0x148] sm:$0xff] %vm286_vm0, %v1866_v19  ;;  %v2067_v4 = vadd.f32 %v3738_v23, %v1996_v20  ;;  %v2130_v40 = vmax.f32 %v2066_v25, 0.0 }
 0x1c2   : > { %v1449_v60 = vpop.f32.mrb[84].mxu0 }
 0x1c3   : > { %v1739_v26 = vadd.f32 %v3830_v55, %v1449_v60  ;;  %v1451_v57 = vpop.f32.mrb[85].mxu0  ;;  %v2131_v27 = vmax.f32 %v2067_v4, 0.0 }
 0x1c4   : > { %v1452_v28 = vpop.f32.mrb[86].mxu0 }
 0x1c5   : > { %v1867_v6 = vadd.f32 %v1739_v26, %v393_v22  ;;  %v1742_v54 = vadd.f32 %v3835_v14, %v1452_v28  ;;  %v1454_v45 = vpop.f32.mrb[87].mxu0  ;;  %v2175_v49 = vpack.c.bf16 %v2131_v27, %v2130_v40 }
 0x1c6   : > { %v1997_v29 = vld [vmem:[#allocation2 + $0x140] sm:$0xff] }
 0x1c7   : > { %1932 = vst.msk [vmem:[#allocation2 + $0x150] sm:$0xff] %vm286_vm0, %v1867_v6  ;;  %v1868_v18 = vadd.f32 %v1742_v54, %v394_v35  ;;  %3097 = vmatmul.mubr.msk.bf16.gmra.mrb[100].mxu1 %vm286_vm0, %v2175_v49  ;;  %v2068_v33 = vadd.f32 %v3738_v23, %v1997_v29  ;;  %v399_v35 = vld [vmem:[#allocation2 + $0x180] sm:$0xff]  ;;  %v400_v49 = vld [vmem:[#allocation2 + $0x188] sm:$0xff] }
 0x1c8   : > { %v1998_v42 = vld [vmem:[#allocation2 + $0x148] sm:$0xff] }
 0x1c9   : > { %1933 = vst.msk [vmem:[#allocation2 + $0x158] sm:$0xff] %vm286_vm0, %v1868_v18  ;;  %v2069_v55 = vadd.f32 %v3738_v23, %v1998_v42  ;;  %v2132_v50 = vmax.f32 %v2068_v33, 0.0 }
 0x1ca   : > { %v1457_v38 = vpop.f32.mrb[88].mxu0 }
 0x1cb   : > { %v1747_v9 = vadd.f32 %v3847_v36, %v1457_v38  ;;  %v1459_v14 = vpop.f32.mrb[89].mxu0  ;;  %v2133_v21 = vmax.f32 %v2069_v55, 0.0 }
 0x1cc   : > { %v1460_v46 = vpop.f32.mrb[90].mxu0 }
 0x1cd   : > { %v1869_v32 = vadd.f32 %v1747_v9, %v395_v44  ;;  %v1750_v0 = vadd.f32 %v3852_v59, %v1460_v46  ;;  %v1462_v56 = vpop.f32.mrb[91].mxu0  ;;  %v2176_v37 = vpack.c.bf16 %v2133_v21, %v2132_v50  ;;  %v401_v9 = vld [vmem:[#allocation2 + $0x190] sm:$0xff] }
 0x1ce   : > { %v1999_v43 = vld [vmem:[#allocation2 + $0x150] sm:$0xff] }
 0x1cf   : > { %1934 = vst.msk [vmem:[#allocation2 + $0x160] sm:$0xff] %vm286_vm0, %v1869_v32  ;;  %v1870_v2 = vadd.f32 %v1750_v0, %v396_v63  ;;  %3100 = vmatprep.mubr.msk.bf16.mxu1 %vm286_vm0, %v2176_v37  ;;  %v2070_v5 = vadd.f32 %v3738_v23, %v1999_v43  ;;  %v402_v32 = vld [vmem:[#allocation2 + $0x198] sm:$0xff] }
 0x1d0   : > { %v2000_v8 = vld [vmem:[#allocation2 + $0x158] sm:$0xff] }
 0x1d1   : > { %1935 = vst.msk [vmem:[#allocation2 + $0x168] sm:$0xff] %vm286_vm0, %v1870_v2  ;;  %v2071_v36 = vadd.f32 %v3738_v23, %v2000_v8  ;;  %v2134_v15 = vmax.f32 %v2070_v5, 0.0 }
 0x1d2   : > { %v1465_v16 = vpop.f32.mrb[92].mxu0 }
 0x1d3   : > { %v1755_v47 = vadd.f32 %v3845_v31, %v1465_v16  ;;  %v1467_v59 = vpop.f32.mrb[93].mxu0  ;;  %v2135_v17 = vmax.f32 %v2071_v36, 0.0 }
 0x1d4   : > { %v1468_v19 = vpop.f32.mrb[94].mxu0 }
 0x1d5   : > { %v1871_v25 = vadd.f32 %v1755_v47, %v397_v13  ;;  %v1758_v20 = vadd.f32 %v3850_v7, %v1468_v19  ;;  %v1470_v4 = vpop.f32.mrb[95].mxu0  ;;  %v2177_v22 = vpack.c.bf16 %v2135_v17, %v2134_v15  ;;  %v403_v47 = vld [vmem:[#allocation2 + $0x1a0] sm:$0xff]  ;;  %v404_v19 = vld [vmem:[#allocation2 + $0x1a8] sm:$0xff] }
 0x1d6   : > { %v2001_v60 = vld [vmem:[#allocation2 + $0x160] sm:$0xff] }
 0x1d7   : > { %1936 = vst.msk [vmem:[#allocation2 + $0x170] sm:$0xff] %vm286_vm0, %v1871_v25  ;;  %v1872_v26 = vadd.f32 %v1758_v20, %v398_v3  ;;  %3101 = vmatmul.mubr.msk.bf16.gmra.mrb[104].mxu1 %vm286_vm0, %v2177_v22  ;;  %v2072_v57 = vadd.f32 %v3738_v23, %v2001_v60 }
 0x1d8   : > { %v2002_v40 = vld [vmem:[#allocation2 + $0x168] sm:$0xff] }
 0x1d9   : > { %1937 = vst.msk [vmem:[#allocation2 + $0x178] sm:$0xff] %vm286_vm0, %v1872_v26  ;;  %v2073_v31 = vadd.f32 %v3738_v23, %v2002_v40  ;;  %v2136_v6 = vmax.f32 %v2072_v57, 0.0  ;;  %v4003_v23 = vld [vmem:[%s4211_s2] ss:$0 sm:$0xff] }
 0x1da   : > { %v1473_v27 = vpop.f32.mrb[96].mxu0 }
 0x1db   : > { %v1763_v28 = vadd.f32 %v3862_v10, %v1473_v27  ;;  %v1475_v7 = vpop.f32.mrb[97].mxu0  ;;  %v2137_v54 = vmax.f32 %v2073_v31, 0.0  ;;  %v405_v31 = vld [vmem:[#allocation2 + $0x1b0] sm:$0xff] }
 0x1dc   : > { %v1476_v45 = vpop.f32.mrb[98].mxu0 }
 0x1dd   : > { %v1873_v29 = vadd.f32 %v1763_v28, %v399_v35  ;;  %v1766_v18 = vadd.f32 %v3867_v11, %v1476_v45  ;;  %v1478_v33 = vpop.f32.mrb[99].mxu0  ;;  %v2178_v42 = vpack.c.bf16 %v2137_v54, %v2136_v6  ;;  %v406_v6 = vld [vmem:[#allocation2 + $0x1b8] sm:$0xff] }
 0x1de   : > { %v2003_v55 = vld [vmem:[#allocation2 + $0x170] sm:$0xff] }
 0x1df   : > { %1938 = vst.msk [vmem:[#allocation2 + $0x180] sm:$0xff] %vm286_vm0, %v1873_v29  ;;  %v1874_v38 = vadd.f32 %v1766_v18, %v400_v49  ;;  %3104 = vmatprep.mubr.msk.bf16.mxu1 %vm286_vm0, %v2178_v42  ;;  %v2074_v10 = vadd.f32 %v4003_v23, %v2003_v55 }
 0x1e0   : > { %v2004_v44 = vld [vmem:[#allocation2 + $0x178] sm:$0xff] }
 0x1e1   : > { %1939 = vst.msk [vmem:[#allocation2 + $0x188] sm:$0xff] %vm286_vm0, %v1874_v38  ;;  %v2075_v11 = vadd.f32 %v4003_v23, %v2004_v44  ;;  %v2138_v46 = vmax.f32 %v2074_v10, 0.0  ;;  %v407_v44 = vld [vmem:[#allocation2 + $0x1c0] sm:$0xff] }
 0x1e2   : > { %v1481_v14 = vpop.f32.mrb[100].mxu0 }
 0x1e3   : > { %v1771_v50 = vadd.f32 %v3860_v1, %v1481_v14  ;;  %v1483_v21 = vpop.f32.mrb[101].mxu0  ;;  %v2139_v63 = vmax.f32 %v2075_v11, 0.0 }
 0x1e4   : > { %v1484_v0 = vpop.f32.mrb[102].mxu0  ;;  %v408_v21 = vld [vmem:[#allocation2 + $0x1c8] sm:$0xff] }
 0x1e5   : > { %v1875_v56 = vadd.f32 %v1771_v50, %v401_v9  ;;  %v1774_v37 = vadd.f32 %v3865_v51, %v1484_v0  ;;  %v1486_v43 = vpop.f32.mrb[103].mxu0  ;;  %v2179_v2 = vpack.c.bf16 %v2139_v63, %v2138_v46 }
 0x1e6   : > { %v2005_v5 = vld [vmem:[#allocation2 + $0x180] sm:$0xff] }
 0x1e7   : > { %1940 = vst.msk [vmem:[#allocation2 + $0x190] sm:$0xff] %vm286_vm0, %v1875_v56  ;;  %v1876_v8 = vadd.f32 %v1774_v37, %v402_v32  ;;  %3105 = vmatmul.mubr.msk.bf16.gmra.mrb[108].mxu1 %vm286_vm0, %v2179_v2  ;;  %v2076_v36 = vadd.f32 %v4003_v23, %v2005_v5  ;;  %v409_v5 = vld [vmem:[#allocation2 + $0x1d0] sm:$0xff] }
 0x1e8   : > { %v2006_v13 = vld [vmem:[#allocation2 + $0x188] sm:$0xff] }
 0x1e9   : > { %1941 = vst.msk [vmem:[#allocation2 + $0x198] sm:$0xff] %vm286_vm0, %v1876_v8  ;;  %v2077_v1 = vadd.f32 %v4003_v23, %v2006_v13  ;;  %v2140_v15 = vmax.f32 %v2076_v36, 0.0 }
 0x1ea   : > { %v1489_v16 = vpop.f32.mrb[104].mxu0 }
 0x1eb   : > { %v1779_v59 = vadd.f32 %v3877_v48, %v1489_v16  ;;  %v1491_v51 = vpop.f32.mrb[105].mxu0  ;;  %v2141_v17 = vmax.f32 %v2077_v1, 0.0  ;;  %v410_v16 = vld [vmem:[#allocation2 + $0x1d8] sm:$0xff] }
 0x1ec   : > { %v1492_v3 = vpop.f32.mrb[106].mxu0 }
 0x1ed   : > { %v1877_v25 = vadd.f32 %v1779_v59, %v403_v47  ;;  %v1782_v20 = vadd.f32 %v3882_v58, %v1492_v3  ;;  %v1494_v4 = vpop.f32.mrb[107].mxu0  ;;  %v2180_v22 = vpack.c.bf16 %v2141_v17, %v2140_v15 }
 0x1ee   : > { %v2007_v60 = vld [vmem:[#allocation2 + $0x190] sm:$0xff]  ;;  %v411_v4 = vld [vmem:[#allocation2 + $0x1e0] sm:$0xff] }
 0x1ef   : > { %1942 = vst.msk [vmem:[#allocation2 + $0x1a0] sm:$0xff] %vm286_vm0, %v1877_v25  ;;  %v1878_v26 = vadd.f32 %v1782_v20, %v404_v19  ;;  %3108 = vmatprep.mubr.msk.bf16.mxu1 %vm286_vm0, %v2180_v22  ;;  %v2078_v57 = vadd.f32 %v4003_v23, %v2007_v60 }
 0x1f0   : > { %v2008_v40 = vld [vmem:[#allocation2 + $0x198] sm:$0xff] }
 0x1f1   : > { %1943 = vst.msk [vmem:[#allocation2 + $0x1a8] sm:$0xff] %vm286_vm0, %v1878_v26  ;;  %v2079_v48 = vadd.f32 %v4003_v23, %v2008_v40  ;;  %v2142_v28 = vmax.f32 %v2078_v57, 0.0 }
 0x1f2   : > { %v1497_v27 = vpop.f32.mrb[108].mxu0 }
 0x1f3   : > { %v1787_v35 = vadd.f32 %v3875_v39, %v1497_v27  ;;  %v1499_v58 = vpop.f32.mrb[109].mxu0  ;;  %v2143_v7 = vmax.f32 %v2079_v48, 0.0 }
 0x1f4   : > { %v1500_v54 = vpop.f32.mrb[110].mxu0  ;;  %v412_v58 = vld [vmem:[#allocation2 + $0x1e8] sm:$0xff] }
 0x1f5   : > { %v1879_v45 = vadd.f32 %v1787_v35, %v405_v31  ;;  %v1790_v49 = vadd.f32 %v3880_v30, %v1500_v54  ;;  %v1502_v29 = vpop.f32.mrb[111].mxu0  ;;  %v2181_v18 = vpack.c.bf16 %v2143_v7, %v2142_v28 }
 0x1f6   : > { %v2009_v33 = vld [vmem:[#allocation2 + $0x1a0] sm:$0xff] }
 0x1f7   : > { %1944 = vst.msk [vmem:[#allocation2 + $0x1b0] sm:$0xff] %vm286_vm0, %v1879_v45  ;;  %v1880_v42 = vadd.f32 %v1790_v49, %v406_v6  ;;  %3109 = vmatmul.mubr.msk.bf16.gmra.mrb[112].mxu1 %vm286_vm0, %v2181_v18  ;;  %v2080_v55 = vadd.f32 %v4003_v23, %v2009_v33 }
 0x1f8   : > { %v2010_v38 = vld [vmem:[#allocation2 + $0x1a8] sm:$0xff] }
 0x1f9   : > { %1945 = vst.msk [vmem:[#allocation2 + $0x1b8] sm:$0xff] %vm286_vm0, %v1880_v42  ;;  %v2081_v39 = vadd.f32 %v4003_v23, %v2010_v38  ;;  %v2144_v9 = vmax.f32 %v2080_v55, 0.0 }
 0x1fa   : > { %v1505_v10 = vpop.f32.mrb[112].mxu0 }
 0x1fb   : > { %v1795_v11 = vadd.f32 %v3898_v52, %v1505_v10  ;;  %v1507_v30 = vpop.f32.mrb[113].mxu0  ;;  %v2145_v14 = vmax.f32 %v2081_v39, 0.0  ;;  %v413_v39 = vld [vmem:[#allocation2 + $0x1f0] sm:$0xff] }
 0x1fc   : > { %v1508_v50 = vpop.f32.mrb[114].mxu0 }
 0x1fd   : > { %v1881_v46 = vadd.f32 %v1795_v11, %v407_v44  ;;  %v1798_v63 = vadd.f32 %v3903_v62, %v1508_v50  ;;  %v1510_v32 = vpop.f32.mrb[115].mxu0  ;;  %v2182_v0 = vpack.c.bf16 %v2145_v14, %v2144_v9  ;;  %v414_v14 = vld [vmem:[#allocation2 + $0x1f8] sm:$0xff] }
 0x1fe   : > { %v2011_v56 = vld [vmem:[#allocation2 + $0x1b0] sm:$0xff] }
 0x1ff   : > { %1946 = vst.msk [vmem:[#allocation2 + $0x1c0] sm:$0xff] %vm286_vm0, %v1881_v46  ;;  %v1882_v37 = vadd.f32 %v1798_v63, %v408_v21  ;;  %3112 = vmatprep.mubr.msk.bf16.mxu1 %vm286_vm0, %v2182_v0  ;;  %v2082_v43 = vadd.f32 %v4003_v23, %v2011_v56 }
 0x200   : > { %v2012_v2 = vld [vmem:[#allocation2 + $0x1b8] sm:$0xff] }
 0x201   : > { %1947 = vst.msk [vmem:[#allocation2 + $0x1c8] sm:$0xff] %vm286_vm0, %v1882_v37  ;;  %v2083_v52 = vadd.f32 %v4003_v23, %v2012_v2  ;;  %v2146_v13 = vmax.f32 %v2082_v43, 0.0 }
 0x202   : > { %v1513_v8 = vpop.f32.mrb[116].mxu0 }
 0x203   : > { %v1803_v62 = vadd.f32 %v3896_v34, %v1513_v8  ;;  %v1515_v36 = vpop.f32.mrb[117].mxu0  ;;  %v2147_v1 = vmax.f32 %v2083_v52, 0.0  ;;  %v4045_v34 = vld [vmem:[%s4213_s4] ss:$0 sm:$0xff] }
 0x204   : > { %v1516_v47 = vpop.f32.mrb[118].mxu0 }
 0x205   : > { %v1883_v59 = vadd.f32 %v1803_v62, %v409_v5  ;;  %v1806_v51 = vadd.f32 %v3901_v53, %v1516_v47  ;;  %v1518_v15 = vpop.f32.mrb[119].mxu0  ;;  %v2183_v17 = vpack.c.bf16 %v2147_v1, %v2146_v13 }
 0x206   : > { %v2013_v3 = vld [vmem:[#allocation2 + $0x1c0] sm:$0xff] }
 0x207   : > { %1948 = vst.msk [vmem:[#allocation2 + $0x1d0] sm:$0xff] %vm286_vm0, %v1883_v59  ;;  %v1884_v19 = vadd.f32 %v1806_v51, %v410_v16  ;;  %3113 = vmatmul.mubr.msk.bf16.gmra.mrb[116].mxu1 %vm286_vm0, %v2183_v17  ;;  %v2084_v25 = vadd.f32 %v4003_v23, %v2013_v3 }
 0x208   : > { %v2014_v20 = vld [vmem:[#allocation2 + $0x1c8] sm:$0xff] }
 0x209   : > { %1949 = vst.msk [vmem:[#allocation2 + $0x1d8] sm:$0xff] %vm286_vm0, %v1884_v19  ;;  %v2085_v53 = vadd.f32 %v4003_v23, %v2014_v20  ;;  %v2148_v31 = vmax.f32 %v2084_v25, 0.0 }
 0x20a   : > { %v1521_v22 = vpop.f32.mrb[120].mxu0  ;;  %v3062_v60 = vpop.f32.mrb[64].mxu1 }
 0x20b   : > { %v1811_v26 = vadd.f32 %v3918_v24, %v1521_v22  ;;  %v2342_v57 = vadd.f32 %v3062_v60, %v4045_v34  ;;  %v1523_v40 = vpop.f32.mrb[121].mxu0  ;;  %v2333_v48 = vpop.f32.mrb[65].mxu1  ;;  %v2149_v27 = vmax.f32 %v2085_v53, 0.0 }
 0x20c   : > { %v2334_v35 = vadd.f32 %v4045_v34, %v2333_v48  ;;  %v1524_v28 = vpop.f32.mrb[122].mxu0  ;;  %v3063_v7 = vpop.f32.mrb[66].mxu1 }
 0x20d   : > { %v1885_v6 = vadd.f32 %v1811_v26, %v411_v4  ;;  %2590 = vst [vmem:[%s4052_s22 + $0x10] sm:$0xff] %v2342_v57  ;;  %v1814_v54 = vadd.f32 %v3924_v61, %v1524_v28  ;;  %v2345_v24 = vadd.f32 %v3063_v7, %v4045_v34  ;;  %v1526_v45 = vpop.f32.mrb[123].mxu0  ;;  %v2336_v49 = vpop.f32.mrb[67].mxu1  ;;  %v2184_v29 = vpack.c.bf16 %v2149_v27, %v2148_v31 }
 0x20e   : > { %2588 = vst [vmem:[%s4052_s22] sm:$0xff] %v2334_v35  ;;  %v2337_v18 = vadd.f32 %v4045_v34, %v2336_v49  ;;  %v2015_v33 = vld [vmem:[#allocation2 + $0x1d0] sm:$0xff] }
 0x20f   : > { %1950 = vst.msk [vmem:[#allocation2 + $0x1e0] sm:$0xff] %vm286_vm0, %v1885_v6  ;;  %v1886_v42 = vadd.f32 %v1814_v54, %v412_v58  ;;  %2591 = vst [vmem:[%s4052_s22 + $0x18] sm:$0xff] %v2345_v24  ;;  %3116 = vmatprep.mubr.msk.bf16.mxu1 %vm286_vm0, %v2184_v29  ;;  %v2086_v55 = vadd.f32 %v4003_v23, %v2015_v33 }
 0x210   : > { %2589 = vst [vmem:[%s4052_s22 + $0x8] sm:$0xff] %v2337_v18  ;;  %v2016_v38 = vld [vmem:[#allocation2 + $0x1d8] sm:$0xff] }
 0x211   : > { %1951 = vst.msk [vmem:[#allocation2 + $0x1e8] sm:$0xff] %vm286_vm0, %v1886_v42  ;;  %v2087_v61 = vadd.f32 %v4003_v23, %v2016_v38  ;;  %v2150_v30 = vmax.f32 %v2086_v55, 0.0 }
 0x212   : > { %v1529_v10 = vpop.f32.mrb[124].mxu0 }
 0x213   : > { %v1819_v44 = vadd.f32 %v3913_v41, %v1529_v10  ;;  %v1531_v11 = vpop.f32.mrb[125].mxu0  ;;  %v2151_v9 = vmax.f32 %v2087_v61, 0.0 }
 0x214   : > { %v1532_v50 = vpop.f32.mrb[126].mxu0 }
 0x215   : > { %v1887_v21 = vadd.f32 %v1819_v44, %v413_v39  ;;  %v1822_v46 = vadd.f32 %v3920_v12, %v1532_v50  ;;  %v1534_v63 = vpop.f32.mrb[127].mxu0  ;;  %v2185_v32 = vpack.c.bf16 %v2151_v9, %v2150_v30 }
 0x216   : > { %v2017_v0 = vld [vmem:[#allocation2 + $0x1e0] sm:$0xff] }
 0x217   : > { %1952 = vst.msk [vmem:[#allocation2 + $0x1f0] sm:$0xff] %vm286_vm0, %v1887_v21  ;;  %v1888_v56 = vadd.f32 %v1822_v46, %v414_v14  ;;  %3117 = vmatmul.mubr.msk.bf16.gmra.mrb[120].mxu1 %vm286_vm0, %v2185_v32  ;;  %v2088_v41 = vadd.f32 %v4003_v23, %v2017_v0 }
 0x218   : > { %v2018_v37 = vld [vmem:[#allocation2 + $0x1e8] sm:$0xff] }
 0x219   : > { %1953 = vst.msk [vmem:[#allocation2 + $0x1f8] sm:$0xff] %vm286_vm0, %v1888_v56  ;;  %v2089_v43 = vadd.f32 %v4003_v23, %v2018_v37  ;;  %v2152_v5 = vmax.f32 %v2088_v41, 0.0 }
 0x21a   : > { %v3066_v2 = vpop.f32.mrb[68].mxu1 }
 0x21b   : > { %v2358_v12 = vadd.f32 %v3066_v2, %v4045_v34  ;;  %v2349_v52 = vpop.f32.mrb[69].mxu1  ;;  %v2153_v8 = vmax.f32 %v2089_v43, 0.0 }
 0x21c   : > { %v2350_v62 = vadd.f32 %v4045_v34, %v2349_v52  ;;  %v3067_v36 = vpop.f32.mrb[70].mxu1 }
 0x21d   : > { %2594 = vst [vmem:[%s4052_s22 + $0x30] sm:$0xff] %v2358_v12  ;;  %v2361_v13 = vadd.f32 %v3067_v36, %v4045_v34  ;;  %v2352_v1 = vpop.f32.mrb[71].mxu1  ;;  %v2186_v16 = vpack.c.bf16 %v2153_v8, %v2152_v5 }
 0x21e   : > { %2592 = vst [vmem:[%s4052_s22 + $0x20] sm:$0xff] %v2350_v62  ;;  %v2353_v47 = vadd.f32 %v4045_v34, %v2352_v1  ;;  %v2019_v59 = vld [vmem:[#allocation2 + $0x1f0] sm:$0xff] }
 0x21f   : > { %2595 = vst [vmem:[%s4052_s22 + $0x38] sm:$0xff] %v2361_v13  ;;  %3120 = vmatprep.mubr.msk.bf16.mxu1 %vm286_vm0, %v2186_v16  ;;  %v2090_v51 = vadd.f32 %v4003_v23, %v2019_v59 }
 0x220   : > { %2593 = vst [vmem:[%s4052_s22 + $0x28] sm:$0xff] %v2353_v47  ;;  %v2020_v15 = vld [vmem:[#allocation2 + $0x1f8] sm:$0xff] }
 0x221   : > { %v2091_v17 = vadd.f32 %v4003_v23, %v2020_v15  ;;  %v2154_v3 = vmax.f32 %v2090_v51, 0.0 }
 0x223   : > { %v2155_v19 = vmax.f32 %v2091_v17, 0.0 }
 0x225   : > { %v2187_v25 = vpack.c.bf16 %v2155_v19, %v2154_v3 }
 0x227   : > { %3121 = vmatmul.mubr.msk.bf16.gmra.mrb[124].mxu1 %vm286_vm0, %v2187_v25 }
 0x22a   : > { %v3070_v20 = vpop.f32.mrb[72].mxu1 }
 0x22b   : > { %v2374_v53 = vadd.f32 %v3070_v20, %v4045_v34  ;;  %v2365_v4 = vpop.f32.mrb[73].mxu1 }
 0x22c   : > { %v2366_v22 = vadd.f32 %v4045_v34, %v2365_v4  ;;  %v3071_v60 = vpop.f32.mrb[74].mxu1 }
 0x22d   : > { %2598 = vst [vmem:[%s4052_s22 + $0x50] sm:$0xff] %v2374_v53  ;;  %v2377_v26 = vadd.f32 %v3071_v60, %v4045_v34  ;;  %v2368_v23 = vpop.f32.mrb[75].mxu1 }
 0x22e   : > { %2596 = vst [vmem:[%s4052_s22 + $0x40] sm:$0xff] %v2366_v22  ;;  %v2369_v57 = vadd.f32 %v4045_v34, %v2368_v23 }
 0x22f   : > { %2599 = vst [vmem:[%s4052_s22 + $0x58] sm:$0xff] %v2377_v26 }
 0x230   : > { %2597 = vst [vmem:[%s4052_s22 + $0x48] sm:$0xff] %v2369_v57 }
 0x23a   : > { %v3074_v40 = vpop.f32.mrb[76].mxu1 }
 0x23b   : > { %v2390_v48 = vadd.f32 %v3074_v40, %v4045_v34  ;;  %v2381_v31 = vpop.f32.mrb[77].mxu1 }
 0x23c   : > { %v2382_v27 = vadd.f32 %v4045_v34, %v2381_v31  ;;  %v3075_v35 = vpop.f32.mrb[78].mxu1 }
 0x23d   : > { %2602 = vst [vmem:[%s4052_s22 + $0x70] sm:$0xff] %v2390_v48  ;;  %v2393_v58 = vadd.f32 %v3075_v35, %v4045_v34  ;;  %v2384_v28 = vpop.f32.mrb[79].mxu1 }
 0x23e   : > { %2600 = vst [vmem:[%s4052_s22 + $0x60] sm:$0xff] %v2382_v27  ;;  %v2385_v7 = vadd.f32 %v4045_v34, %v2384_v28 }
 0x23f   : > { %2603 = vst [vmem:[%s4052_s22 + $0x78] sm:$0xff] %v2393_v58 }
 0x240   : > { %2601 = vst [vmem:[%s4052_s22 + $0x68] sm:$0xff] %v2385_v7 }
 0x24a   : > { %v3078_v6 = vpop.f32.mrb[80].mxu1 }
 0x24b   : > { %v2406_v54 = vadd.f32 %v3078_v6, %v4045_v34  ;;  %v2397_v24 = vpop.f32.mrb[81].mxu1 }
 0x24c   : > { %v2398_v45 = vadd.f32 %v4045_v34, %v2397_v24  ;;  %v3079_v49 = vpop.f32.mrb[82].mxu1 }
 0x24d   : > { %2606 = vst [vmem:[%s4052_s22 + $0x90] sm:$0xff] %v2406_v54  ;;  %v2409_v29 = vadd.f32 %v3079_v49, %v4045_v34  ;;  %v2400_v18 = vpop.f32.mrb[83].mxu1 }
 0x24e   : > { %2604 = vst [vmem:[%s4052_s22 + $0x80] sm:$0xff] %v2398_v45  ;;  %v2401_v33 = vadd.f32 %v4045_v34, %v2400_v18 }
 0x24f   : > { %2607 = vst [vmem:[%s4052_s22 + $0x98] sm:$0xff] %v2409_v29 }
 0x250   : > { %2605 = vst [vmem:[%s4052_s22 + $0x88] sm:$0xff] %v2401_v33 }
 0x25a   : > { %v3082_v42 = vpop.f32.mrb[84].mxu1 }
 0x25b   : > { %v2422_v55 = vadd.f32 %v3082_v42, %v4045_v34  ;;  %v2413_v38 = vpop.f32.mrb[85].mxu1 }
 0x25c   : > { %v2414_v61 = vadd.f32 %v4045_v34, %v2413_v38  ;;  %v3083_v39 = vpop.f32.mrb[86].mxu1 }
 0x25d   : > { %2610 = vst [vmem:[%s4052_s22 + $0xb0] sm:$0xff] %v2422_v55  ;;  %v2425_v10 = vadd.f32 %v3083_v39, %v4045_v34  ;;  %v2416_v44 = vpop.f32.mrb[87].mxu1 }
 0x25e   : > { %2608 = vst [vmem:[%s4052_s22 + $0xa0] sm:$0xff] %v2414_v61  ;;  %v2417_v11 = vadd.f32 %v4045_v34, %v2416_v44 }
 0x25f   : > { %2611 = vst [vmem:[%s4052_s22 + $0xb8] sm:$0xff] %v2425_v10 }
 0x260   : > { %2609 = vst [vmem:[%s4052_s22 + $0xa8] sm:$0xff] %v2417_v11 }
 0x26a   : > { %v3086_v30 = vpop.f32.mrb[88].mxu1 }
 0x26b   : > { %v2438_v9 = vadd.f32 %v3086_v30, %v4045_v34  ;;  %v2429_v14 = vpop.f32.mrb[89].mxu1 }
 0x26c   : > { %v2430_v50 = vadd.f32 %v4045_v34, %v2429_v14  ;;  %v3087_v21 = vpop.f32.mrb[90].mxu1 }
 0x26d   : > { %2614 = vst [vmem:[%s4052_s22 + $0xd0] sm:$0xff] %v2438_v9  ;;  %v2441_v46 = vadd.f32 %v3087_v21, %v4045_v34  ;;  %v2432_v63 = vpop.f32.mrb[91].mxu1 }
 0x26e   : > { %2612 = vst [vmem:[%s4052_s22 + $0xc0] sm:$0xff] %v2430_v50  ;;  %v2433_v32 = vadd.f32 %v4045_v34, %v2432_v63 }
 0x26f   : > { %2615 = vst [vmem:[%s4052_s22 + $0xd8] sm:$0xff] %v2441_v46 }
 0x270   : > { %2613 = vst [vmem:[%s4052_s22 + $0xc8] sm:$0xff] %v2433_v32 }
 0x27a   : > { %v3090_v0 = vpop.f32.mrb[92].mxu1 }
 0x27b   : > { %v2454_v56 = vadd.f32 %v3090_v0, %v4045_v34  ;;  %v2445_v41 = vpop.f32.mrb[93].mxu1 }
 0x27c   : > { %v2446_v37 = vadd.f32 %v4045_v34, %v2445_v41  ;;  %v3091_v43 = vpop.f32.mrb[94].mxu1 }
 0x27d   : > { %2618 = vst [vmem:[%s4052_s22 + $0xf0] sm:$0xff] %v2454_v56  ;;  %v2457_v2 = vadd.f32 %v3091_v43, %v4045_v34  ;;  %v2448_v12 = vpop.f32.mrb[95].mxu1 }
 0x27e   : > { %2616 = vst [vmem:[%s4052_s22 + $0xe0] sm:$0xff] %v2446_v37  ;;  %v2449_v52 = vadd.f32 %v4045_v34, %v2448_v12 }
 0x27f   : > { %2619 = vst [vmem:[%s4052_s22 + $0xf8] sm:$0xff] %v2457_v2 }
 0x280   : > { %2617 = vst [vmem:[%s4052_s22 + $0xe8] sm:$0xff] %v2449_v52 }
 0x28a   : > { %v3094_v5 = vpop.f32.mrb[96].mxu1 }
 0x28b   : > { %v2470_v8 = vadd.f32 %v3094_v5, %v4045_v34  ;;  %v2461_v62 = vpop.f32.mrb[97].mxu1 }
 0x28c   : > { %v2462_v36 = vadd.f32 %v4045_v34, %v2461_v62  ;;  %v3095_v13 = vpop.f32.mrb[98].mxu1 }
 0x28d   : > { %2622 = vst [vmem:[%s4052_s22 + $0x110] sm:$0xff] %v2470_v8  ;;  %v2473_v1 = vadd.f32 %v3095_v13, %v4045_v34  ;;  %v2464_v16 = vpop.f32.mrb[99].mxu1 }
 0x28e   : > { %2620 = vst [vmem:[%s4052_s22 + $0x100] sm:$0xff] %v2462_v36  ;;  %v2465_v47 = vadd.f32 %v4045_v34, %v2464_v16 }
 0x28f   : > { %2623 = vst [vmem:[%s4052_s22 + $0x118] sm:$0xff] %v2473_v1 }
 0x290   : > { %2621 = vst [vmem:[%s4052_s22 + $0x108] sm:$0xff] %v2465_v47 }
 0x29a   : > { %v3098_v59 = vpop.f32.mrb[100].mxu1 }
 0x29b   : > { %v2486_v51 = vadd.f32 %v3098_v59, %v4045_v34  ;;  %v2477_v15 = vpop.f32.mrb[101].mxu1 }
 0x29c   : > { %v2478_v17 = vadd.f32 %v4045_v34, %v2477_v15  ;;  %v3099_v3 = vpop.f32.mrb[102].mxu1 }
 0x29d   : > { %2626 = vst [vmem:[%s4052_s22 + $0x130] sm:$0xff] %v2486_v51  ;;  %v2489_v19 = vadd.f32 %v3099_v3, %v4045_v34  ;;  %v2480_v25 = vpop.f32.mrb[103].mxu1 }
 0x29e   : > { %2624 = vst [vmem:[%s4052_s22 + $0x120] sm:$0xff] %v2478_v17  ;;  %v2481_v20 = vadd.f32 %v4045_v34, %v2480_v25 }
 0x29f   : > { %2627 = vst [vmem:[%s4052_s22 + $0x138] sm:$0xff] %v2489_v19 }
 0x2a0   : > { %2625 = vst [vmem:[%s4052_s22 + $0x128] sm:$0xff] %v2481_v20 }
 0x2aa   : > { %v3102_v53 = vpop.f32.mrb[104].mxu1 }
 0x2ab   : > { %v2502_v4 = vadd.f32 %v3102_v53, %v4045_v34  ;;  %v2493_v22 = vpop.f32.mrb[105].mxu1 }
 0x2ac   : > { %v2494_v60 = vadd.f32 %v4045_v34, %v2493_v22  ;;  %v3103_v26 = vpop.f32.mrb[106].mxu1 }
 0x2ad   : > { %2630 = vst [vmem:[%s4052_s22 + $0x150] sm:$0xff] %v2502_v4  ;;  %v2505_v23 = vadd.f32 %v3103_v26, %v4045_v34  ;;  %v2496_v57 = vpop.f32.mrb[107].mxu1 }
 0x2ae   : > { %2628 = vst [vmem:[%s4052_s22 + $0x140] sm:$0xff] %v2494_v60  ;;  %v2497_v40 = vadd.f32 %v4045_v34, %v2496_v57 }
 0x2af   : > { %2631 = vst [vmem:[%s4052_s22 + $0x158] sm:$0xff] %v2505_v23 }
 0x2b0   : > { %2629 = vst [vmem:[%s4052_s22 + $0x148] sm:$0xff] %v2497_v40 }
 0x2ba   : > { %v3106_v48 = vpop.f32.mrb[108].mxu1 }
 0x2bb   : > { %v2518_v31 = vadd.f32 %v3106_v48, %v4045_v34  ;;  %v2509_v27 = vpop.f32.mrb[109].mxu1 }
 0x2bc   : > { %v2510_v35 = vadd.f32 %v4045_v34, %v2509_v27  ;;  %v3107_v58 = vpop.f32.mrb[110].mxu1 }
 0x2bd   : > { %2634 = vst [vmem:[%s4052_s22 + $0x170] sm:$0xff] %v2518_v31  ;;  %v2521_v28 = vadd.f32 %v3107_v58, %v4045_v34  ;;  %v2512_v7 = vpop.f32.mrb[111].mxu1 }
 0x2be   : > { %2632 = vst [vmem:[%s4052_s22 + $0x160] sm:$0xff] %v2510_v35  ;;  %v2513_v6 = vadd.f32 %v4045_v34, %v2512_v7 }
 0x2bf   : > { %2635 = vst [vmem:[%s4052_s22 + $0x178] sm:$0xff] %v2521_v28 }
 0x2c0   : > { %2633 = vst [vmem:[%s4052_s22 + $0x168] sm:$0xff] %v2513_v6 }
 0x2ca   : > { %v3110_v54 = vpop.f32.mrb[112].mxu1 }
 0x2cb   : > { %v2534_v24 = vadd.f32 %v3110_v54, %v4045_v34  ;;  %v2525_v45 = vpop.f32.mrb[113].mxu1 }
 0x2cc   : > { %v2526_v49 = vadd.f32 %v4045_v34, %v2525_v45  ;;  %v3111_v29 = vpop.f32.mrb[114].mxu1 }
 0x2cd   : > { %2638 = vst [vmem:[%s4052_s22 + $0x190] sm:$0xff] %v2534_v24  ;;  %v2537_v18 = vadd.f32 %v3111_v29, %v4045_v34  ;;  %v2528_v33 = vpop.f32.mrb[115].mxu1 }
 0x2ce   : > { %2636 = vst [vmem:[%s4052_s22 + $0x180] sm:$0xff] %v2526_v49  ;;  %v2529_v42 = vadd.f32 %v4045_v34, %v2528_v33 }
 0x2cf   : > { %2639 = vst [vmem:[%s4052_s22 + $0x198] sm:$0xff] %v2537_v18 }
 0x2d0   : > { %2637 = vst [vmem:[%s4052_s22 + $0x188] sm:$0xff] %v2529_v42 }
 0x2da   : > { %v3114_v55 = vpop.f32.mrb[116].mxu1 }
 0x2db   : > { %v2550_v38 = vadd.f32 %v3114_v55, %v4045_v34  ;;  %v2541_v61 = vpop.f32.mrb[117].mxu1 }
 0x2dc   : > { %v2542_v39 = vadd.f32 %v4045_v34, %v2541_v61  ;;  %v3115_v10 = vpop.f32.mrb[118].mxu1 }
 0x2dd   : > { %2642 = vst [vmem:[%s4052_s22 + $0x1b0] sm:$0xff] %v2550_v38  ;;  %v2553_v44 = vadd.f32 %v3115_v10, %v4045_v34  ;;  %v2544_v11 = vpop.f32.mrb[119].mxu1 }
 0x2de   : > { %2640 = vst [vmem:[%s4052_s22 + $0x1a0] sm:$0xff] %v2542_v39  ;;  %v2545_v30 = vadd.f32 %v4045_v34, %v2544_v11 }
 0x2df   : > { %2643 = vst [vmem:[%s4052_s22 + $0x1b8] sm:$0xff] %v2553_v44 }
 0x2e0   : > { %2641 = vst [vmem:[%s4052_s22 + $0x1a8] sm:$0xff] %v2545_v30 }
 0x2ea   : > { %v3118_v9 = vpop.f32.mrb[120].mxu1 }
 0x2eb   : > { %v2566_v14 = vadd.f32 %v3118_v9, %v4045_v34  ;;  %v2557_v50 = vpop.f32.mrb[121].mxu1 }
 0x2ec   : > { %v2558_v21 = vadd.f32 %v4045_v34, %v2557_v50  ;;  %v3119_v46 = vpop.f32.mrb[122].mxu1 }
 0x2ed   : > { %2646 = vst [vmem:[%s4052_s22 + $0x1d0] sm:$0xff] %v2566_v14  ;;  %v2569_v63 = vadd.f32 %v3119_v46, %v4045_v34  ;;  %v2560_v32 = vpop.f32.mrb[123].mxu1 }
 0x2ee   : > { %2644 = vst [vmem:[%s4052_s22 + $0x1c0] sm:$0xff] %v2558_v21  ;;  %v2561_v0 = vadd.f32 %v4045_v34, %v2560_v32 }
 0x2ef   : > { %2647 = vst [vmem:[%s4052_s22 + $0x1d8] sm:$0xff] %v2569_v63 }
 0x2f0   : > { %2645 = vst [vmem:[%s4052_s22 + $0x1c8] sm:$0xff] %v2561_v0 }
 0x2fa   : > { %v3122_v56 = vpop.f32.mrb[124].mxu1 }
 0x2fb   : > { %v2582_v41 = vadd.f32 %v3122_v56, %v4045_v34  ;;  %v2573_v37 = vpop.f32.mrb[125].mxu1 }
 0x2fc   : > { %v2574_v43 = vadd.f32 %v4045_v34, %v2573_v37  ;;  %v3123_v2 = vpop.f32.mrb[126].mxu1 }
 0x2fd   : > { %2650 = vst [vmem:[%s4052_s22 + $0x1f0] sm:$0xff] %v2582_v41  ;;  %v2585_v12 = vadd.f32 %v3123_v2, %v4045_v34  ;;  %v2576_v52 = vpop.f32.mrb[127].mxu1 }
 0x2fe   : > { %2648 = vst [vmem:[%s4052_s22 + $0x1e0] sm:$0xff] %v2574_v43  ;;  %v2577_v5 = vadd.f32 %v4045_v34, %v2576_v52 }
 0x2ff   : > { %2651 = vst [vmem:[%s4052_s22 + $0x1f8] sm:$0xff] %v2585_v12 }
 0x300   : > { %2649 = vst [vmem:[%s4052_s22 + $0x1e8] sm:$0xff] %v2577_v5 }
 0x301 PF: > { %s15_s20 = sadd.s32 1, %s3327_s20   ;;  %s4215_s18 = smov %s3323_s19 }
 0x302   : > { %p12_p5 = scmp.ge.s32.totalorder %s15_s20, 6   ;;  %s4216_s19 = smov %s4218_s21 }
 0x304   :  { %14 = sbr.rel (!%p12_p5) target bundleno = 2 (0x2), region = 81 }

// kernel: depth_aware_fe.5
= control target key start
LH: loop header
LB: loop body
LE: loop exit
PB: predicated region body
PF: predicated region fallthrough
CT: control target
= control target key end

     0   :  { %v4495_v0 = vmov 0   ;;  %s6103_s1 = inlined_call_operand.vmem [shape: bf16[896,128], index: 1, kind: input, shape index: {}]   ;;  %s6104_s0 = inlined_call_operand.vmem [shape: bf16[512,896], index: 0, kind: input, shape index: {}]   ;;  %s6105_s2 = inlined_call_operand.vmem [shape: f32[1,128], index: 2, kind: input, shape index: {}]   ;;  %s6106_s3 = inlined_call_operand.vmem [shape: f32[512,128], index: 3, kind: output, shape index: {}]  }
   0x1   :  { %2003 = vmatprep.subr.bf16.mxu1 %v4495_v0  ;;  %2292 = vmatprep.subr.bf16.mxu0 %v4495_v0  ;;  %v4119_v1 = vld [vmem:[%s6103_s1] sm:$0xff]   ;;  %v4121_v3 = vld [vmem:[%s6103_s1 + $0x8] sm:$0xff]   ;;  %v4123_v5 = vld [vmem:[%s6103_s1 + $0x10] sm:$0xff]  }
   0x2   :  { %v4524_v2 = vld [vmem:[%s6103_s1 + $0x80] sm:$0xff]   ;;  %2004 = vmatpush1.bf16.msra.mxu1 %v4119_v1  ;;  %v4534_v4 = vld [vmem:[%s6103_s1 + $0x88] sm:$0xff]   ;;  %v4545_v6 = vld [vmem:[%s6103_s1 + $0x90] sm:$0xff]  }
   0x3   :  { %2293 = vmatpush1.bf16.msra.mxu0 %v4524_v2  ;;  %2005 = vmatprep.subr.bf16.mxu1 %v4495_v0  ;;  %v4125_v7 = vld [vmem:[%s6103_s1 + $0x18] sm:$0xff]   ;;  %v4127_v9 = vld [vmem:[%s6103_s1 + $0x20] sm:$0xff]   ;;  %v4129_v11 = vld [vmem:[%s6103_s1 + $0x28] sm:$0xff]  }
   0x4   :  { %2294 = vmatprep.subr.bf16.mxu0 %v4495_v0  ;;  %v4556_v8 = vld [vmem:[%s6103_s1 + $0x98] sm:$0xff]   ;;  %v4567_v10 = vld [vmem:[%s6103_s1 + $0xa0] sm:$0xff]   ;;  %v4578_v12 = vld [vmem:[%s6103_s1 + $0xa8] sm:$0xff]  }
   0x5   :  { %v4131_v13 = vld [vmem:[%s6103_s1 + $0x30] sm:$0xff]   ;;  %v4133_v15 = vld [vmem:[%s6103_s1 + $0x38] sm:$0xff]   ;;  %v4135_v17 = vld [vmem:[%s6103_s1 + $0x40] sm:$0xff]  }
   0x6   :  { %2006 = vmatpush1.bf16.msra.mxu1 %v4121_v3  ;;  %v4589_v14 = vld [vmem:[%s6103_s1 + $0xb0] sm:$0xff]   ;;  %v4600_v16 = vld [vmem:[%s6103_s1 + $0xb8] sm:$0xff]   ;;  %v4611_v18 = vld [vmem:[%s6103_s1 + $0xc0] sm:$0xff]  }
   0x7   :  { %2295 = vmatpush1.bf16.msra.mxu0 %v4534_v4  ;;  %2007 = vmatprep.subr.bf16.mxu1 %v4495_v0  ;;  %v4153_v19 = vld [vmem:[%s6104_s0 + $0x4] ss:$28 sps:$4 sm:$0xff]   ;;  %v4137_v20 = vld [vmem:[%s6103_s1 + $0x48] sm:$0xff]   ;;  %v4139_v23 = vld [vmem:[%s6103_s1 + $0x50] sm:$0xff]  }
   0x8   :  { %2296 = vmatprep.subr.bf16.mxu0 %v4495_v0  ;;  %v4156_v21 = vld [vmem:[%s6104_s0 + $0xc] ss:$28 sps:$4 sm:$0xff]   ;;  %2035 = vmatprep.mubr.bf16.mxu1 %v4153_v19  ;;  %v4639_v24 = vld [vmem:[%s6103_s1 + $0xd0] sm:$0xff]   ;;  %v4141_v25 = vld [vmem:[%s6103_s1 + $0x58] sm:$0xff]  }
   0x9   :  { %v4628_v22 = vld [vmem:[%s6103_s1 + $0xc8] sm:$0xff]   ;;  %2324 = vmatprep.mubr.bf16.mxu0 %v4156_v21  ;;  %v4650_v26 = vld [vmem:[%s6103_s1 + $0xd8] sm:$0xff]   ;;  %v4143_v27 = vld [vmem:[%s6103_s1 + $0x60] sm:$0xff]  }
   0xa   :  { %2008 = vmatpush1.bf16.msra.mxu1 %v4123_v5  ;;  %v4661_v28 = vld [vmem:[%s6103_s1 + $0xe0] sm:$0xff]   ;;  %v4145_v29 = vld [vmem:[%s6103_s1 + $0x68] sm:$0xff]   ;;  %v4147_v31 = vld [vmem:[%s6103_s1 + $0x70] sm:$0xff]  }
   0xb   :  { %2297 = vmatpush1.bf16.msra.mxu0 %v4545_v6  ;;  %2009 = vmatprep.subr.bf16.mxu1 %v4495_v0  ;;  %v4672_v30 = vld [vmem:[%s6103_s1 + $0xe8] sm:$0xff]   ;;  %v4683_v32 = vld [vmem:[%s6103_s1 + $0xf0] sm:$0xff]   ;;  %v4149_v33 = vld [vmem:[%s6103_s1 + $0x78] sm:$0xff]  }
   0xc   :  { %2298 = vmatprep.subr.bf16.mxu0 %v4495_v0  ;;  %v4694_v34 = vld [vmem:[%s6103_s1 + $0xf8] sm:$0xff]   ;;  %v4154_v36 = vld [vmem:[%s6104_s0 + $0x8] ss:$28 sps:$4 sm:$0xff]   ;;  %v4165_v43 = vld [vmem:[%s6104_s0 + $0x74] ss:$28 sps:$4 sm:$0xff]  }
   0xd   :  { %v4151_v35 = vld [vmem:[%s6104_s0] ss:$28 sps:$4 sm:$0xff]   ;;  %v4164_v40 = vld [vmem:[%s6103_s1 + $0x108] sm:$0xff]   ;;  %v4162_v41 = vld [vmem:[%s6104_s0 + $0x38] ss:$28 sps:$4 sm:$0xff]  }
   0xe   :  { %2010 = vmatpush1.bf16.msra.mxu1 %v4125_v7  ;;  %v4157_v37 = vld [vmem:[%s6103_s1 + $0x100] sm:$0xff]   ;;  %v4158_v38 = vld [vmem:[%s6104_s0 + $0x3c] ss:$28 sps:$4 sm:$0xff]   ;;  %v4177_v45 = vld [vmem:[%s6103_s1 + $0x110] sm:$0xff]  }
   0xf   :  { %2299 = vmatpush1.bf16.msra.mxu0 %v4556_v8  ;;  %2011 = vmatprep.subr.bf16.mxu1 %v4495_v0  ;;  %v4160_v39 = vld [vmem:[%s6104_s0 + $0x44] ss:$28 sps:$4 sm:$0xff]   ;;  %v4167_v44 = vld [vmem:[%s6104_s0 + $0x7c] ss:$28 sps:$4 sm:$0xff]   ;;  %v4169_v47 = vld [vmem:[%s6104_s0 + $0x70] ss:$28 sps:$4 sm:$0xff]  }
  0x10   :  { %2300 = vmatprep.subr.bf16.mxu0 %v4495_v0  ;;  %v4163_v42 = vld [vmem:[%s6104_s0 + $0x40] ss:$28 sps:$4 sm:$0xff]   ;;  %v4170_v48 = vld [vmem:[%s6104_s0 + $0x78] ss:$28 sps:$4 sm:$0xff]   ;;  %v4171_v49 = vld [vmem:[%s6104_s0 + $0xac] ss:$28 sps:$4 sm:$0xff]  }
  0x11   :  { %v4184_v46 = vld [vmem:[%s6103_s1 + $0x118] sm:$0xff]   ;;  %v4173_v50 = vld [vmem:[%s6104_s0 + $0xb4] ss:$28 sps:$4 sm:$0xff]   ;;  %v4197_v51 = vld [vmem:[%s6103_s1 + $0x120] sm:$0xff]  }
  0x12   :  { %2012 = vmatpush1.bf16.msra.mxu1 %v4127_v9  ;;  %v4204_v52 = vld [vmem:[%s6103_s1 + $0x128] sm:$0xff]   ;;  %v4178_v55 = vld [vmem:[%s6104_s0 + $0xe4] ss:$28 sps:$4 sm:$0xff]   ;;  %v4217_v57 = vld [vmem:[%s6103_s1 + $0x130] sm:$0xff]  }
  0x13   :  { %2301 = vmatpush1.bf16.msra.mxu0 %v4567_v10  ;;  %2013 = vmatprep.subr.bf16.mxu1 %v4495_v0  ;;  %v4175_v53 = vld [vmem:[%s6104_s0 + $0xa8] ss:$28 sps:$4 sm:$0xff]   ;;  %v4176_v54 = vld [vmem:[%s6104_s0 + $0xb0] ss:$28 sps:$4 sm:$0xff]   ;;  %v4224_v58 = vld [vmem:[%s6103_s1 + $0x138] sm:$0xff]  }
  0x14   :  { %2302 = vmatprep.subr.bf16.mxu0 %v4495_v0  ;;  %v4180_v56 = vld [vmem:[%s6104_s0 + $0xec] ss:$28 sps:$4 sm:$0xff]   ;;  %v4182_v59 = vld [vmem:[%s6104_s0 + $0xe0] ss:$28 sps:$4 sm:$0xff]   ;;  %v4196_v9 = vld [vmem:[%s6104_s0 + $0x158] ss:$28 sps:$4 sm:$0xff]  }
  0x15   :  { %v4183_v60 = vld [vmem:[%s6104_s0 + $0xe8] ss:$28 sps:$4 sm:$0xff]   ;;  %v4185_v61 = vld [vmem:[%s6104_s0 + $0x11c] ss:$28 sps:$4 sm:$0xff]   ;;  %v4195_v7 = vld [vmem:[%s6104_s0 + $0x150] ss:$28 sps:$4 sm:$0xff]  }
  0x16   :  { %2014 = vmatpush1.bf16.msra.mxu1 %v4129_v11  ;;  %v4187_v62 = vld [vmem:[%s6104_s0 + $0x124] ss:$28 sps:$4 sm:$0xff]   ;;  %v4244_v1 = vld [vmem:[%s6103_s1 + $0x148] sm:$0xff]   ;;  %v4193_v5 = vld [vmem:[%s6104_s0 + $0x15c] ss:$28 sps:$4 sm:$0xff]  }
  0x17   :  { %2303 = vmatpush1.bf16.msra.mxu0 %v4578_v12  ;;  %2015 = vmatprep.subr.bf16.mxu1 %v4495_v0  ;;  %v4237_v63 = vld [vmem:[%s6103_s1 + $0x140] sm:$0xff]   ;;  %v4200_v11 = vld [vmem:[%s6104_s0 + $0x194] ss:$28 sps:$4 sm:$0xff]  }
  0x18   :  { %2304 = vmatprep.subr.bf16.mxu0 %v4495_v0  ;;  %v4190_v3 = vld [vmem:[%s6104_s0 + $0x120] ss:$28 sps:$4 sm:$0xff]   ;;  %v4210_v21 = vld [vmem:[%s6104_s0 + $0x1c8] ss:$28 sps:$4 sm:$0xff]  }
  0x19   :  { %v4209_v19 = vld [vmem:[%s6104_s0 + $0x1c0] ss:$28 sps:$4 sm:$0xff]  }
  0x1a   :  { %2016 = vmatpush1.bf16.msra.mxu1 %v4131_v13  ;;  %v4202_v13 = vld [vmem:[%s6104_s0 + $0x188] ss:$28 sps:$4 sm:$0xff]  }
  0x1b   :  { %2305 = vmatpush1.bf16.msra.mxu0 %v4589_v14  ;;  %2017 = vmatprep.subr.bf16.mxu1 %v4495_v0 }
  0x1c   :  { %2306 = vmatprep.subr.bf16.mxu0 %v4495_v0 }
  0x1e   :  { %2018 = vmatpush1.bf16.msra.mxu1 %v4133_v15  ;;  %v4203_v15 = vld [vmem:[%s6104_s0 + $0x190] ss:$28 sps:$4 sm:$0xff]  }
  0x1f   :  { %2307 = vmatpush1.bf16.msra.mxu0 %v4600_v16  ;;  %2019 = vmatprep.subr.bf16.mxu1 %v4495_v0 }
  0x20   :  { %2308 = vmatprep.subr.bf16.mxu0 %v4495_v0 }
  0x22   :  { %2020 = vmatpush1.bf16.msra.mxu1 %v4135_v17  ;;  %v4207_v17 = vld [vmem:[%s6104_s0 + $0x1cc] ss:$28 sps:$4 sm:$0xff]  }
  0x23   :  { %2309 = vmatpush1.bf16.msra.mxu0 %v4611_v18  ;;  %2021 = vmatprep.subr.bf16.mxu1 %v4495_v0 }
  0x24   :  { %2310 = vmatprep.subr.bf16.mxu0 %v4495_v0 }
  0x26   :  { %2022 = vmatpush1.bf16.msra.mxu1 %v4137_v20  ;;  %v4304_v20 = vld [vmem:[%s6103_s1 + $0x178] sm:$0xff]  }
  0x27   :  { %2311 = vmatpush1.bf16.msra.mxu0 %v4628_v22  ;;  %2023 = vmatprep.subr.bf16.mxu1 %v4495_v0 }
  0x28   :  { %2312 = vmatprep.subr.bf16.mxu0 %v4495_v0 }
  0x2a   :  { %2024 = vmatpush1.bf16.msra.mxu1 %v4139_v23  ;;  %v4213_v23 = vld [vmem:[%s6104_s0 + $0x204] ss:$28 sps:$4 sm:$0xff]  }
  0x2b   :  { %2313 = vmatpush1.bf16.msra.mxu0 %v4639_v24  ;;  %2025 = vmatprep.subr.bf16.mxu1 %v4495_v0 }
  0x2c   :  { %2314 = vmatprep.subr.bf16.mxu0 %v4495_v0 }
  0x2e   :  { %2026 = vmatpush1.bf16.msra.mxu1 %v4141_v25  ;;  %v4216_v25 = vld [vmem:[%s6104_s0 + $0x200] ss:$28 sps:$4 sm:$0xff]  }
  0x2f   :  { %2315 = vmatpush1.bf16.msra.mxu0 %v4650_v26  ;;  %2027 = vmatprep.subr.bf16.mxu1 %v4495_v0 }
  0x30   :  { %2316 = vmatprep.subr.bf16.mxu0 %v4495_v0 }
  0x32   :  { %2028 = vmatpush1.bf16.msra.mxu1 %v4143_v27  ;;  %v4222_v27 = vld [vmem:[%s6104_s0 + $0x230] ss:$28 sps:$4 sm:$0xff]  }
  0x33   :  { %2317 = vmatpush1.bf16.msra.mxu0 %v4661_v28  ;;  %2029 = vmatprep.subr.bf16.mxu1 %v4495_v0 }
  0x34   :  { %2318 = vmatprep.subr.bf16.mxu0 %v4495_v0 }
  0x36   :  { %2030 = vmatpush1.bf16.msra.mxu1 %v4145_v29  ;;  %v4225_v29 = vld [vmem:[%s6104_s0 + $0x26c] ss:$28 sps:$4 sm:$0xff]  }
  0x37   :  { %2319 = vmatpush1.bf16.msra.mxu0 %v4672_v30  ;;  %2031 = vmatprep.subr.bf16.mxu1 %v4495_v0 }
  0x38   :  { %2320 = vmatprep.subr.bf16.mxu0 %v4495_v0 }
  0x3a   :  { %2032 = vmatpush1.bf16.msra.mxu1 %v4147_v31  ;;  %v4229_v31 = vld [vmem:[%s6104_s0 + $0x268] ss:$28 sps:$4 sm:$0xff]  }
  0x3b   :  { %2321 = vmatpush1.bf16.msra.mxu0 %v4683_v32  ;;  %2033 = vmatprep.subr.bf16.mxu1 %v4495_v0 }
  0x3c   :  { %2322 = vmatprep.subr.bf16.mxu0 %v4495_v0 }
  0x3e   :  { %2034 = vmatpush1.bf16.msra.mxu1 %v4149_v33  ;;  %v4231_v33 = vld [vmem:[%s6104_s0 + $0x2a4] ss:$28 sps:$4 sm:$0xff]  }
  0x3f   :  { %2323 = vmatpush1.bf16.msra.mxu0 %v4694_v34  ;;  %3894 = vmatprep.subr.bf16.mxu1 %v4495_v0 }
  0x40   :  { %2581 = vmatprep.subr.bf16.mxu0 %v4495_v0 }
  0x41   :  { %2036 = vmatmul.mubr.bf16.vlgmr.msra.gmra.mrb[0].mxu1 %v4151_v35  ;;  %v4235_v35 = vld [vmem:[%s6104_s0 + $0x2a0] ss:$28 sps:$4 sm:$0xff]  }
  0x42   :  { %2325 = vmatmul.mubr.bf16.vlgmr.msra.gmra.mrb[0].mxu0 %v4154_v36  ;;  %3910 = vmatpush1.bf16.msra.mxu1 %v4524_v2  ;;  %v4189_v2 = vld [vmem:[%s6104_s0 + $0x118] ss:$28 sps:$4 sm:$0xff]   ;;  %v4236_v36 = vld [vmem:[%s6104_s0 + $0x2a8] ss:$28 sps:$4 sm:$0xff]  }
  0x43   :  { %2582 = vmatpush1.bf16.msra.mxu0 %v4157_v37  ;;  %2043 = vmatprep.mubr.bf16.mxu1 %v4158_v38  ;;  %v4238_v37 = vld [vmem:[%s6104_s0 + $0x2dc] ss:$28 sps:$4 sm:$0xff]   ;;  %v4240_v38 = vld [vmem:[%s6104_s0 + $0x2e4] ss:$28 sps:$4 sm:$0xff]  }
  0x44   :  { %2332 = vmatprep.mubr.bf16.mxu0 %v4160_v39  ;;  %2583 = vmatprep.subr.bf16.mxu0 %v4495_v0  ;;  %v4242_v39 = vld [vmem:[%s6104_s0 + $0x2d8] ss:$28 sps:$4 sm:$0xff]  }
  0x45   :  { %3895 = vmatprep.subr.bf16.mxu1 %v4495_v0 }
  0x46   :  { %3911 = vmatpush1.bf16.msra.mxu1 %v4534_v4  ;;  %v4191_v4 = vld [vmem:[%s6104_s0 + $0x154] ss:$28 sps:$4 sm:$0xff]  }
  0x47   :  { %2584 = vmatpush1.bf16.msra.mxu0 %v4164_v40  ;;  %3896 = vmatprep.subr.bf16.mxu1 %v4495_v0  ;;  %v4243_v40 = vld [vmem:[%s6104_s0 + $0x2e0] ss:$28 sps:$4 sm:$0xff]  }
  0x48   :  { %2585 = vmatprep.subr.bf16.mxu0 %v4495_v0 }
  0x49   :  { %2044 = vmatmul.mubr.bf16.gmra.mrb[4].mxu1 %v4162_v41  ;;  %v4245_v41 = vld [vmem:[%s6104_s0 + $0x314] ss:$28 sps:$4 sm:$0xff]  }
  0x4a   :  { %2333 = vmatmul.mubr.bf16.gmra.mrb[4].mxu0 %v4163_v42  ;;  %2051 = vmatprep.mubr.bf16.mxu1 %v4165_v43  ;;  %v4247_v42 = vld [vmem:[%s6104_s0 + $0x31c] ss:$28 sps:$4 sm:$0xff]   ;;  %v4249_v43 = vld [vmem:[%s6104_s0 + $0x310] ss:$28 sps:$4 sm:$0xff]  }
  0x4b   :  { %2340 = vmatprep.mubr.bf16.mxu0 %v4167_v44  ;;  %2586 = vmatpush1.bf16.msra.mxu0 %v4177_v45  ;;  %v4250_v44 = vld [vmem:[%s6104_s0 + $0x318] ss:$28 sps:$4 sm:$0xff]   ;;  %v4251_v45 = vld [vmem:[%s6104_s0 + $0x34c] ss:$28 sps:$4 sm:$0xff]  }
  0x4c   :  { %3912 = vmatpush1.bf16.msra.mxu1 %v4545_v6  ;;  %2587 = vmatprep.subr.bf16.mxu0 %v4495_v0  ;;  %v4257_v6 = vld [vmem:[%s6103_s1 + $0x150] sm:$0xff]  }
  0x4d   :  { %3897 = vmatprep.subr.bf16.mxu1 %v4495_v0 }
  0x4f   :  { %2588 = vmatpush1.bf16.msra.mxu0 %v4184_v46  ;;  %v4253_v46 = vld [vmem:[%s6104_s0 + $0x354] ss:$28 sps:$4 sm:$0xff]  }
  0x50   :  { %2589 = vmatprep.subr.bf16.mxu0 %v4495_v0  ;;  %3913 = vmatpush1.bf16.msra.mxu1 %v4556_v8  ;;  %v4264_v8 = vld [vmem:[%s6103_s1 + $0x158] sm:$0xff]  }
  0x51   :  { %2052 = vmatmul.mubr.bf16.gmra.mrb[8].mxu1 %v4169_v47  ;;  %3898 = vmatprep.subr.bf16.mxu1 %v4495_v0  ;;  %v4255_v47 = vld [vmem:[%s6104_s0 + $0x348] ss:$28 sps:$4 sm:$0xff]  }
  0x52   :  { %2341 = vmatmul.mubr.bf16.gmra.mrb[8].mxu0 %v4170_v48  ;;  %2059 = vmatprep.mubr.bf16.mxu1 %v4171_v49  ;;  %v4256_v48 = vld [vmem:[%s6104_s0 + $0x350] ss:$28 sps:$4 sm:$0xff]   ;;  %v4258_v49 = vld [vmem:[%s6104_s0 + $0x384] ss:$28 sps:$4 sm:$0xff]  }
  0x53   :  { %2348 = vmatprep.mubr.bf16.mxu0 %v4173_v50  ;;  %2590 = vmatpush1.bf16.msra.mxu0 %v4197_v51  ;;  %v4260_v50 = vld [vmem:[%s6104_s0 + $0x38c] ss:$28 sps:$4 sm:$0xff]   ;;  %v4262_v51 = vld [vmem:[%s6104_s0 + $0x380] ss:$28 sps:$4 sm:$0xff]  }
  0x54   :  { %2591 = vmatprep.subr.bf16.mxu0 %v4495_v0  ;;  %3914 = vmatpush1.bf16.msra.mxu1 %v4567_v10  ;;  %v4198_v10 = vld [vmem:[%s6104_s0 + $0x18c] ss:$28 sps:$4 sm:$0xff]  }
  0x55   :  { %3899 = vmatprep.subr.bf16.mxu1 %v4495_v0 }
  0x57   :  { %2592 = vmatpush1.bf16.msra.mxu0 %v4204_v52  ;;  %v4263_v52 = vld [vmem:[%s6104_s0 + $0x388] ss:$28 sps:$4 sm:$0xff]  }
  0x58   :  { %2593 = vmatprep.subr.bf16.mxu0 %v4495_v0  ;;  %3915 = vmatpush1.bf16.msra.mxu1 %v4578_v12  ;;  %v4277_v12 = vld [vmem:[%s6103_s1 + $0x160] sm:$0xff]  }
  0x59   :  { %2060 = vmatmul.mubr.bf16.gmra.mrb[12].mxu1 %v4175_v53  ;;  %3900 = vmatprep.subr.bf16.mxu1 %v4495_v0  ;;  %v4265_v53 = vld [vmem:[%s6104_s0 + $0x3bc] ss:$28 sps:$4 sm:$0xff]  }
  0x5a   :  { %2349 = vmatmul.mubr.bf16.gmra.mrb[12].mxu0 %v4176_v54  ;;  %2067 = vmatprep.mubr.bf16.mxu1 %v4178_v55  ;;  %v4267_v54 = vld [vmem:[%s6104_s0 + $0x3c4] ss:$28 sps:$4 sm:$0xff]  }
  0x5b   :  { %2356 = vmatprep.mubr.bf16.mxu0 %v4180_v56  ;;  %2594 = vmatpush1.bf16.msra.mxu0 %v4217_v57  ;;  %v5001_v55 = vld [vmem:[%s6103_s1 + $0x180] sm:$0xff]   ;;  %v4269_v56 = vld [vmem:[%s6104_s0 + $0x3b8] ss:$28 sps:$4 sm:$0xff]  }
  0x5c   :  { %2595 = vmatprep.subr.bf16.mxu0 %v4495_v0  ;;  %3916 = vmatpush1.bf16.msra.mxu1 %v4589_v14  ;;  %v4284_v14 = vld [vmem:[%s6103_s1 + $0x168] sm:$0xff]   ;;  %v4270_v57 = vld [vmem:[%s6104_s0 + $0x3c0] ss:$28 sps:$4 sm:$0xff]  }
  0x5d   :  { %3901 = vmatprep.subr.bf16.mxu1 %v4495_v0 }
  0x5f   :  { %2596 = vmatpush1.bf16.msra.mxu0 %v4224_v58  ;;  %v4271_v58 = vld [vmem:[%s6104_s0 + $0x3f4] ss:$28 sps:$4 sm:$0xff]  }
  0x60   :  { %2597 = vmatprep.subr.bf16.mxu0 %v4495_v0  ;;  %3917 = vmatpush1.bf16.msra.mxu1 %v4600_v16  ;;  %v4205_v16 = vld [vmem:[%s6104_s0 + $0x1c4] ss:$28 sps:$4 sm:$0xff]  }
  0x61   :  { %2068 = vmatmul.mubr.bf16.gmra.mrb[16].mxu1 %v4182_v59  ;;  %3902 = vmatprep.subr.bf16.mxu1 %v4495_v0  ;;  %v4273_v59 = vld [vmem:[%s6104_s0 + $0x3fc] ss:$28 sps:$4 sm:$0xff]  }
  0x62   :  { %2357 = vmatmul.mubr.bf16.gmra.mrb[16].mxu0 %v4183_v60  ;;  %2075 = vmatprep.mubr.bf16.mxu1 %v4185_v61  ;;  %v4275_v60 = vld [vmem:[%s6104_s0 + $0x3f0] ss:$28 sps:$4 sm:$0xff]   ;;  %v4276_v61 = vld [vmem:[%s6104_s0 + $0x3f8] ss:$28 sps:$4 sm:$0xff]  }
  0x63   :  { %2364 = vmatprep.mubr.bf16.mxu0 %v4187_v62  ;;  %2598 = vmatpush1.bf16.msra.mxu0 %v4237_v63  ;;  %v4278_v62 = vld [vmem:[%s6104_s0 + $0x42c] ss:$28 sps:$4 sm:$0xff]   ;;  %v4280_v63 = vld [vmem:[%s6104_s0 + $0x434] ss:$28 sps:$4 sm:$0xff]  }
  0x64   :  { %2599 = vmatprep.subr.bf16.mxu0 %v4495_v0  ;;  %3918 = vmatpush1.bf16.msra.mxu1 %v4611_v18  ;;  %v4297_v18 = vld [vmem:[%s6103_s1 + $0x170] sm:$0xff]  }
  0x65   :  { %3903 = vmatprep.subr.bf16.mxu1 %v4495_v0 }
  0x67   :  { %2600 = vmatpush1.bf16.msra.mxu0 %v4244_v1  ;;  %v4282_v1 = vld [vmem:[%s6104_s0 + $0x428] ss:$28 sps:$4 sm:$0xff]  }
  0x68   :  { %2601 = vmatprep.subr.bf16.mxu0 %v4495_v0  ;;  %3919 = vmatpush1.bf16.msra.mxu1 %v4628_v22  ;;  %v4211_v22 = vld [vmem:[%s6104_s0 + $0x1fc] ss:$28 sps:$4 sm:$0xff]  }
  0x69   :  { %2076 = vmatmul.mubr.bf16.gmra.mrb[20].mxu1 %v4189_v2  ;;  %3904 = vmatprep.subr.bf16.mxu1 %v4495_v0  ;;  %v4283_v2 = vld [vmem:[%s6104_s0 + $0x430] ss:$28 sps:$4 sm:$0xff]  }
  0x6a   :  { %2365 = vmatmul.mubr.bf16.gmra.mrb[20].mxu0 %v4190_v3  ;;  %2083 = vmatprep.mubr.bf16.mxu1 %v4191_v4  ;;  %v4285_v3 = vld [vmem:[%s6104_s0 + $0x464] ss:$28 sps:$4 sm:$0xff]   ;;  %v4287_v4 = vld [vmem:[%s6104_s0 + $0x46c] ss:$28 sps:$4 sm:$0xff]  }
  0x6b   :  { %2372 = vmatprep.mubr.bf16.mxu0 %v4193_v5  ;;  %2602 = vmatpush1.bf16.msra.mxu0 %v4257_v6  ;;  %v4289_v5 = vld [vmem:[%s6104_s0 + $0x460] ss:$28 sps:$4 sm:$0xff]   ;;  %v4290_v6 = vld [vmem:[%s6104_s0 + $0x468] ss:$28 sps:$4 sm:$0xff]  }
  0x6c   :  { %2603 = vmatprep.subr.bf16.mxu0 %v4495_v0  ;;  %3920 = vmatpush1.bf16.msra.mxu1 %v4639_v24  ;;  %v4215_v24 = vld [vmem:[%s6104_s0 + $0x1f8] ss:$28 sps:$4 sm:$0xff]  }
  0x6d   :  { %3905 = vmatprep.subr.bf16.mxu1 %v4495_v0 }
  0x6f   :  { %2604 = vmatpush1.bf16.msra.mxu0 %v4264_v8  ;;  %v4293_v8 = vld [vmem:[%s6104_s0 + $0x4a4] ss:$28 sps:$4 sm:$0xff]  }
  0x70   :  { %2605 = vmatprep.subr.bf16.mxu0 %v4495_v0  ;;  %3921 = vmatpush1.bf16.msra.mxu1 %v4650_v26  ;;  %v4218_v26 = vld [vmem:[%s6104_s0 + $0x234] ss:$28 sps:$4 sm:$0xff]  }
  0x71   :  { %2084 = vmatmul.mubr.bf16.gmra.mrb[24].mxu1 %v4195_v7  ;;  %3906 = vmatprep.subr.bf16.mxu1 %v4495_v0  ;;  %v4291_v7 = vld [vmem:[%s6104_s0 + $0x49c] ss:$28 sps:$4 sm:$0xff]  }
  0x72   :  { %2373 = vmatmul.mubr.bf16.gmra.mrb[24].mxu0 %v4196_v9  ;;  %2091 = vmatprep.mubr.bf16.mxu1 %v4198_v10  ;;  %v4295_v9 = vld [vmem:[%s6104_s0 + $0x498] ss:$28 sps:$4 sm:$0xff]   ;;  %v4296_v10 = vld [vmem:[%s6104_s0 + $0x4a0] ss:$28 sps:$4 sm:$0xff]  }
  0x73   :  { %2380 = vmatprep.mubr.bf16.mxu0 %v4200_v11  ;;  %2606 = vmatpush1.bf16.msra.mxu0 %v4277_v12  ;;  %v4298_v11 = vld [vmem:[%s6104_s0 + $0x4d4] ss:$28 sps:$4 sm:$0xff]   ;;  %v4300_v12 = vld [vmem:[%s6104_s0 + $0x4dc] ss:$28 sps:$4 sm:$0xff]  }
  0x74   :  { %2607 = vmatprep.subr.bf16.mxu0 %v4495_v0  ;;  %3922 = vmatpush1.bf16.msra.mxu1 %v4661_v28  ;;  %v4223_v28 = vld [vmem:[%s6104_s0 + $0x238] ss:$28 sps:$4 sm:$0xff]  }
  0x75   :  { %3907 = vmatprep.subr.bf16.mxu1 %v4495_v0 }
  0x77   :  { %2608 = vmatpush1.bf16.msra.mxu0 %v4284_v14  ;;  %v4303_v14 = vld [vmem:[%s6104_s0 + $0x4d8] ss:$28 sps:$4 sm:$0xff]  }
  0x78   :  { %2609 = vmatprep.subr.bf16.mxu0 %v4495_v0  ;;  %3923 = vmatpush1.bf16.msra.mxu1 %v4672_v30  ;;  %v4227_v30 = vld [vmem:[%s6104_s0 + $0x274] ss:$28 sps:$4 sm:$0xff]  }
  0x79   :  { %2092 = vmatmul.mubr.bf16.gmra.mrb[28].mxu1 %v4202_v13  ;;  %3908 = vmatprep.subr.bf16.mxu1 %v4495_v0  ;;  %v4302_v13 = vld [vmem:[%s6104_s0 + $0x4d0] ss:$28 sps:$4 sm:$0xff]  }
  0x7a   :  { %2381 = vmatmul.mubr.bf16.gmra.mrb[28].mxu0 %v4203_v15  ;;  %2099 = vmatprep.mubr.bf16.mxu1 %v4205_v16  ;;  %v4305_v15 = vld [vmem:[%s6104_s0 + $0x50c] ss:$28 sps:$4 sm:$0xff]   ;;  %v4307_v16 = vld [vmem:[%s6104_s0 + $0x514] ss:$28 sps:$4 sm:$0xff]  }
  0x7b   :  { %2388 = vmatprep.mubr.bf16.mxu0 %v4207_v17  ;;  %2610 = vmatpush1.bf16.msra.mxu0 %v4297_v18  ;;  %v4309_v17 = vld [vmem:[%s6104_s0 + $0x508] ss:$28 sps:$4 sm:$0xff]   ;;  %v4310_v18 = vld [vmem:[%s6104_s0 + $0x510] ss:$28 sps:$4 sm:$0xff]  }
  0x7c   :  { %2611 = vmatprep.subr.bf16.mxu0 %v4495_v0  ;;  %3924 = vmatpush1.bf16.msra.mxu1 %v4683_v32  ;;  %v4230_v32 = vld [vmem:[%s6104_s0 + $0x270] ss:$28 sps:$4 sm:$0xff]  }
  0x7d   :  { %3909 = vmatprep.subr.bf16.mxu1 %v4495_v0  ;;  %v4220_v0 = vld [vmem:[%s6104_s0 + $0x23c] ss:$28 sps:$4 sm:$0xff]  }
  0x7f   :  { %2612 = vmatpush1.bf16.msra.mxu0 %v4304_v20  ;;  %v4315_v20 = vld [vmem:[%s6104_s0 + $0x14] ss:$28 sps:$4 sm:$0xff]  }
  0x80   :  { %3925 = vmatpush1.bf16.msra.mxu1 %v4694_v34  ;;  %v4233_v34 = vld [vmem:[%s6104_s0 + $0x2ac] ss:$28 sps:$4 sm:$0xff]  }
  0x81   :  { %2100 = vmatmul.mubr.bf16.gmra.mrb[32].mxu1 %v4209_v19  ;;  %3814 = vmatprep.subr.bf16.mxu1 %v5001_v55  ;;  %v4311_v19 = vld [vmem:[%s6104_s0 + $0x544] ss:$28 sps:$4 sm:$0xff]  }
  0x82   :  { %2389 = vmatmul.mubr.bf16.gmra.mrb[32].mxu0 %v4210_v21  ;;  %2107 = vmatprep.mubr.bf16.mxu1 %v4211_v22  ;;  %v4316_v21 = vld [vmem:[%s6104_s0 + $0x540] ss:$28 sps:$4 sm:$0xff]   ;;  %v4313_v22 = vld [vmem:[%s6104_s0 + $0x10] ss:$28 sps:$4 sm:$0xff]  }
  0x83   :  { %2396 = vmatprep.mubr.bf16.mxu0 %v4213_v23  ;;  %v4317_v23 = vld [vmem:[%s6104_s0 + $0x57c] ss:$28 sps:$4 sm:$0xff]  }
  0x89   :  { %2108 = vmatmul.mubr.bf16.gmra.mrb[36].mxu1 %v4215_v24  ;;  %v4319_v24 = vld [vmem:[%s6104_s0 + $0x4c] ss:$28 sps:$4 sm:$0xff]  }
  0x8a   :  { %2397 = vmatmul.mubr.bf16.gmra.mrb[36].mxu0 %v4216_v25  ;;  %2115 = vmatprep.mubr.bf16.mxu1 %v4218_v26  ;;  %v4321_v25 = vld [vmem:[%s6104_s0 + $0x578] ss:$28 sps:$4 sm:$0xff]   ;;  %v4322_v26 = vld [vmem:[%s6104_s0 + $0x48] ss:$28 sps:$4 sm:$0xff]  }
  0x8b   :  { %2404 = vmatprep.mubr.bf16.mxu0 %v4220_v0  ;;  %v4323_v0 = vld [vmem:[%s6104_s0 + $0x5b4] ss:$28 sps:$4 sm:$0xff]  }
  0x91   :  { %2116 = vmatmul.mubr.bf16.gmra.mrb[40].mxu1 %v4222_v27  ;;  %v4325_v27 = vld [vmem:[%s6104_s0 + $0x84] ss:$28 sps:$4 sm:$0xff]  }
  0x92   :  { %2405 = vmatmul.mubr.bf16.gmra.mrb[40].mxu0 %v4223_v28  ;;  %2123 = vmatprep.mubr.bf16.mxu1 %v4225_v29  ;;  %v4327_v28 = vld [vmem:[%s6104_s0 + $0x5b0] ss:$28 sps:$4 sm:$0xff]   ;;  %v4328_v29 = vld [vmem:[%s6104_s0 + $0x80] ss:$28 sps:$4 sm:$0xff]  }
  0x93   :  { %2412 = vmatprep.mubr.bf16.mxu0 %v4227_v30  ;;  %v4329_v30 = vld [vmem:[%s6104_s0 + $0x5ec] ss:$28 sps:$4 sm:$0xff]  }
  0x99   :  { %2124 = vmatmul.mubr.bf16.gmra.mrb[44].mxu1 %v4229_v31  ;;  %v4331_v31 = vld [vmem:[%s6104_s0 + $0xbc] ss:$28 sps:$4 sm:$0xff]  }
  0x9a   :  { %2413 = vmatmul.mubr.bf16.gmra.mrb[44].mxu0 %v4230_v32  ;;  %2131 = vmatprep.mubr.bf16.mxu1 %v4231_v33 }
  0x9b   :  { %2420 = vmatprep.mubr.bf16.mxu0 %v4233_v34  ;;  %v4333_v34 = vld [vmem:[%s6104_s0 + $0x5e8] ss:$28 sps:$4 sm:$0xff]  }
  0xa1   :  { %2132 = vmatmul.mubr.bf16.gmra.mrb[48].mxu1 %v4235_v35 }
  0xa2   :  { %2421 = vmatmul.mubr.bf16.gmra.mrb[48].mxu0 %v4236_v36  ;;  %2139 = vmatprep.mubr.bf16.mxu1 %v4238_v37  ;;  %v4334_v36 = vld [vmem:[%s6104_s0 + $0xb8] ss:$28 sps:$4 sm:$0xff]   ;;  %v4335_v37 = vld [vmem:[%s6104_s0 + $0x624] ss:$28 sps:$4 sm:$0xff]  }
  0xa3   :  { %2428 = vmatprep.mubr.bf16.mxu0 %v4240_v38 }
  0xa9   :  { %2140 = vmatmul.mubr.bf16.gmra.mrb[52].mxu1 %v4242_v39  ;;  %v4337_v39 = vld [vmem:[%s6104_s0 + $0xf4] ss:$28 sps:$4 sm:$0xff]  }
  0xaa   :  { %2429 = vmatmul.mubr.bf16.gmra.mrb[52].mxu0 %v4243_v40  ;;  %2147 = vmatprep.mubr.bf16.mxu1 %v4245_v41 }
  0xab   :  { %2436 = vmatprep.mubr.bf16.mxu0 %v4247_v42  ;;  %v4339_v42 = vld [vmem:[%s6104_s0 + $0x620] ss:$28 sps:$4 sm:$0xff]  }
  0xb1   :  { %2148 = vmatmul.mubr.bf16.gmra.mrb[56].mxu1 %v4249_v43 }
  0xb2   :  { %2437 = vmatmul.mubr.bf16.gmra.mrb[56].mxu0 %v4250_v44  ;;  %2155 = vmatprep.mubr.bf16.mxu1 %v4251_v45  ;;  %v4340_v44 = vld [vmem:[%s6104_s0 + $0xf0] ss:$28 sps:$4 sm:$0xff]   ;;  %v4341_v45 = vld [vmem:[%s6104_s0 + $0x65c] ss:$28 sps:$4 sm:$0xff]  }
  0xb3   :  { %2444 = vmatprep.mubr.bf16.mxu0 %v4253_v46 }
  0xb9   :  { %2156 = vmatmul.mubr.bf16.gmra.mrb[60].mxu1 %v4255_v47  ;;  %v4343_v47 = vld [vmem:[%s6104_s0 + $0x12c] ss:$28 sps:$4 sm:$0xff]  }
  0xba   :  { %2445 = vmatmul.mubr.bf16.gmra.mrb[60].mxu0 %v4256_v48  ;;  %2163 = vmatprep.mubr.bf16.mxu1 %v4258_v49 }
  0xbb   :  { %2452 = vmatprep.mubr.bf16.mxu0 %v4260_v50  ;;  %v4345_v50 = vld [vmem:[%s6104_s0 + $0x658] ss:$28 sps:$4 sm:$0xff]  }
  0xc1   :  { %2164 = vmatmul.mubr.bf16.gmra.mrb[64].mxu1 %v4262_v51 }
  0xc2   :  { %2453 = vmatmul.mubr.bf16.gmra.mrb[64].mxu0 %v4263_v52  ;;  %2171 = vmatprep.mubr.bf16.mxu1 %v4265_v53  ;;  %v4346_v52 = vld [vmem:[%s6104_s0 + $0x128] ss:$28 sps:$4 sm:$0xff]   ;;  %v4347_v53 = vld [vmem:[%s6104_s0 + $0x694] ss:$28 sps:$4 sm:$0xff]  }
  0xc3   :  { %2460 = vmatprep.mubr.bf16.mxu0 %v4267_v54 }
  0xc9   :  { %2172 = vmatmul.mubr.bf16.gmra.mrb[68].mxu1 %v4269_v56  ;;  %v4349_v56 = vld [vmem:[%s6104_s0 + $0x164] ss:$28 sps:$4 sm:$0xff]  }
  0xca   :  { %2461 = vmatmul.mubr.bf16.gmra.mrb[68].mxu0 %v4270_v57  ;;  %2179 = vmatprep.mubr.bf16.mxu1 %v4271_v58 }
  0xcb   :  { %2468 = vmatprep.mubr.bf16.mxu0 %v4273_v59  ;;  %v4351_v59 = vld [vmem:[%s6104_s0 + $0x690] ss:$28 sps:$4 sm:$0xff]  }
  0xd1   :  { %2180 = vmatmul.mubr.bf16.gmra.mrb[72].mxu1 %v4275_v60 }
  0xd2   :  { %2469 = vmatmul.mubr.bf16.gmra.mrb[72].mxu0 %v4276_v61  ;;  %2187 = vmatprep.mubr.bf16.mxu1 %v4278_v62  ;;  %v4352_v61 = vld [vmem:[%s6104_s0 + $0x160] ss:$28 sps:$4 sm:$0xff]   ;;  %v4353_v62 = vld [vmem:[%s6104_s0 + $0x6cc] ss:$28 sps:$4 sm:$0xff]  }
  0xd3   :  { %2476 = vmatprep.mubr.bf16.mxu0 %v4280_v63 }
  0xd9   :  { %2188 = vmatmul.mubr.bf16.gmra.mrb[76].mxu1 %v4282_v1  ;;  %v4355_v1 = vld [vmem:[%s6104_s0 + $0x19c] ss:$28 sps:$4 sm:$0xff]  }
  0xda   :  { %2477 = vmatmul.mubr.bf16.gmra.mrb[76].mxu0 %v4283_v2  ;;  %2195 = vmatprep.mubr.bf16.mxu1 %v4285_v3 }
  0xdb   :  { %2484 = vmatprep.mubr.bf16.mxu0 %v4287_v4  ;;  %v4357_v4 = vld [vmem:[%s6104_s0 + $0x6c8] ss:$28 sps:$4 sm:$0xff]  }
  0xe1   :  { %2196 = vmatmul.mubr.bf16.gmra.mrb[80].mxu1 %v4289_v5 }
  0xe2   :  { %2485 = vmatmul.mubr.bf16.gmra.mrb[80].mxu0 %v4290_v6  ;;  %2203 = vmatprep.mubr.bf16.mxu1 %v4291_v7  ;;  %v4358_v6 = vld [vmem:[%s6104_s0 + $0x198] ss:$28 sps:$4 sm:$0xff]   ;;  %v4361_v7 = vld [vmem:[%s6104_s0 + $0x54c] ss:$28 sps:$4 sm:$0xff]  }
  0xe3   :  { %2492 = vmatprep.mubr.bf16.mxu0 %v4293_v8 }
  0xe9   :  { %2204 = vmatmul.mubr.bf16.gmra.mrb[84].mxu1 %v4295_v9  ;;  %v4362_v9 = vld [vmem:[%s6104_s0 + $0x1d4] ss:$28 sps:$4 sm:$0xff]  }
  0xea   :  { %2493 = vmatmul.mubr.bf16.gmra.mrb[84].mxu0 %v4296_v10  ;;  %2211 = vmatprep.mubr.bf16.mxu1 %v4298_v11 }
  0xeb   :  { %2500 = vmatprep.mubr.bf16.mxu0 %v4300_v12  ;;  %v4359_v12 = vld [vmem:[%s6104_s0 + $0x548] ss:$28 sps:$4 sm:$0xff]  }
  0xf1   :  { %2212 = vmatmul.mubr.bf16.gmra.mrb[88].mxu1 %v4302_v13 }
  0xf2   :  { %2501 = vmatmul.mubr.bf16.gmra.mrb[88].mxu0 %v4303_v14  ;;  %2219 = vmatprep.mubr.bf16.mxu1 %v4305_v15  ;;  %v4364_v14 = vld [vmem:[%s6104_s0 + $0x1d0] ss:$28 sps:$4 sm:$0xff]  }
  0xf3   :  { %2508 = vmatprep.mubr.bf16.mxu0 %v4307_v16  ;;  %v4366_v16 = vld [vmem:[%s6104_s0 + $0x584] ss:$28 sps:$4 sm:$0xff]  }
  0xf9   :  { %2220 = vmatmul.mubr.bf16.gmra.mrb[92].mxu1 %v4309_v17  ;;  %v4368_v17 = vld [vmem:[%s6104_s0 + $0x20c] ss:$28 sps:$4 sm:$0xff]  }
  0xfa   :  { %2509 = vmatmul.mubr.bf16.gmra.mrb[92].mxu0 %v4310_v18  ;;  %2227 = vmatprep.mubr.bf16.mxu1 %v4311_v19  ;;  %v4372_v18 = vld [vmem:[%s6103_s1 + $0x188] sm:$0xff]   ;;  %v4379_v19 = vld [vmem:[%s6103_s1 + $0x190] sm:$0xff]  }
  0xfb   :  { %2613 = vmatprep.mubr.bf16.mxu0 %v4315_v20 }
 0x101   :  { %2228 = vmatmul.mubr.bf16.gmra.mrb[96].mxu1 %v4316_v21 }
 0x102   :  { %2614 = vmatmul.mubr.bf16.vlgmr.msra.gmra.mrb[0].mxu0 %v4313_v22  ;;  %2235 = vmatprep.mubr.bf16.mxu1 %v4317_v23  ;;  %v4370_v22 = vld [vmem:[%s6104_s0 + $0x580] ss:$28 sps:$4 sm:$0xff]  }
 0x103   :  { %2621 = vmatprep.mubr.bf16.mxu0 %v4319_v24  ;;  %v4373_v24 = vld [vmem:[%s6104_s0 + $0x5bc] ss:$28 sps:$4 sm:$0xff]  }
 0x109   :  { %2236 = vmatmul.mubr.bf16.gmra.mrb[100].mxu1 %v4321_v25 }
 0x10a   :  { %2622 = vmatmul.mubr.bf16.gmra.mrb[4].mxu0 %v4322_v26  ;;  %2243 = vmatprep.mubr.bf16.mxu1 %v4323_v0  ;;  %v4375_v26 = vld [vmem:[%s6104_s0 + $0x244] ss:$28 sps:$4 sm:$0xff]   ;;  %v4386_v0 = vld [vmem:[%s6103_s1 + $0x198] sm:$0xff]  }
 0x10b   :  { %2629 = vmatprep.mubr.bf16.mxu0 %v4325_v27 }
 0x111   :  { %2244 = vmatmul.mubr.bf16.gmra.mrb[104].mxu1 %v4327_v28  ;;  %v4393_v28 = vld [vmem:[%s6103_s1 + $0x1a0] sm:$0xff]  }
 0x112   :  { %2630 = vmatmul.mubr.bf16.gmra.mrb[8].mxu0 %v4328_v29  ;;  %2251 = vmatprep.mubr.bf16.mxu1 %v4329_v30  ;;  %v4377_v30 = vld [vmem:[%s6104_s0 + $0x5b8] ss:$28 sps:$4 sm:$0xff]  }
 0x113   :  { %2637 = vmatprep.mubr.bf16.mxu0 %v4331_v31 }
 0x114   :  { %v5124_v32 = vpop.f32.mrb[0].mxu1 }
 0x115   :  { %v2039_v33 = vpop.f32.mrb[1].mxu1 }
 0x116   :  { %v5129_v35 = vpop.f32.mrb[2].mxu1  ;;  %v4378_v33 = vld [vmem:[%s6104_s0 + $0x240] ss:$28 sps:$4 sm:$0xff]  }
 0x117   :  { %v2042_v38 = vpop.f32.mrb[3].mxu1 }
 0x118   :  { %v4400_v38 = vld [vmem:[%s6103_s1 + $0x1a8] sm:$0xff]  }
 0x119   :  { %2252 = vmatmul.mubr.bf16.gmra.mrb[108].mxu1 %v4333_v34  ;;  %v4380_v34 = vld [vmem:[%s6104_s0 + $0x5f4] ss:$28 sps:$4 sm:$0xff]  }
 0x11a   :  { %2638 = vmatmul.mubr.bf16.gmra.mrb[12].mxu0 %v4334_v36  ;;  %2259 = vmatprep.mubr.bf16.mxu1 %v4335_v37  ;;  %v4382_v37 = vld [vmem:[%s6104_s0 + $0x27c] ss:$28 sps:$4 sm:$0xff]  }
 0x11b   :  { %2645 = vmatprep.mubr.bf16.mxu0 %v4337_v39 }
 0x11c   :  { %v5140_v40 = vpop.f32.mrb[4].mxu1 }
 0x11d   :  { %v2047_v41 = vpop.f32.mrb[5].mxu1 }
 0x11e   :  { %v5145_v43 = vpop.f32.mrb[6].mxu1  ;;  %v4407_v41 = vld [vmem:[%s6103_s1 + $0x1b0] sm:$0xff]  }
 0x11f   :  { %v2050_v46 = vpop.f32.mrb[7].mxu1 }
 0x120   :  { %v4385_v46 = vld [vmem:[%s6104_s0 + $0x278] ss:$28 sps:$4 sm:$0xff]  }
 0x121   :  { %2260 = vmatmul.mubr.bf16.gmra.mrb[112].mxu1 %v4339_v42 }
 0x122   :  { %2646 = vmatmul.mubr.bf16.gmra.mrb[16].mxu0 %v4340_v44  ;;  %2267 = vmatprep.mubr.bf16.mxu1 %v4341_v45  ;;  %v4384_v44 = vld [vmem:[%s6104_s0 + $0x5f0] ss:$28 sps:$4 sm:$0xff]  }
 0x123   :  { %2653 = vmatprep.mubr.bf16.mxu0 %v4343_v47  ;;  %v4387_v47 = vld [vmem:[%s6104_s0 + $0x62c] ss:$28 sps:$4 sm:$0xff]  }
 0x124   :  { %v5156_v48 = vpop.f32.mrb[8].mxu1 }
 0x125   :  { %v2055_v49 = vpop.f32.mrb[9].mxu1 }
 0x126   :  { %v5161_v51 = vpop.f32.mrb[10].mxu1 }
 0x127   :  { %v2058_v54 = vpop.f32.mrb[11].mxu1 }
 0x129   :  { %2268 = vmatmul.mubr.bf16.gmra.mrb[116].mxu1 %v4345_v50  ;;  %v4389_v50 = vld [vmem:[%s6104_s0 + $0x2b4] ss:$28 sps:$4 sm:$0xff]  }
 0x12a   :  { %2654 = vmatmul.mubr.bf16.gmra.mrb[20].mxu0 %v4346_v52  ;;  %2275 = vmatprep.mubr.bf16.mxu1 %v4347_v53  ;;  %v4414_v52 = vld [vmem:[%s6103_s1 + $0x1b8] sm:$0xff]  }
 0x12b   :  { %2661 = vmatprep.mubr.bf16.mxu0 %v4349_v56  ;;  %v4391_v56 = vld [vmem:[%s6104_s0 + $0x628] ss:$28 sps:$4 sm:$0xff]  }
 0x12c   :  { %v5172_v57 = vpop.f32.mrb[12].mxu1 }
 0x12d   :  { %v2063_v58 = vpop.f32.mrb[13].mxu1 }
 0x12e   :  { %v5177_v60 = vpop.f32.mrb[14].mxu1 }
 0x12f   :  { %v2066_v63 = vpop.f32.mrb[15].mxu1 }
 0x130   :  { %v4396_v63 = vld [vmem:[%s6104_s0 + $0x2ec] ss:$28 sps:$4 sm:$0xff]  }
 0x131   :  { %2276 = vmatmul.mubr.bf16.gmra.mrb[120].mxu1 %v4351_v59  ;;  %v4392_v59 = vld [vmem:[%s6104_s0 + $0x2b0] ss:$28 sps:$4 sm:$0xff]  }
 0x132   :  { %2662 = vmatmul.mubr.bf16.gmra.mrb[24].mxu0 %v4352_v61  ;;  %2283 = vmatprep.mubr.bf16.mxu1 %v4353_v62  ;;  %v4394_v61 = vld [vmem:[%s6104_s0 + $0x664] ss:$28 sps:$4 sm:$0xff]  }
 0x133   :  { %2669 = vmatprep.mubr.bf16.mxu0 %v4355_v1 }
 0x134   :  { %v5188_v2 = vpop.f32.mrb[16].mxu1 }
 0x135   :  { %v2071_v3 = vpop.f32.mrb[17].mxu1 }
 0x136   :  { %v5193_v5 = vpop.f32.mrb[18].mxu1 }
 0x137   :  { %v2074_v8 = vpop.f32.mrb[19].mxu1 }
 0x138   :  { %v4401_v8 = vld [vmem:[%s6104_s0 + $0x69c] ss:$28 sps:$4 sm:$0xff]  }
 0x139   :  { %2284 = vmatmul.mubr.bf16.gmra.mrb[124].mxu1 %v4357_v4  ;;  %v4398_v4 = vld [vmem:[%s6104_s0 + $0x660] ss:$28 sps:$4 sm:$0xff]  }
 0x13a   :  { %2670 = vmatmul.mubr.bf16.gmra.mrb[28].mxu0 %v4358_v6  ;;  %2516 = vmatprep.mubr.bf16.mxu1 %v4361_v7  ;;  %v4399_v7 = vld [vmem:[%s6104_s0 + $0x2e8] ss:$28 sps:$4 sm:$0xff]  }
 0x13b   :  { %2677 = vmatprep.mubr.bf16.mxu0 %v4362_v9 }
 0x13c   :  { %v5204_v10 = vpop.f32.mrb[20].mxu1 }
 0x13d   :  { %v2079_v11 = vpop.f32.mrb[21].mxu1 }
 0x13e   :  { %v5209_v13 = vpop.f32.mrb[22].mxu1  ;;  %v4403_v11 = vld [vmem:[%s6104_s0 + $0x324] ss:$28 sps:$4 sm:$0xff]  }
 0x13f   :  { %v2082_v15 = vpop.f32.mrb[23].mxu1 }
 0x140   :  { %v4405_v15 = vld [vmem:[%s6104_s0 + $0x698] ss:$28 sps:$4 sm:$0xff]  }
 0x141   :  { %2517 = vmatmul.mubr.bf16.vlgmr.msra.gmra.mrb[96].mxu1 %v4359_v12 }
 0x142   :  { %2678 = vmatmul.mubr.bf16.gmra.mrb[32].mxu0 %v4364_v14  ;;  %3815 = vmatpush3.bf16.msra.mxu1 %v5001_v55  ;;  %v4371_v55 = vld [vmem:[%s6104_s0 + $0x208] ss:$28 sps:$4 sm:$0xff]  }
 0x143   :  { %2524 = vmatprep.mubr.bf16.mxu1 %v4366_v16  ;;  %2685 = vmatprep.mubr.bf16.mxu0 %v4368_v17  ;;  %v4406_v17 = vld [vmem:[%s6104_s0 + $0x320] ss:$28 sps:$4 sm:$0xff]  }
 0x144   :  { %v5227_v20 = vpop.f32.mrb[24].mxu1  ;;  %3816 = vmatprep.subr.bf16.mxu1 %v4372_v18 }
 0x145   :  { %v2087_v21 = vpop.f32.mrb[25].mxu1 }
 0x146   :  { %v5232_v23 = vpop.f32.mrb[26].mxu1  ;;  %3817 = vmatpush3.bf16.msra.mxu1 %v4372_v18  ;;  %v4408_v18 = vld [vmem:[%s6104_s0 + $0x6d4] ss:$28 sps:$4 sm:$0xff]   ;;  %v4410_v21 = vld [vmem:[%s6104_s0 + $0x35c] ss:$28 sps:$4 sm:$0xff]  }
 0x147   :  { %v2090_v25 = vpop.f32.mrb[27].mxu1  ;;  %3818 = vmatprep.subr.bf16.mxu1 %v4379_v19 }
 0x149   :  { %2525 = vmatmul.mubr.bf16.gmra.mrb[100].mxu1 %v4370_v22 }
 0x14a   :  { %2686 = vmatmul.mubr.bf16.gmra.mrb[36].mxu0 %v4371_v55  ;;  %2532 = vmatprep.mubr.bf16.mxu1 %v4373_v24  ;;  %v4412_v24 = vld [vmem:[%s6104_s0 + $0x6d0] ss:$28 sps:$4 sm:$0xff]  }
 0x14b   :  { %2693 = vmatprep.mubr.bf16.mxu0 %v4375_v26  ;;  %3819 = vmatpush3.bf16.msra.mxu1 %v4379_v19  ;;  %v4413_v26 = vld [vmem:[%s6104_s0 + $0x358] ss:$28 sps:$4 sm:$0xff]  }
 0x14c   :  { %v5246_v27 = vpop.f32.mrb[28].mxu1  ;;  %3820 = vmatprep.subr.bf16.mxu1 %v4386_v0 }
 0x14d   :  { %v2095_v29 = vpop.f32.mrb[29].mxu1 }
 0x14e   :  { %v5254_v31 = vpop.f32.mrb[30].mxu1  ;;  %v4415_v29 = vld [vmem:[%s6104_s0 + $0x394] ss:$28 sps:$4 sm:$0xff]  }
 0x14f   :  { %v2098_v36 = vpop.f32.mrb[31].mxu1  ;;  %3821 = vmatpush3.bf16.msra.mxu1 %v4386_v0  ;;  %v4417_v0 = vld [vmem:[%s6104_s0 + $0x18] ss:$28 sps:$4 sm:$0xff]  }
 0x150   :  { %3822 = vmatprep.subr.bf16.mxu1 %v4393_v28 }
 0x151   :  { %2533 = vmatmul.mubr.bf16.gmra.mrb[104].mxu1 %v4377_v30 }
 0x152   :  { %2694 = vmatmul.mubr.bf16.gmra.mrb[40].mxu0 %v4378_v33  ;;  %2540 = vmatprep.mubr.bf16.mxu1 %v4380_v34  ;;  %v4419_v34 = vld [vmem:[%s6104_s0 + $0x50] ss:$28 sps:$4 sm:$0xff]  }
 0x153   :  { %2701 = vmatprep.mubr.bf16.mxu0 %v4382_v37  ;;  %3823 = vmatpush3.bf16.msra.mxu1 %v4393_v28  ;;  %v4418_v37 = vld [vmem:[%s6104_s0 + $0x390] ss:$28 sps:$4 sm:$0xff]  }
 0x154   :  { %v5268_v39 = vpop.f32.mrb[32].mxu1  ;;  %3824 = vmatprep.subr.bf16.mxu1 %v4400_v38 }
 0x155   :  { %v2103_v42 = vpop.f32.mrb[33].mxu1 }
 0x156   :  { %v5276_v45 = vpop.f32.mrb[34].mxu1  ;;  %v4420_v42 = vld [vmem:[%s6104_s0 + $0x3cc] ss:$28 sps:$4 sm:$0xff]  }
 0x157   :  { %v2106_v49 = vpop.f32.mrb[35].mxu1  ;;  %3825 = vmatpush3.bf16.msra.mxu1 %v4400_v38  ;;  %v4422_v38 = vld [vmem:[%s6104_s0 + $0x88] ss:$28 sps:$4 sm:$0xff]  }
 0x158   :  { %3826 = vmatprep.subr.bf16.mxu1 %v4407_v41 }
 0x159   :  { %2541 = vmatmul.mubr.bf16.gmra.mrb[108].mxu1 %v4384_v44 }
 0x15a   :  { %2702 = vmatmul.mubr.bf16.gmra.mrb[44].mxu0 %v4385_v46  ;;  %2548 = vmatprep.mubr.bf16.mxu1 %v4387_v47  ;;  %v4424_v47 = vld [vmem:[%s6104_s0 + $0xc0] ss:$28 sps:$4 sm:$0xff]  }
 0x15b   :  { %2709 = vmatprep.mubr.bf16.mxu0 %v4389_v50  ;;  %3827 = vmatpush3.bf16.msra.mxu1 %v4407_v41  ;;  %v4423_v50 = vld [vmem:[%s6104_s0 + $0x3c8] ss:$28 sps:$4 sm:$0xff]  }
 0x15c   :  { %v5290_v53 = vpop.f32.mrb[36].mxu1  ;;  %3828 = vmatprep.subr.bf16.mxu1 %v4414_v52 }
 0x15d   :  { %v2111_v54 = vpop.f32.mrb[37].mxu1 }
 0x15e   :  { %v5295_v58 = vpop.f32.mrb[38].mxu1 }
 0x15f   :  { %v2114_v62 = vpop.f32.mrb[39].mxu1  ;;  %3829 = vmatpush3.bf16.msra.mxu1 %v4414_v52  ;;  %v4427_v52 = vld [vmem:[%s6104_s0 + $0xf8] ss:$28 sps:$4 sm:$0xff]  }
 0x160   :  { %v4429_v62 = vld [vmem:[%s6104_s0 + $0x130] ss:$28 sps:$4 sm:$0xff]  }
 0x161   :  { %2549 = vmatmul.mubr.bf16.gmra.mrb[112].mxu1 %v4391_v56  ;;  %v4425_v56 = vld [vmem:[%s6104_s0 + $0x404] ss:$28 sps:$4 sm:$0xff]  }
 0x162   :  { %2710 = vmatmul.mubr.bf16.gmra.mrb[48].mxu0 %v4392_v59  ;;  %2556 = vmatprep.mubr.bf16.mxu1 %v4394_v61 }
 0x163   :  { %2717 = vmatprep.mubr.bf16.mxu0 %v4396_v63 }
 0x164   :  { %v5306_v1 = vpop.f32.mrb[40].mxu1 }
 0x165   :  { %v2119_v3 = vpop.f32.mrb[41].mxu1 }
 0x166   :  { %v5311_v6 = vpop.f32.mrb[42].mxu1  ;;  %v4428_v3 = vld [vmem:[%s6104_s0 + $0x400] ss:$28 sps:$4 sm:$0xff]  }
 0x167   :  { %v2122_v9 = vpop.f32.mrb[43].mxu1 }
 0x169   :  { %2557 = vmatmul.mubr.bf16.gmra.mrb[116].mxu1 %v4398_v4  ;;  %v4432_v4 = vld [vmem:[%s6104_s0 + $0x168] ss:$28 sps:$4 sm:$0xff]  }
 0x16a   :  { %2718 = vmatmul.mubr.bf16.gmra.mrb[52].mxu0 %v4399_v7  ;;  %2564 = vmatprep.mubr.bf16.mxu1 %v4401_v8  ;;  %v4430_v8 = vld [vmem:[%s6104_s0 + $0x43c] ss:$28 sps:$4 sm:$0xff]  }
 0x16b   :  { %2725 = vmatprep.mubr.bf16.mxu0 %v4403_v11 }
 0x16c   :  { %v5322_v12 = vpop.f32.mrb[44].mxu1 }
 0x16d   :  { %v2127_v14 = vpop.f32.mrb[45].mxu1 }
 0x16e   :  { %v5327_v16 = vpop.f32.mrb[46].mxu1  ;;  %v4434_v14 = vld [vmem:[%s6104_s0 + $0x1a0] ss:$28 sps:$4 sm:$0xff]  }
 0x16f   :  { %v2130_v19 = vpop.f32.mrb[47].mxu1 }
 0x171   :  { %2565 = vmatmul.mubr.bf16.gmra.mrb[120].mxu1 %v4405_v15 }
 0x172   :  { %2726 = vmatmul.mubr.bf16.gmra.mrb[56].mxu0 %v4406_v17  ;;  %2572 = vmatprep.mubr.bf16.mxu1 %v4408_v18  ;;  %v4433_v17 = vld [vmem:[%s6104_s0 + $0x438] ss:$28 sps:$4 sm:$0xff]  }
 0x173   :  { %2733 = vmatprep.mubr.bf16.mxu0 %v4410_v21  ;;  %v4437_v18 = vld [vmem:[%s6104_s0 + $0x1d8] ss:$28 sps:$4 sm:$0xff]  }
 0x174   :  { %v5338_v22 = vpop.f32.mrb[48].mxu1  ;;  %v4435_v21 = vld [vmem:[%s6104_s0 + $0x474] ss:$28 sps:$4 sm:$0xff]  }
 0x175   :  { %v2135_v55 = vpop.f32.mrb[49].mxu1 }
 0x176   :  { %v5343_v25 = vpop.f32.mrb[50].mxu1 }
 0x177   :  { %v2138_v28 = vpop.f32.mrb[51].mxu1 }
 0x178   :  { %v4438_v28 = vld [vmem:[%s6104_s0 + $0x470] ss:$28 sps:$4 sm:$0xff]  }
 0x179   :  { %2573 = vmatmul.mubr.bf16.gmra.mrb[124].mxu1 %v4412_v24 }
 0x17a   :  { %2734 = vmatmul.mubr.bf16.gmra.mrb[60].mxu0 %v4413_v26  ;;  %3830 = vmatprep.mubr.bf16.mxu1 %v4417_v0  ;;  %v4439_v26 = vld [vmem:[%s6104_s0 + $0x210] ss:$28 sps:$4 sm:$0xff]  }
 0x17b   :  { %2741 = vmatprep.mubr.bf16.mxu0 %v4415_v29  ;;  %v4442_v29 = vld [vmem:[%s6104_s0 + $0x248] ss:$28 sps:$4 sm:$0xff]  }
 0x17c   :  { %v5354_v30 = vpop.f32.mrb[52].mxu1 }
 0x17d   :  { %v2143_v33 = vpop.f32.mrb[53].mxu1 }
 0x17e   :  { %v5359_v36 = vpop.f32.mrb[54].mxu1 }
 0x17f   :  { %v2146_v41 = vpop.f32.mrb[55].mxu1 }
 0x180   :  { %v4444_v41 = vld [vmem:[%s6104_s0 + $0x280] ss:$28 sps:$4 sm:$0xff]  }
 0x181   :  { %3831 = vmatmul.mubr.bf16.vlgmr.msra.gmra.mrb[128].mxu1 %v4419_v34  ;;  %v4440_v34 = vld [vmem:[%s6104_s0 + $0x4ac] ss:$28 sps:$4 sm:$0xff]  }
 0x182   :  { %2742 = vmatmul.mubr.bf16.gmra.mrb[64].mxu0 %v4418_v37  ;;  %3834 = vmatprep.mubr.bf16.mxu1 %v4422_v38 }
 0x183   :  { %2749 = vmatprep.mubr.bf16.mxu0 %v4420_v42 }
 0x184   :  { %v5370_v44 = vpop.f32.mrb[56].mxu1 }
 0x185   :  { %v2151_v46 = vpop.f32.mrb[57].mxu1 }
 0x186   :  { %v5375_v49 = vpop.f32.mrb[58].mxu1  ;;  %v4443_v46 = vld [vmem:[%s6104_s0 + $0x4a8] ss:$28 sps:$4 sm:$0xff]  }
 0x187   :  { %v2154_v54 = vpop.f32.mrb[59].mxu1 }
 0x189   :  { %3835 = vmatmul.mubr.bf16.gmra.mrb[132].mxu1 %v4424_v47  ;;  %v4447_v47 = vld [vmem:[%s6104_s0 + $0x2b8] ss:$28 sps:$4 sm:$0xff]  }
 0x18a   :  { %2750 = vmatmul.mubr.bf16.gmra.mrb[68].mxu0 %v4423_v50  ;;  %3838 = vmatprep.mubr.bf16.mxu1 %v4427_v52  ;;  %v4445_v52 = vld [vmem:[%s6104_s0 + $0x4e4] ss:$28 sps:$4 sm:$0xff]  }
 0x18b   :  { %2757 = vmatprep.mubr.bf16.mxu0 %v4425_v56 }
 0x18c   :  { %v5386_v59 = vpop.f32.mrb[60].mxu1 }
 0x18d   :  { %v2159_v61 = vpop.f32.mrb[61].mxu1 }
 0x18e   :  { %v5391_v63 = vpop.f32.mrb[62].mxu1  ;;  %v4449_v61 = vld [vmem:[%s6104_s0 + $0x2f0] ss:$28 sps:$4 sm:$0xff]  }
 0x18f   :  { %v2162_v7 = vpop.f32.mrb[63].mxu1 }
 0x191   :  { %3839 = vmatmul.mubr.bf16.gmra.mrb[136].mxu1 %v4429_v62 }
 0x192   :  { %2758 = vmatmul.mubr.bf16.gmra.mrb[72].mxu0 %v4428_v3  ;;  %3842 = vmatprep.mubr.bf16.mxu1 %v4432_v4  ;;  %v4448_v3 = vld [vmem:[%s6104_s0 + $0x4e0] ss:$28 sps:$4 sm:$0xff]   ;;  %v4452_v4 = vld [vmem:[%s6104_s0 + $0x328] ss:$28 sps:$4 sm:$0xff]  }
 0x193   :  { %2765 = vmatprep.mubr.bf16.mxu0 %v4430_v8  ;;  %v4450_v8 = vld [vmem:[%s6104_s0 + $0x51c] ss:$28 sps:$4 sm:$0xff]  }
 0x194   :  { %v5402_v9 = vpop.f32.mrb[64].mxu1 }
 0x195   :  { %v2167_v11 = vpop.f32.mrb[65].mxu1 }
 0x196   :  { %v5407_v15 = vpop.f32.mrb[66].mxu1 }
 0x197   :  { %v2170_v19 = vpop.f32.mrb[67].mxu1 }
 0x198   :  { %v4453_v19 = vld [vmem:[%s6104_s0 + $0x518] ss:$28 sps:$4 sm:$0xff]  }
 0x199   :  { %3843 = vmatmul.mubr.bf16.gmra.mrb[140].mxu1 %v4434_v14 }
 0x19a   :  { %2766 = vmatmul.mubr.bf16.gmra.mrb[76].mxu0 %v4433_v17  ;;  %3846 = vmatprep.mubr.bf16.mxu1 %v4437_v18  ;;  %v4454_v17 = vld [vmem:[%s6104_s0 + $0x360] ss:$28 sps:$4 sm:$0xff]  }
 0x19b   :  { %2773 = vmatprep.mubr.bf16.mxu0 %v4435_v21  ;;  %v4457_v21 = vld [vmem:[%s6104_s0 + $0x398] ss:$28 sps:$4 sm:$0xff]  }
 0x19c   :  { %v5418_v55 = vpop.f32.mrb[68].mxu1 }
 0x19d   :  { %v2175_v24 = vpop.f32.mrb[69].mxu1 }
 0x19e   :  { %v5423_v0 = vpop.f32.mrb[70].mxu1 }
 0x19f   :  { %v2178_v33 = vpop.f32.mrb[71].mxu1 }
 0x1a0   :  { %v4459_v33 = vld [vmem:[%s6104_s0 + $0x3d0] ss:$28 sps:$4 sm:$0xff]  }
 0x1a1   :  { %3847 = vmatmul.mubr.bf16.gmra.mrb[144].mxu1 %v4439_v26  ;;  %v4455_v26 = vld [vmem:[%s6104_s0 + $0x554] ss:$28 sps:$4 sm:$0xff]  }
 0x1a2   :  { %2774 = vmatmul.mubr.bf16.gmra.mrb[80].mxu0 %v4438_v28  ;;  %3850 = vmatprep.mubr.bf16.mxu1 %v4442_v29 }
 0x1a3   :  { %2781 = vmatprep.mubr.bf16.mxu0 %v4440_v34 }
 0x1a4   :  { %v5434_v37 = vpop.f32.mrb[72].mxu1 }
 0x1a5   :  { %v2183_v38 = vpop.f32.mrb[73].mxu1 }
 0x1a6   :  { %v5439_v42 = vpop.f32.mrb[74].mxu1  ;;  %v4458_v38 = vld [vmem:[%s6104_s0 + $0x550] ss:$28 sps:$4 sm:$0xff]  }
 0x1a7   :  { %v2186_v50 = vpop.f32.mrb[75].mxu1 }
 0x1a9   :  { %3851 = vmatmul.mubr.bf16.gmra.mrb[148].mxu1 %v4444_v41  ;;  %v4462_v41 = vld [vmem:[%s6104_s0 + $0x408] ss:$28 sps:$4 sm:$0xff]  }
 0x1aa   :  { %2782 = vmatmul.mubr.bf16.gmra.mrb[84].mxu0 %v4443_v46  ;;  %3854 = vmatprep.mubr.bf16.mxu1 %v4447_v47  ;;  %v4460_v47 = vld [vmem:[%s6104_s0 + $0x58c] ss:$28 sps:$4 sm:$0xff]  }
 0x1ab   :  { %2789 = vmatprep.mubr.bf16.mxu0 %v4445_v52 }
 0x1ac   :  { %v5450_v54 = vpop.f32.mrb[76].mxu1 }
 0x1ad   :  { %v2191_v56 = vpop.f32.mrb[77].mxu1 }
 0x1ae   :  { %v5455_v62 = vpop.f32.mrb[78].mxu1  ;;  %v4464_v56 = vld [vmem:[%s6104_s0 + $0x440] ss:$28 sps:$4 sm:$0xff]  }
 0x1af   :  { %v2194_v7 = vpop.f32.mrb[79].mxu1 }
 0x1b1   :  { %3855 = vmatmul.mubr.bf16.gmra.mrb[152].mxu1 %v4449_v61 }
 0x1b2   :  { %2790 = vmatmul.mubr.bf16.gmra.mrb[88].mxu0 %v4448_v3  ;;  %3858 = vmatprep.mubr.bf16.mxu1 %v4452_v4  ;;  %v4463_v3 = vld [vmem:[%s6104_s0 + $0x588] ss:$28 sps:$4 sm:$0xff]   ;;  %v4467_v4 = vld [vmem:[%s6104_s0 + $0x478] ss:$28 sps:$4 sm:$0xff]  }
 0x1b3   :  { %2797 = vmatprep.mubr.bf16.mxu0 %v4450_v8  ;;  %v4465_v8 = vld [vmem:[%s6104_s0 + $0x5c4] ss:$28 sps:$4 sm:$0xff]  }
 0x1b4   :  { %v5466_v11 = vpop.f32.mrb[80].mxu1 }
 0x1b5   :  { %v2199_v14 = vpop.f32.mrb[81].mxu1 }
 0x1b6   :  { %v5471_v18 = vpop.f32.mrb[82].mxu1 }
 0x1b7   :  { %v2202_v24 = vpop.f32.mrb[83].mxu1 }
 0x1b8   :  { %v4468_v24 = vld [vmem:[%s6104_s0 + $0x5c0] ss:$28 sps:$4 sm:$0xff]  }
 0x1b9   :  { %3859 = vmatmul.mubr.bf16.gmra.mrb[156].mxu1 %v4454_v17 }
 0x1ba   :  { %2798 = vmatmul.mubr.bf16.gmra.mrb[92].mxu0 %v4453_v19  ;;  %3862 = vmatprep.mubr.bf16.mxu1 %v4457_v21  ;;  %v4469_v19 = vld [vmem:[%s6104_s0 + $0x4b0] ss:$28 sps:$4 sm:$0xff]  }
 0x1bb   :  { %2805 = vmatprep.mubr.bf16.mxu0 %v4455_v26  ;;  %v4472_v26 = vld [vmem:[%s6104_s0 + $0x4e8] ss:$28 sps:$4 sm:$0xff]  }
 0x1bc   :  { %v5482_v28 = vpop.f32.mrb[84].mxu1 }
 0x1bd   :  { %v2207_v29 = vpop.f32.mrb[85].mxu1 }
 0x1be   :  { %v5487_v34 = vpop.f32.mrb[86].mxu1 }
 0x1bf   :  { %v2210_v46 = vpop.f32.mrb[87].mxu1 }
 0x1c1   :  { %3863 = vmatmul.mubr.bf16.gmra.mrb[160].mxu1 %v4459_v33  ;;  %v4470_v33 = vld [vmem:[%s6104_s0 + $0x5fc] ss:$28 sps:$4 sm:$0xff]  }
 0x1c2   :  { %2806 = vmatmul.mubr.bf16.gmra.mrb[96].mxu0 %v4458_v38  ;;  %3866 = vmatprep.mubr.bf16.mxu1 %v4462_v41  ;;  %v4474_v41 = vld [vmem:[%s6104_s0 + $0x520] ss:$28 sps:$4 sm:$0xff]  }
 0x1c3   :  { %2813 = vmatprep.mubr.bf16.mxu0 %v4460_v47 }
 0x1c4   :  { %v5498_v50 = vpop.f32.mrb[88].mxu1 }
 0x1c5   :  { %v2215_v52 = vpop.f32.mrb[89].mxu1 }
 0x1c6   :  { %v5503_v61 = vpop.f32.mrb[90].mxu1  ;;  %v4473_v52 = vld [vmem:[%s6104_s0 + $0x5f8] ss:$28 sps:$4 sm:$0xff]  }
 0x1c7   :  { %v2218_v7 = vpop.f32.mrb[91].mxu1 }
 0x1c9   :  { %3867 = vmatmul.mubr.bf16.gmra.mrb[164].mxu1 %v4464_v56  ;;  %v4477_v56 = vld [vmem:[%s6104_s0 + $0x558] ss:$28 sps:$4 sm:$0xff]  }
 0x1ca   :  { %2814 = vmatmul.mubr.bf16.gmra.mrb[100].mxu0 %v4463_v3  ;;  %3870 = vmatprep.mubr.bf16.mxu1 %v4467_v4  ;;  %v4475_v4 = vld [vmem:[%s6104_s0 + $0x634] ss:$28 sps:$4 sm:$0xff]  }
 0x1cb   :  { %2821 = vmatprep.mubr.bf16.mxu0 %v4465_v8 }
 0x1cc   :  { %v5514_v14 = vpop.f32.mrb[92].mxu1 }
 0x1cd   :  { %v2223_v17 = vpop.f32.mrb[93].mxu1 }
 0x1ce   :  { %v5519_v21 = vpop.f32.mrb[94].mxu1  ;;  %v4479_v17 = vld [vmem:[%s6104_s0 + $0x590] ss:$28 sps:$4 sm:$0xff]  }
 0x1cf   :  { %v2226_v29 = vpop.f32.mrb[95].mxu1 }
 0x1d1   :  { %3871 = vmatmul.mubr.bf16.gmra.mrb[168].mxu1 %v4469_v19 }
 0x1d2   :  { %2822 = vmatmul.mubr.bf16.gmra.mrb[104].mxu0 %v4468_v24  ;;  %3874 = vmatprep.mubr.bf16.mxu1 %v4472_v26  ;;  %v4478_v26 = vld [vmem:[%s6104_s0 + $0x630] ss:$28 sps:$4 sm:$0xff]  }
 0x1d3   :  { %2829 = vmatprep.mubr.bf16.mxu0 %v4470_v33  ;;  %v4480_v33 = vld [vmem:[%s6104_s0 + $0x66c] ss:$28 sps:$4 sm:$0xff]  }
 0x1d5   :  { %v2615_v38 = vpop.f32.mrb[0].mxu0 }
 0x1d6   :  { %v5534_v46 = vadd.f32 %v2615_v38, %v5124_v32  ;;  %v2617_v47 = vpop.f32.mrb[1].mxu0 }
 0x1d7   :  { %v2618_v3 = vpop.f32.mrb[2].mxu0  ;;  %v4484_v47 = vld [vmem:[%s6104_s0 + $0x600] ss:$28 sps:$4 sm:$0xff]  }
 0x1d8   :  { %v5546_v7 = vadd.f32 %v2618_v3, %v5129_v35  ;;  %v2620_v8 = vpop.f32.mrb[3].mxu0  ;;  %v4482_v35 = vld [vmem:[%s6104_s0 + $0x5c8] ss:$28 sps:$4 sm:$0xff]  }
 0x1d9   :  { %3875 = vmatmul.mubr.bf16.gmra.mrb[172].mxu1 %v4474_v41  ;;  %v4483_v3 = vld [vmem:[%s6104_s0 + $0x668] ss:$28 sps:$4 sm:$0xff]  }
 0x1da   :  { %2830 = vmatmul.mubr.bf16.gmra.mrb[108].mxu0 %v4473_v52  ;;  %3878 = vmatprep.mubr.bf16.mxu1 %v4477_v56  ;;  %v4485_v8 = vld [vmem:[%s6104_s0 + $0x6a4] ss:$28 sps:$4 sm:$0xff]  }
 0x1db   :  { %2837 = vmatprep.mubr.bf16.mxu0 %v4475_v4 }
 0x1dd   :  { %v2623_v32 = vpop.f32.mrb[4].mxu0 }
 0x1de   :  { %v5552_v19 = vadd.f32 %v2623_v32, %v5140_v40  ;;  %v2625_v24 = vpop.f32.mrb[5].mxu0 }
 0x1df   :  { %v2626_v29 = vpop.f32.mrb[6].mxu0  ;;  %v4489_v24 = vld [vmem:[%s6104_s0 + $0x670] ss:$28 sps:$4 sm:$0xff]  }
 0x1e0   :  { %v5564_v38 = vadd.f32 %v2626_v29, %v5145_v43  ;;  %v2628_v41 = vpop.f32.mrb[7].mxu0  ;;  %v4487_v43 = vld [vmem:[%s6104_s0 + $0x638] ss:$28 sps:$4 sm:$0xff]   ;;  %v4488_v29 = vld [vmem:[%s6104_s0 + $0x6a0] ss:$28 sps:$4 sm:$0xff]  }
 0x1e1   :  { %3879 = vmatmul.mubr.bf16.gmra.mrb[176].mxu1 %v4479_v17  ;;  %v4490_v41 = vld [vmem:[%s6104_s0 + $0x6dc] ss:$28 sps:$4 sm:$0xff]  }
 0x1e2   :  { %2838 = vmatmul.mubr.bf16.gmra.mrb[112].mxu0 %v4478_v26  ;;  %3882 = vmatprep.mubr.bf16.mxu1 %v4482_v35 }
 0x1e3   :  { %2845 = vmatprep.mubr.bf16.mxu0 %v4480_v33 }
 0x1e5   :  { %v2631_v40 = vpop.f32.mrb[8].mxu0 }
 0x1e6   :  { %v5570_v52 = vadd.f32 %v2631_v40, %v5156_v48  ;;  %v2633_v56 = vpop.f32.mrb[9].mxu0 }
 0x1e7   :  { %v2634_v4 = vpop.f32.mrb[10].mxu0  ;;  %v4494_v56 = vld [vmem:[%s6104_s0 + $0x6e0] ss:$28 sps:$4 sm:$0xff]  }
 0x1e8   :  { %v5582_v32 = vadd.f32 %v2634_v4, %v5161_v51  ;;  %v2636_v17 = vpop.f32.mrb[11].mxu0  ;;  %v4492_v51 = vld [vmem:[%s6104_s0 + $0x6a8] ss:$28 sps:$4 sm:$0xff]   ;;  %v4493_v4 = vld [vmem:[%s6104_s0 + $0x6d8] ss:$28 sps:$4 sm:$0xff]  }
 0x1e9   :  { %3883 = vmatmul.mubr.bf16.gmra.mrb[180].mxu1 %v4484_v47 }
 0x1ea   :  { %2846 = vmatmul.mubr.bf16.gmra.mrb[116].mxu0 %v4483_v3  ;;  %3886 = vmatprep.mubr.bf16.mxu1 %v4487_v43 }
 0x1eb   :  { %2853 = vmatprep.mubr.bf16.mxu0 %v4485_v8 }
 0x1ed   :  { %v2639_v48 = vpop.f32.mrb[12].mxu0 }
 0x1ee   :  { %v5588_v26 = vadd.f32 %v2639_v48, %v5172_v57  ;;  %v2641_v35 = vpop.f32.mrb[13].mxu0 }
 0x1ef   :  { %v2642_v33 = vpop.f32.mrb[14].mxu0 }
 0x1f0   :  { %v5600_v40 = vadd.f32 %v2642_v33, %v5177_v60  ;;  %v2644_v47 = vpop.f32.mrb[15].mxu0 }
 0x1f1   :  { %3887 = vmatmul.mubr.bf16.gmra.mrb[184].mxu1 %v4489_v24 }
 0x1f2   :  { %2854 = vmatmul.mubr.bf16.gmra.mrb[120].mxu0 %v4488_v29  ;;  %3890 = vmatprep.mubr.bf16.mxu1 %v4492_v51 }
 0x1f3   :  { %2861 = vmatprep.mubr.bf16.mxu0 %v4490_v41 }
 0x1f5   :  { %v2647_v57 = vpop.f32.mrb[16].mxu0 }
 0x1f6   :  { %v5606_v3 = vadd.f32 %v2647_v57, %v5188_v2  ;;  %v2649_v43 = vpop.f32.mrb[17].mxu0 }
 0x1f7   :  { %v2650_v60 = vpop.f32.mrb[18].mxu0 }
 0x1f8   :  { %v5612_v8 = vadd.f32 %v2650_v60, %v5193_v5  ;;  %v2652_v17 = vpop.f32.mrb[19].mxu0 }
 0x1f9   :  { %3891 = vmatmul.mubr.bf16.gmra.mrb[188].mxu1 %v4494_v56 }
 0x1fa   :  { %2862 = vmatmul.mubr.bf16.gmra.mrb[124].mxu0 %v4493_v4 }
 0x1fd   :  { %v2655_v48 = vpop.f32.mrb[20].mxu0 }
 0x1fe   :  { %v5615_v24 = vadd.f32 %v2655_v48, %v5204_v10  ;;  %v2657_v35 = vpop.f32.mrb[21].mxu0 }
 0x1ff   :  { %v2658_v29 = vpop.f32.mrb[22].mxu0 }
 0x200   :  { %v5618_v2 = vadd.f32 %v2658_v29, %v5209_v13  ;;  %v2660_v51 = vpop.f32.mrb[23].mxu0 }
 0x205   :  { %v2663_v33 = vpop.f32.mrb[24].mxu0 }
 0x206   :  { %v5621_v41 = vadd.f32 %v2663_v33, %v5227_v20  ;;  %v2665_v47 = vpop.f32.mrb[25].mxu0 }
 0x207   :  { %v2666_v5 = vpop.f32.mrb[26].mxu0 }
 0x208   :  { %v5624_v57 = vadd.f32 %v2666_v5, %v5232_v23  ;;  %v2668_v56 = vpop.f32.mrb[27].mxu0 }
 0x20d   :  { %v2671_v43 = vpop.f32.mrb[28].mxu0 }
 0x20e   :  { %v5627_v10 = vadd.f32 %v2671_v43, %v5246_v27  ;;  %v2673_v4 = vpop.f32.mrb[29].mxu0 }
 0x20f   :  { %v2674_v60 = vpop.f32.mrb[30].mxu0 }
 0x210   :  { %v5630_v13 = vadd.f32 %v2674_v60, %v5254_v31  ;;  %v2676_v17 = vpop.f32.mrb[31].mxu0 }
 0x214   :  { %v5632_v48 = vpop.f32.mrb[96].mxu1 }
 0x215   :  { %v2679_v20 = vpop.f32.mrb[32].mxu0  ;;  %v2520_v35 = vpop.f32.mrb[97].mxu1 }
 0x216   :  { %v5635_v29 = vadd.f32 %v2679_v20, %v5268_v39  ;;  %v2681_v23 = vpop.f32.mrb[33].mxu0  ;;  %v5637_v51 = vpop.f32.mrb[98].mxu1 }
 0x217   :  { %6107 = vst [vmem:[#allocation3_spill] sm:$0xff] %v5637_v51  ;;  %v2682_v33 = vpop.f32.mrb[34].mxu0  ;;  %v2523_v47 = vpop.f32.mrb[99].mxu1 }
 0x218   :  { %v5640_v27 = vadd.f32 %v2682_v33, %v5276_v45  ;;  %v2684_v5 = vpop.f32.mrb[35].mxu0 }
 0x21c   :  { %v5642_v56 = vpop.f32.mrb[100].mxu1 }
 0x21d   :  { %6108 = vst [vmem:[#allocation4_spill] sm:$0xff] %v5642_v56  ;;  %v2687_v31 = vpop.f32.mrb[36].mxu0  ;;  %v2528_v43 = vpop.f32.mrb[101].mxu1 }
 0x21e   :  { %v5645_v4 = vadd.f32 %v2687_v31, %v5290_v53  ;;  %v2689_v60 = vpop.f32.mrb[37].mxu0  ;;  %v5647_v17 = vpop.f32.mrb[102].mxu1 }
 0x21f   :  { %6109 = vst [vmem:[#allocation5_spill] sm:$0xff] %v5647_v17  ;;  %v2690_v39 = vpop.f32.mrb[38].mxu0  ;;  %v2531_v20 = vpop.f32.mrb[103].mxu1 }
 0x220   :  { %v5650_v35 = vadd.f32 %v2690_v39, %v5295_v58  ;;  %v2692_v23 = vpop.f32.mrb[39].mxu0 }
 0x224   :  { %v5652_v47 = vpop.f32.mrb[104].mxu1 }
 0x225   :  { %6110 = vst [vmem:[#allocation6_spill] sm:$0xff] %v5652_v47  ;;  %v2695_v45 = vpop.f32.mrb[40].mxu0  ;;  %v2536_v33 = vpop.f32.mrb[105].mxu1 }
 0x226   :  { %v5655_v5 = vadd.f32 %v2695_v45, %v5306_v1  ;;  %v2697_v43 = vpop.f32.mrb[41].mxu0  ;;  %v5657_v56 = vpop.f32.mrb[106].mxu1 }
 0x227   :  { %6111 = vst [vmem:[#allocation7_spill] sm:$0xff] %v5657_v56  ;;  %v2698_v53 = vpop.f32.mrb[42].mxu0  ;;  %v2539_v31 = vpop.f32.mrb[107].mxu1 }
 0x228   :  { %v5660_v60 = vadd.f32 %v2698_v53, %v5311_v6  ;;  %v2700_v20 = vpop.f32.mrb[43].mxu0 }
 0x22c   :  { %v5662_v17 = vpop.f32.mrb[108].mxu1 }
 0x22d   :  { %6112 = vst [vmem:[#allocation8_spill] sm:$0xff] %v5662_v17  ;;  %v2703_v58 = vpop.f32.mrb[44].mxu0  ;;  %v2544_v39 = vpop.f32.mrb[109].mxu1 }
 0x22e   :  { %v5665_v23 = vadd.f32 %v2703_v58, %v5322_v12  ;;  %v2705_v33 = vpop.f32.mrb[45].mxu0  ;;  %v5667_v47 = vpop.f32.mrb[110].mxu1 }
 0x22f   :  { %6113 = vst [vmem:[#allocation9_spill] sm:$0xff] %v5667_v47  ;;  %v2706_v1 = vpop.f32.mrb[46].mxu0  ;;  %v2547_v45 = vpop.f32.mrb[111].mxu1 }
 0x230   :  { %v5670_v43 = vadd.f32 %v2706_v1, %v5327_v16  ;;  %v2708_v31 = vpop.f32.mrb[47].mxu0 }
 0x234   :  { %v5672_v56 = vpop.f32.mrb[112].mxu1 }
 0x235   :  { %6114 = vst [vmem:[#allocation10_spill] sm:$0xff] %v5672_v56  ;;  %v2711_v6 = vpop.f32.mrb[48].mxu0  ;;  %v2552_v53 = vpop.f32.mrb[113].mxu1 }
 0x236   :  { %v5675_v20 = vadd.f32 %v2711_v6, %v5338_v22  ;;  %v2713_v39 = vpop.f32.mrb[49].mxu0  ;;  %v5677_v17 = vpop.f32.mrb[114].mxu1 }
 0x237   :  { %6115 = vst [vmem:[#allocation11_spill] sm:$0xff] %v5677_v17  ;;  %v2714_v12 = vpop.f32.mrb[50].mxu0  ;;  %v2555_v58 = vpop.f32.mrb[115].mxu1 }
 0x238   :  { %v5680_v33 = vadd.f32 %v2714_v12, %v5343_v25  ;;  %v2716_v45 = vpop.f32.mrb[51].mxu0 }
 0x23c   :  { %v5682_v47 = vpop.f32.mrb[116].mxu1 }
 0x23d   :  { %6116 = vst [vmem:[#allocation12_spill] sm:$0xff] %v5682_v47  ;;  %v2719_v16 = vpop.f32.mrb[52].mxu0  ;;  %v2560_v1 = vpop.f32.mrb[117].mxu1 }
 0x23e   :  { %v5685_v31 = vadd.f32 %v2719_v16, %v5354_v30  ;;  %v2721_v53 = vpop.f32.mrb[53].mxu0  ;;  %v5687_v56 = vpop.f32.mrb[118].mxu1 }
 0x23f   :  { %6117 = vst [vmem:[#allocation13_spill] sm:$0xff] %v5687_v56  ;;  %v2722_v22 = vpop.f32.mrb[54].mxu0  ;;  %v2563_v6 = vpop.f32.mrb[119].mxu1 }
 0x240   :  { %v5690_v39 = vadd.f32 %v2722_v22, %v5359_v36  ;;  %v2724_v58 = vpop.f32.mrb[55].mxu0 }
 0x244   :  { %v5692_v17 = vpop.f32.mrb[120].mxu1 }
 0x245   :  { %6118 = vst [vmem:[#allocation14_spill] sm:$0xff] %v5692_v17  ;;  %v2727_v25 = vpop.f32.mrb[56].mxu0  ;;  %v2568_v12 = vpop.f32.mrb[121].mxu1 }
 0x246   :  { %v5695_v45 = vadd.f32 %v2727_v25, %v5370_v44  ;;  %v2729_v1 = vpop.f32.mrb[57].mxu0  ;;  %v5697_v47 = vpop.f32.mrb[122].mxu1 }
 0x247   :  { %6119 = vst [vmem:[#allocation15_spill] sm:$0xff] %v5697_v47  ;;  %v2730_v30 = vpop.f32.mrb[58].mxu0  ;;  %v2571_v16 = vpop.f32.mrb[123].mxu1 }
 0x248   :  { %v5700_v53 = vadd.f32 %v2730_v30, %v5375_v49  ;;  %v2732_v6 = vpop.f32.mrb[59].mxu0  ;;  %v5715_v49 = vld [vmem:[%s6105_s2] ss:$0 sm:$0xff] }
 0x24c   :  { %v5702_v56 = vpop.f32.mrb[124].mxu1 }
 0x24d   :  { %6120 = vst [vmem:[#allocation16_spill] sm:$0xff] %v5702_v56  ;;  %v2735_v36 = vpop.f32.mrb[60].mxu0  ;;  %v2576_v22 = vpop.f32.mrb[125].mxu1 }
 0x24e   :  { %v5705_v58 = vadd.f32 %v2735_v36, %v5386_v59  ;;  %v2737_v12 = vpop.f32.mrb[61].mxu0  ;;  %v5707_v17 = vpop.f32.mrb[126].mxu1 }
 0x24f   :  { %6121 = vst [vmem:[#allocation17_spill] sm:$0xff] %v5707_v17  ;;  %v2738_v44 = vpop.f32.mrb[62].mxu0  ;;  %v2579_v25 = vpop.f32.mrb[127].mxu1 }
 0x250   :  { %v5710_v1 = vadd.f32 %v2738_v44, %v5391_v63  ;;  %v2740_v16 = vpop.f32.mrb[63].mxu0 }
 0x254   :  { %v3832_v47 = vpop.f32.mrb[128].mxu1 }
 0x255   :  { %v2743_v30 = vpop.f32.mrb[64].mxu0  ;;  %v2913_v6 = vadd.f32 %v5552_v19, %v3832_v47  ;;  %v2904_v59 = vpop.f32.mrb[129].mxu1 }
 0x256   :  { %v5719_v36 = vadd.f32 %v2743_v30, %v5402_v9  ;;  %v2745_v22 = vpop.f32.mrb[65].mxu0  ;;  %v2905_v12 = vadd.f32 %v5534_v46, %v2904_v59  ;;  %v3833_v25 = vpop.f32.mrb[130].mxu1 }
 0x257   :  { %v3363_v63 = vadd.f32 %v5715_v49, %v2913_v6  ;;  %v2746_v44 = vpop.f32.mrb[66].mxu0  ;;  %v2916_v16 = vadd.f32 %v5564_v38, %v3833_v25  ;;  %v2907_v17 = vpop.f32.mrb[131].mxu1 }
 0x258   :  { %v3361_v56 = vadd.f32 %v5715_v49, %v2905_v12  ;;  %v5726_v51 = vadd.f32 %v2746_v44, %v5407_v15  ;;  %v2748_v19 = vpop.f32.mrb[67].mxu0  ;;  %v2908_v47 = vadd.f32 %v5546_v7, %v2907_v17 }
 0x259   :  { %3427 = vst [vmem:[%s6106_s3 + $0x10] sm:$0xff] %v3363_v63  ;;  %v3364_v9 = vadd.f32 %v5715_v49, %v2916_v16 }
 0x25a   :  { %3425 = vst [vmem:[%s6106_s3] sm:$0xff] %v3361_v56  ;;  %v3362_v46 = vadd.f32 %v5715_v49, %v2908_v47 }
 0x25b   :  { %3428 = vst [vmem:[%s6106_s3 + $0x18] sm:$0xff] %v3364_v9 }
 0x25c   :  { %3426 = vst [vmem:[%s6106_s3 + $0x8] sm:$0xff] %v3362_v46  ;;  %v3836_v15 = vpop.f32.mrb[132].mxu1 }
 0x25d   :  { %v2751_v7 = vpop.f32.mrb[68].mxu0  ;;  %v2929_v38 = vadd.f32 %v5588_v26, %v3836_v15  ;;  %v2920_v17 = vpop.f32.mrb[133].mxu1 }
 0x25e   :  { %v5745_v30 = vadd.f32 %v2751_v7, %v5418_v55  ;;  %v2753_v6 = vpop.f32.mrb[69].mxu0  ;;  %v2921_v56 = vadd.f32 %v5570_v52, %v2920_v17  ;;  %v3837_v59 = vpop.f32.mrb[134].mxu1 }
 0x25f   :  { %v3367_v22 = vadd.f32 %v5715_v49, %v2929_v38  ;;  %v2754_v12 = vpop.f32.mrb[70].mxu0  ;;  %v2932_v25 = vadd.f32 %v5600_v40, %v3837_v59  ;;  %v2923_v63 = vpop.f32.mrb[135].mxu1 }
 0x260   :  { %v3365_v44 = vadd.f32 %v5715_v49, %v2921_v56  ;;  %v5752_v16 = vadd.f32 %v2754_v12, %v5423_v0  ;;  %v2756_v26 = vpop.f32.mrb[71].mxu0  ;;  %v2924_v19 = vadd.f32 %v5582_v32, %v2923_v63 }
 0x261   :  { %3431 = vst [vmem:[%s6106_s3 + $0x30] sm:$0xff] %v3367_v22  ;;  %v3368_v55 = vadd.f32 %v5715_v49, %v2932_v25 }
 0x262   :  { %3429 = vst [vmem:[%s6106_s3 + $0x20] sm:$0xff] %v3365_v44  ;;  %v3366_v52 = vadd.f32 %v5715_v49, %v2924_v19 }
 0x263   :  { %3432 = vst [vmem:[%s6106_s3 + $0x38] sm:$0xff] %v3368_v55 }
 0x264   :  { %3430 = vst [vmem:[%s6106_s3 + $0x28] sm:$0xff] %v3366_v52  ;;  %v3840_v0 = vpop.f32.mrb[136].mxu1 }
 0x265   :  { %v2759_v32 = vpop.f32.mrb[72].mxu0  ;;  %v2945_v40 = vadd.f32 %v5615_v24, %v3840_v0  ;;  %v2936_v47 = vpop.f32.mrb[137].mxu1 }
 0x266   :  { %v5771_v9 = vadd.f32 %v2759_v32, %v5434_v37  ;;  %v2761_v46 = vpop.f32.mrb[73].mxu0  ;;  %v2937_v15 = vadd.f32 %v5606_v3, %v2936_v47  ;;  %v3841_v7 = vpop.f32.mrb[138].mxu1 }
 0x267   :  { %v3371_v38 = vadd.f32 %v5715_v49, %v2945_v40  ;;  %v2762_v17 = vpop.f32.mrb[74].mxu0  ;;  %v2948_v6 = vadd.f32 %v5618_v2, %v3841_v7  ;;  %v2939_v56 = vpop.f32.mrb[139].mxu1 }
 0x268   :  { %v3369_v59 = vadd.f32 %v5715_v49, %v2937_v15  ;;  %v5778_v22 = vadd.f32 %v2762_v17, %v5439_v42  ;;  %v2764_v24 = vpop.f32.mrb[75].mxu0  ;;  %v2940_v12 = vadd.f32 %v5612_v8, %v2939_v56 }
 0x269   :  { %3435 = vst [vmem:[%s6106_s3 + $0x50] sm:$0xff] %v3371_v38  ;;  %v3372_v37 = vadd.f32 %v5715_v49, %v2948_v6 }
 0x26a   :  { %3433 = vst [vmem:[%s6106_s3 + $0x40] sm:$0xff] %v3369_v59  ;;  %v3370_v3 = vadd.f32 %v5715_v49, %v2940_v12 }
 0x26b   :  { %3436 = vst [vmem:[%s6106_s3 + $0x58] sm:$0xff] %v3372_v37 }
 0x26c   :  { %3434 = vst [vmem:[%s6106_s3 + $0x48] sm:$0xff] %v3370_v3  ;;  %v3844_v42 = vpop.f32.mrb[140].mxu1 }
 0x26d   :  { %v2767_v8 = vpop.f32.mrb[76].mxu0  ;;  %v2961_v2 = vadd.f32 %v5627_v10, %v3844_v42  ;;  %v2952_v25 = vpop.f32.mrb[141].mxu1 }
 0x26e   :  { %v5797_v63 = vadd.f32 %v2767_v8, %v5450_v54  ;;  %v2769_v44 = vpop.f32.mrb[77].mxu0  ;;  %v2953_v26 = vadd.f32 %v5621_v41, %v2952_v25  ;;  %v3845_v19 = vpop.f32.mrb[142].mxu1 }
 0x26f   :  { %v3375_v55 = vadd.f32 %v5715_v49, %v2961_v2  ;;  %v2770_v52 = vpop.f32.mrb[78].mxu0  ;;  %v2964_v0 = vadd.f32 %v5630_v13, %v3845_v19  ;;  %v2955_v32 = vpop.f32.mrb[143].mxu1 }
 0x270   :  { %v3373_v40 = vadd.f32 %v5715_v49, %v2953_v26  ;;  %v5804_v47 = vadd.f32 %v2770_v52, %v5455_v62  ;;  %v2772_v10 = vpop.f32.mrb[79].mxu0  ;;  %v2956_v46 = vadd.f32 %v5624_v57, %v2955_v32 }
 0x271   :  { %3439 = vst [vmem:[%s6106_s3 + $0x70] sm:$0xff] %v3375_v55  ;;  %v3376_v54 = vadd.f32 %v5715_v49, %v2964_v0 }
 0x272   :  { %3437 = vst [vmem:[%s6106_s3 + $0x60] sm:$0xff] %v3373_v40  ;;  %v3374_v41 = vadd.f32 %v5715_v49, %v2956_v46 }
 0x273   :  { %3440 = vst [vmem:[%s6106_s3 + $0x78] sm:$0xff] %v3376_v54 }
 0x274   :  { %3438 = vst [vmem:[%s6106_s3 + $0x68] sm:$0xff] %v3374_v41  ;;  %v3848_v62 = vpop.f32.mrb[144].mxu1 }
 0x275   :  { %v2775_v57 = vpop.f32.mrb[80].mxu0  ;;  %v2977_v13 = vadd.f32 %v5645_v4, %v3848_v62  ;;  %v2968_v15 = vpop.f32.mrb[145].mxu1 }
 0x276   :  { %v5823_v7 = vadd.f32 %v2775_v57, %v5466_v11  ;;  %v2777_v38 = vpop.f32.mrb[81].mxu0  ;;  %v2969_v17 = vadd.f32 %v5635_v29, %v2968_v15  ;;  %v3849_v6 = vpop.f32.mrb[146].mxu1 }
 0x277   :  { %v3379_v56 = vadd.f32 %v5715_v49, %v2977_v13  ;;  %v2778_v59 = vpop.f32.mrb[82].mxu0  ;;  %v2980_v24 = vadd.f32 %v5650_v35, %v3849_v6  ;;  %v2971_v12 = vpop.f32.mrb[147].mxu1 }
 0x278   :  { %v3377_v37 = vadd.f32 %v5715_v49, %v2969_v17  ;;  %v5830_v3 = vadd.f32 %v2778_v59, %v5471_v18  ;;  %v2780_v4 = vpop.f32.mrb[83].mxu0  ;;  %v2972_v42 = vadd.f32 %v5640_v27, %v2971_v12 }
 0x279   :  { %3443 = vst [vmem:[%s6106_s3 + $0x90] sm:$0xff] %v3379_v56  ;;  %v3380_v11 = vadd.f32 %v5715_v49, %v2980_v24 }
 0x27a   :  { %3441 = vst [vmem:[%s6106_s3 + $0x80] sm:$0xff] %v3377_v37  ;;  %v3378_v29 = vadd.f32 %v5715_v49, %v2972_v42 }
 0x27b   :  { %3444 = vst [vmem:[%s6106_s3 + $0x98] sm:$0xff] %v3380_v11 }
 0x27c   :  { %3442 = vst [vmem:[%s6106_s3 + $0x88] sm:$0xff] %v3378_v29  ;;  %v3852_v18 = vpop.f32.mrb[148].mxu1 }
 0x27d   :  { %v2783_v27 = vpop.f32.mrb[84].mxu0  ;;  %v2993_v35 = vadd.f32 %v5665_v23, %v3852_v18  ;;  %v2984_v8 = vpop.f32.mrb[149].mxu1 }
 0x27e   :  { %v5849_v2 = vadd.f32 %v2783_v27, %v5482_v28  ;;  %v2785_v25 = vpop.f32.mrb[85].mxu0  ;;  %v2985_v44 = vadd.f32 %v5655_v5, %v2984_v8  ;;  %v3853_v26 = vpop.f32.mrb[150].mxu1 }
 0x27f   :  { %v3383_v19 = vadd.f32 %v5715_v49, %v2993_v35  ;;  %v2786_v55 = vpop.f32.mrb[86].mxu0  ;;  %v2996_v52 = vadd.f32 %v5670_v43, %v3853_v26  ;;  %v2987_v0 = vpop.f32.mrb[151].mxu1 }
 0x280   :  { %v3381_v32 = vadd.f32 %v5715_v49, %v2985_v44  ;;  %v5856_v40 = vadd.f32 %v2786_v55, %v5487_v34  ;;  %v2788_v23 = vpop.f32.mrb[87].mxu0  ;;  %v2988_v10 = vadd.f32 %v5660_v60, %v2987_v0 }
 0x281   :  { %3447 = vst [vmem:[%s6106_s3 + $0xb0] sm:$0xff] %v3383_v19  ;;  %v3384_v28 = vadd.f32 %v5715_v49, %v2996_v52 }
 0x282   :  { %3445 = vst [vmem:[%s6106_s3 + $0xa0] sm:$0xff] %v3381_v32  ;;  %v3382_v5 = vadd.f32 %v5715_v49, %v2988_v10 }
 0x283   :  { %3448 = vst [vmem:[%s6106_s3 + $0xb8] sm:$0xff] %v3384_v28 }
 0x284   :  { %3446 = vst [vmem:[%s6106_s3 + $0xa8] sm:$0xff] %v3382_v5  ;;  %v3856_v34 = vpop.f32.mrb[152].mxu1  ;;  %v6122_v5 = vld [vmem:[#allocation3_spill] sm:$0xff] }
 0x285   :  { %v2791_v60 = vpop.f32.mrb[88].mxu0  ;;  %v3009_v43 = vadd.f32 %v5685_v31, %v3856_v34  ;;  %v3000_v46 = vpop.f32.mrb[153].mxu1 }
 0x286   :  { %v5875_v54 = vadd.f32 %v2791_v60, %v5498_v50  ;;  %v2793_v41 = vpop.f32.mrb[89].mxu0  ;;  %v3001_v62 = vadd.f32 %v5675_v20, %v3000_v46  ;;  %v3857_v57 = vpop.f32.mrb[154].mxu1 }
 0x287   :  { %v3387_v13 = vadd.f32 %v5715_v49, %v3009_v43  ;;  %v2794_v15 = vpop.f32.mrb[90].mxu0  ;;  %v3012_v38 = vadd.f32 %v5690_v39, %v3857_v57  ;;  %v3003_v17 = vpop.f32.mrb[155].mxu1  ;;  %v6123_v41 = vld [vmem:[#allocation4_spill] sm:$0xff] }
 0x288   :  { %v3385_v6 = vadd.f32 %v5715_v49, %v3001_v62  ;;  %v5882_v56 = vadd.f32 %v2794_v15, %v5503_v61  ;;  %v2796_v31 = vpop.f32.mrb[91].mxu0  ;;  %v3004_v59 = vadd.f32 %v5680_v33, %v3003_v17 }
 0x289   :  { %3451 = vst [vmem:[%s6106_s3 + $0xd0] sm:$0xff] %v3387_v13  ;;  %v3388_v50 = vadd.f32 %v5715_v49, %v3012_v38 }
 0x28a   :  { %3449 = vst [vmem:[%s6106_s3 + $0xc0] sm:$0xff] %v3385_v6  ;;  %v3386_v20 = vadd.f32 %v5715_v49, %v3004_v59 }
 0x28b   :  { %3452 = vst [vmem:[%s6106_s3 + $0xd8] sm:$0xff] %v3388_v50  ;;  %v6124_v50 = vld [vmem:[#allocation5_spill] sm:$0xff] }
 0x28c   :  { %3450 = vst [vmem:[%s6106_s3 + $0xc8] sm:$0xff] %v3386_v20  ;;  %v3860_v61 = vpop.f32.mrb[156].mxu1 }
 0x28d   :  { %v2799_v33 = vpop.f32.mrb[92].mxu0  ;;  %v3025_v39 = vadd.f32 %v5705_v58, %v3860_v61  ;;  %v3016_v24 = vpop.f32.mrb[157].mxu1 }
 0x28e   :  { %v5901_v12 = vadd.f32 %v2799_v33, %v5514_v14  ;;  %v2801_v37 = vpop.f32.mrb[93].mxu0  ;;  %v3017_v4 = vadd.f32 %v5695_v45, %v3016_v24  ;;  %v3861_v42 = vpop.f32.mrb[158].mxu1 }
 0x28f   :  { %v3391_v11 = vadd.f32 %v5715_v49, %v3025_v39  ;;  %v2802_v29 = vpop.f32.mrb[94].mxu0  ;;  %v3028_v18 = vadd.f32 %v5710_v1, %v3861_v42  ;;  %v3019_v27 = vpop.f32.mrb[159].mxu1  ;;  %v6125_v37 = vld [vmem:[#allocation6_spill] sm:$0xff] }
 0x290   :  { %v3389_v35 = vadd.f32 %v5715_v49, %v3017_v4  ;;  %v5908_v8 = vadd.f32 %v2802_v29, %v5519_v21  ;;  %v2804_v58 = vpop.f32.mrb[95].mxu0  ;;  %v3020_v25 = vadd.f32 %v5700_v53, %v3019_v27 }
 0x291   :  { %3455 = vst [vmem:[%s6106_s3 + $0xf0] sm:$0xff] %v3391_v11  ;;  %v3392_v14 = vadd.f32 %v5715_v49, %v3028_v18 }
 0x292   :  { %3453 = vst [vmem:[%s6106_s3 + $0xe0] sm:$0xff] %v3389_v35  ;;  %v3390_v45 = vadd.f32 %v5715_v49, %v3020_v25 }
 0x293   :  { %3456 = vst [vmem:[%s6106_s3 + $0xf8] sm:$0xff] %v3392_v14  ;;  %v6126_v14 = vld [vmem:[#allocation7_spill] sm:$0xff] }
 0x294   :  { %3454 = vst [vmem:[%s6106_s3 + $0xe8] sm:$0xff] %v3390_v45  ;;  %v3864_v21 = vpop.f32.mrb[160].mxu1 }
 0x295   :  { %v2807_v53 = vpop.f32.mrb[96].mxu0  ;;  %v3041_v1 = vadd.f32 %v5745_v30, %v3864_v21  ;;  %v3032_v44 = vpop.f32.mrb[161].mxu1 }
 0x296   :  { %v5927_v26 = vadd.f32 %v2807_v53, %v5632_v48  ;;  %v2809_v19 = vpop.f32.mrb[97].mxu0  ;;  %v3033_v55 = vadd.f32 %v5719_v36, %v3032_v44  ;;  %v3865_v52 = vpop.f32.mrb[162].mxu1 }
 0x297   :  { %v3395_v0 = vadd.f32 %v5715_v49, %v3041_v1  ;;  %v2810_v32 = vpop.f32.mrb[98].mxu0  ;;  %v3044_v23 = vadd.f32 %v5752_v16, %v3865_v52  ;;  %v3035_v10 = vpop.f32.mrb[163].mxu1  ;;  %v6127_v19 = vld [vmem:[#allocation8_spill] sm:$0xff] }
 0x298   :  { %v3393_v28 = vadd.f32 %v5715_v49, %v3033_v55  ;;  %v5934_v34 = vadd.f32 %v2810_v32, %v6122_v5  ;;  %v2812_v30 = vpop.f32.mrb[99].mxu0  ;;  %v3036_v60 = vadd.f32 %v5726_v51, %v3035_v10 }
 0x299   :  { %3459 = vst [vmem:[%s6106_s3 + $0x110] sm:$0xff] %v3395_v0  ;;  %v3396_v48 = vadd.f32 %v5715_v49, %v3044_v23 }
 0x29a   :  { %3457 = vst [vmem:[%s6106_s3 + $0x100] sm:$0xff] %v3393_v28  ;;  %v3394_v36 = vadd.f32 %v5715_v49, %v3036_v60  ;;  %v6128_v60 = vld [vmem:[#allocation9_spill] sm:$0xff] }
 0x29b   :  { %3460 = vst [vmem:[%s6106_s3 + $0x118] sm:$0xff] %v3396_v48 }
 0x29c   :  { %3458 = vst [vmem:[%s6106_s3 + $0x108] sm:$0xff] %v3394_v36  ;;  %v3868_v51 = vpop.f32.mrb[164].mxu1 }
 0x29d   :  { %v2815_v16 = vpop.f32.mrb[100].mxu0  ;;  %v3057_v43 = vadd.f32 %v5797_v63, %v3868_v51  ;;  %v3048_v46 = vpop.f32.mrb[165].mxu1 }
 0x29e   :  { %v5953_v62 = vadd.f32 %v2815_v16, %v6123_v41  ;;  %v2817_v57 = vpop.f32.mrb[101].mxu0  ;;  %v3049_v13 = vadd.f32 %v5771_v9, %v3048_v46  ;;  %v3869_v15 = vpop.f32.mrb[166].mxu1  ;;  %v6129_v46 = vld [vmem:[#allocation10_spill] sm:$0xff] }
 0x29f   :  { %v3399_v38 = vadd.f32 %v5715_v49, %v3057_v43  ;;  %v2818_v17 = vpop.f32.mrb[102].mxu0  ;;  %v3060_v6 = vadd.f32 %v5804_v47, %v3869_v15  ;;  %v3051_v31 = vpop.f32.mrb[167].mxu1 }
 0x2a0   :  { %v3397_v59 = vadd.f32 %v5715_v49, %v3049_v13  ;;  %v5960_v20 = vadd.f32 %v2818_v17, %v6124_v50  ;;  %v2820_v63 = vpop.f32.mrb[103].mxu0  ;;  %v3052_v61 = vadd.f32 %v5778_v22, %v3051_v31  ;;  %v6130_v50 = vld [vmem:[#allocation11_spill] sm:$0xff] }
 0x2a1   :  { %3463 = vst [vmem:[%s6106_s3 + $0x130] sm:$0xff] %v3399_v38  ;;  %v3400_v9 = vadd.f32 %v5715_v49, %v3060_v6 }
 0x2a2   :  { %3461 = vst [vmem:[%s6106_s3 + $0x120] sm:$0xff] %v3397_v59  ;;  %v3398_v47 = vadd.f32 %v5715_v49, %v3052_v61 }
 0x2a3   :  { %3464 = vst [vmem:[%s6106_s3 + $0x138] sm:$0xff] %v3400_v9 }
 0x2a4   :  { %3462 = vst [vmem:[%s6106_s3 + $0x128] sm:$0xff] %v3398_v47  ;;  %v3872_v22 = vpop.f32.mrb[168].mxu1 }
 0x2a5   :  { %v2823_v33 = vpop.f32.mrb[104].mxu0  ;;  %v3073_v39 = vadd.f32 %v5849_v2, %v3872_v22  ;;  %v3064_v24 = vpop.f32.mrb[169].mxu1 }
 0x2a6   :  { %v5979_v4 = vadd.f32 %v2823_v33, %v6125_v37  ;;  %v2825_v42 = vpop.f32.mrb[105].mxu0  ;;  %v3065_v11 = vadd.f32 %v5823_v7, %v3064_v24  ;;  %v3873_v29 = vpop.f32.mrb[170].mxu1  ;;  %v6131_v33 = vld [vmem:[#allocation12_spill] sm:$0xff] }
 0x2a7   :  { %v3403_v18 = vadd.f32 %v5715_v49, %v3073_v39  ;;  %v2826_v27 = vpop.f32.mrb[106].mxu0  ;;  %v3076_v35 = vadd.f32 %v5856_v40, %v3873_v29  ;;  %v3067_v58 = vpop.f32.mrb[171].mxu1 }
 0x2a8   :  { %v3401_v25 = vadd.f32 %v5715_v49, %v3065_v11  ;;  %v5986_v45 = vadd.f32 %v2826_v27, %v6126_v14  ;;  %v2828_v2 = vpop.f32.mrb[107].mxu0  ;;  %v3068_v21 = vadd.f32 %v5830_v3, %v3067_v58  ;;  %v6132_v58 = vld [vmem:[#allocation13_spill] sm:$0xff] }
 0x2a9   :  { %3467 = vst [vmem:[%s6106_s3 + $0x150] sm:$0xff] %v3403_v18  ;;  %v3404_v7 = vadd.f32 %v5715_v49, %v3076_v35 }
 0x2aa   :  { %3465 = vst [vmem:[%s6106_s3 + $0x140] sm:$0xff] %v3401_v25  ;;  %v3402_v40 = vadd.f32 %v5715_v49, %v3068_v21 }
 0x2ab   :  { %3468 = vst [vmem:[%s6106_s3 + $0x158] sm:$0xff] %v3404_v7 }
 0x2ac   :  { %3466 = vst [vmem:[%s6106_s3 + $0x148] sm:$0xff] %v3402_v40  ;;  %v3876_v3 = vpop.f32.mrb[172].mxu1 }
 0x2ad   :  { %v2831_v53 = vpop.f32.mrb[108].mxu0  ;;  %v3089_v1 = vadd.f32 %v5901_v12, %v3876_v3  ;;  %v3080_v44 = vpop.f32.mrb[173].mxu1 }
 0x2ae   :  { %v3980_v55 = vadd.f32 %v2831_v53, %v6127_v19  ;;  %v2833_v52 = vpop.f32.mrb[109].mxu0  ;;  %v3081_v0 = vadd.f32 %v5875_v54, %v3080_v44  ;;  %v3877_v32 = vpop.f32.mrb[174].mxu1  ;;  %v6133_v53 = vld [vmem:[#allocation14_spill] sm:$0xff] }
 0x2af   :  { %v3407_v23 = vadd.f32 %v5715_v49, %v3089_v1  ;;  %v2834_v10 = vpop.f32.mrb[110].mxu0  ;;  %v3092_v28 = vadd.f32 %v5908_v8, %v3877_v32  ;;  %v3083_v5 = vpop.f32.mrb[175].mxu1 }
 0x2b0   :  { %v3405_v30 = vadd.f32 %v5715_v49, %v3081_v0  ;;  %v3981_v48 = vadd.f32 %v2834_v10, %v6128_v60  ;;  %v2836_v36 = vpop.f32.mrb[111].mxu0  ;;  %v3084_v12 = vadd.f32 %v5882_v56, %v3083_v5 }
 0x2b1   :  { %3471 = vst [vmem:[%s6106_s3 + $0x170] sm:$0xff] %v3407_v23  ;;  %v3408_v54 = vadd.f32 %v5715_v49, %v3092_v28  ;;  %v6134_v28 = vld [vmem:[#allocation15_spill] sm:$0xff] }
 0x2b2   :  { %3469 = vst [vmem:[%s6106_s3 + $0x160] sm:$0xff] %v3405_v30  ;;  %v3406_v8 = vadd.f32 %v5715_v49, %v3084_v12 }
 0x2b3   :  { %3472 = vst [vmem:[%s6106_s3 + $0x178] sm:$0xff] %v3408_v54 }
 0x2b4   :  { %3470 = vst [vmem:[%s6106_s3 + $0x168] sm:$0xff] %v3406_v8  ;;  %v3880_v56 = vpop.f32.mrb[176].mxu1 }
 0x2b5   :  { %v2839_v51 = vpop.f32.mrb[112].mxu0  ;;  %v3105_v16 = vadd.f32 %v5953_v62, %v3880_v56  ;;  %v3096_v43 = vpop.f32.mrb[177].mxu1  ;;  %v6135_v56 = vld [vmem:[#allocation16_spill] sm:$0xff] }
 0x2b6   :  { %v3982_v41 = vadd.f32 %v2839_v51, %v6129_v46  ;;  %v2841_v57 = vpop.f32.mrb[113].mxu0  ;;  %v3097_v13 = vadd.f32 %v5927_v26, %v3096_v43  ;;  %v3881_v15 = vpop.f32.mrb[178].mxu1 }
 0x2b7   :  { %v3411_v38 = vadd.f32 %v5715_v49, %v3105_v16  ;;  %v2842_v17 = vpop.f32.mrb[114].mxu0  ;;  %v3108_v6 = vadd.f32 %v5960_v20, %v3881_v15  ;;  %v3099_v31 = vpop.f32.mrb[179].mxu1 }
 0x2b8   :  { %v3409_v59 = vadd.f32 %v5715_v49, %v3097_v13  ;;  %v3983_v63 = vadd.f32 %v2842_v17, %v6130_v50  ;;  %v2844_v61 = vpop.f32.mrb[115].mxu0  ;;  %v3100_v62 = vadd.f32 %v5934_v34, %v3099_v31 }
 0x2b9   :  { %3475 = vst [vmem:[%s6106_s3 + $0x190] sm:$0xff] %v3411_v38  ;;  %v3412_v26 = vadd.f32 %v5715_v49, %v3108_v6  ;;  %v6136_v38 = vld [vmem:[#allocation17_spill] sm:$0xff] }
 0x2ba   :  { %3473 = vst [vmem:[%s6106_s3 + $0x180] sm:$0xff] %v3409_v59  ;;  %v3410_v20 = vadd.f32 %v5715_v49, %v3100_v62 }
 0x2bb   :  { %3476 = vst [vmem:[%s6106_s3 + $0x198] sm:$0xff] %v3412_v26 }
 0x2bc   :  { %3474 = vst [vmem:[%s6106_s3 + $0x188] sm:$0xff] %v3410_v20  ;;  %v3884_v34 = vpop.f32.mrb[180].mxu1 }
 0x2bd   :  { %v2847_v9 = vpop.f32.mrb[116].mxu0  ;;  %v3121_v47 = vadd.f32 %v3980_v55, %v3884_v34  ;;  %v3112_v22 = vpop.f32.mrb[181].mxu1 }
 0x2be   :  { %v3984_v39 = vadd.f32 %v2847_v9, %v6131_v33  ;;  %v2849_v24 = vpop.f32.mrb[117].mxu0  ;;  %v3113_v37 = vadd.f32 %v5979_v4, %v3112_v22  ;;  %v3885_v42 = vpop.f32.mrb[182].mxu1 }
 0x2bf   :  { %v3415_v11 = vadd.f32 %v5715_v49, %v3121_v47  ;;  %v2850_v29 = vpop.f32.mrb[118].mxu0  ;;  %v3124_v18 = vadd.f32 %v3981_v48, %v3885_v42  ;;  %v3115_v27 = vpop.f32.mrb[183].mxu1 }
 0x2c0   :  { %v3413_v35 = vadd.f32 %v5715_v49, %v3113_v37  ;;  %v3985_v25 = vadd.f32 %v2850_v29, %v6132_v58  ;;  %v2852_v14 = vpop.f32.mrb[119].mxu0  ;;  %v3116_v2 = vadd.f32 %v5986_v45, %v3115_v27 }
 0x2c1   :  { %3479 = vst [vmem:[%s6106_s3 + $0x1b0] sm:$0xff] %v3415_v11  ;;  %v3416_v21 = vadd.f32 %v5715_v49, %v3124_v18 }
 0x2c2   :  { %3477 = vst [vmem:[%s6106_s3 + $0x1a0] sm:$0xff] %v3413_v35  ;;  %v3414_v4 = vadd.f32 %v5715_v49, %v3116_v2 }
 0x2c3   :  { %3480 = vst [vmem:[%s6106_s3 + $0x1b8] sm:$0xff] %v3416_v21 }
 0x2c4   :  { %3478 = vst [vmem:[%s6106_s3 + $0x1a8] sm:$0xff] %v3414_v4  ;;  %v3888_v45 = vpop.f32.mrb[184].mxu1 }
 0x2c5   :  { %v2855_v7 = vpop.f32.mrb[120].mxu0  ;;  %v3137_v40 = vadd.f32 %v3984_v39, %v3888_v45  ;;  %v3128_v3 = vpop.f32.mrb[185].mxu1 }
 0x2c6   :  { %v3986_v1 = vadd.f32 %v2855_v7, %v6133_v53  ;;  %v2857_v44 = vpop.f32.mrb[121].mxu0  ;;  %v3129_v19 = vadd.f32 %v3982_v41, %v3128_v3  ;;  %v3889_v55 = vpop.f32.mrb[186].mxu1 }
 0x2c7   :  { %v3419_v52 = vadd.f32 %v5715_v49, %v3137_v40  ;;  %v2858_v0 = vpop.f32.mrb[122].mxu0  ;;  %v3140_v32 = vadd.f32 %v3985_v25, %v3889_v55  ;;  %v3131_v23 = vpop.f32.mrb[187].mxu1 }
 0x2c8   :  { %v3417_v10 = vadd.f32 %v5715_v49, %v3129_v19  ;;  %v3987_v5 = vadd.f32 %v2858_v0, %v6134_v28  ;;  %v2860_v30 = vpop.f32.mrb[123].mxu0  ;;  %v3132_v60 = vadd.f32 %v3983_v63, %v3131_v23 }
 0x2c9   :  { %3483 = vst [vmem:[%s6106_s3 + $0x1d0] sm:$0xff] %v3419_v52  ;;  %v3420_v48 = vadd.f32 %v5715_v49, %v3140_v32 }
 0x2ca   :  { %3481 = vst [vmem:[%s6106_s3 + $0x1c0] sm:$0xff] %v3417_v10  ;;  %v3418_v36 = vadd.f32 %v5715_v49, %v3132_v60 }
 0x2cb   :  { %3484 = vst [vmem:[%s6106_s3 + $0x1d8] sm:$0xff] %v3420_v48 }
 0x2cc   :  { %3482 = vst [vmem:[%s6106_s3 + $0x1c8] sm:$0xff] %v3418_v36  ;;  %v3892_v12 = vpop.f32.mrb[188].mxu1 }
 0x2cd   :  { %v2863_v54 = vpop.f32.mrb[124].mxu0  ;;  %v3144_v8 = vpop.f32.mrb[189].mxu1 }
 0x2ce   :  { %v3988_v51 = vadd.f32 %v2863_v54, %v6135_v56  ;;  %v2865_v16 = vpop.f32.mrb[125].mxu0  ;;  %v3145_v43 = vadd.f32 %v3986_v1, %v3144_v8  ;;  %v3893_v46 = vpop.f32.mrb[190].mxu1 }
 0x2cf   :  { %v2866_v41 = vpop.f32.mrb[126].mxu0  ;;  %v3147_v57 = vpop.f32.mrb[191].mxu1 }
 0x2d0   :  { %v3153_v13 = vadd.f32 %v3988_v51, %v3892_v12  ;;  %v3421_v15 = vadd.f32 %v5715_v49, %v3145_v43  ;;  %v3989_v17 = vadd.f32 %v2866_v41, %v6136_v38  ;;  %v2868_v6 = vpop.f32.mrb[127].mxu0  ;;  %v3148_v31 = vadd.f32 %v3987_v5, %v3147_v57 }
 0x2d2   :  { %v3423_v59 = vadd.f32 %v5715_v49, %v3153_v13  ;;  %3485 = vst [vmem:[%s6106_s3 + $0x1e0] sm:$0xff] %v3421_v15  ;;  %v3156_v50 = vadd.f32 %v3989_v17, %v3893_v46  ;;  %v3422_v63 = vadd.f32 %v5715_v49, %v3148_v31 }
 0x2d4   :  { %3487 = vst [vmem:[%s6106_s3 + $0x1f0] sm:$0xff] %v3423_v59  ;;  %v3424_v61 = vadd.f32 %v5715_v49, %v3156_v50  ;;  %3486 = vst [vmem:[%s6106_s3 + $0x1e8] sm:$0xff] %v3422_v63 }
 0x2d6   :  { %3488 = vst [vmem:[%s6106_s3 + $0x1f8] sm:$0xff] %v3424_v61 }

// kernel: depth_aware_fe.6
= control target key start
LH: loop header
LB: loop body
LE: loop exit
PB: predicated region body
PF: predicated region fallthrough
CT: control target
= control target key end

     0   :  { %s672_s15 = smov 0   ;;  %s674_s16 = smov 0   ;;  %s749_s0 = inlined_call_operand.vmem [shape: f32[2,32,256], index: 0, kind: input, shape index: {}]   ;;  %s750_s1 = inlined_call_operand.vmem [shape: f32[2,12,256], index: 1, kind: input, shape index: {}]   ;;  %s751_s2 = inlined_call_operand.vmem [shape: bf16[32,32], index: 2, kind: input, shape index: {}]   ;;  %s752_s3 = inlined_call_operand.vmem [shape: f32[32,1], index: 3, kind: input, shape index: {}]   ;;  %s753_s4 = inlined_call_operand.vmem [shape: f32[2,12,32], index: 4, kind: output, shape index: {}]  }
   0x1   :  { %s676_s17 = smov 0  }
   0x2 LB: > { %s26_s18 = sadd.s32 1, %s639_s16  ;;  %p567_p0 = scmp.ge.s32.totalorder %s643_s17, 1  ;;  %s643_s17 = sphi %s676_s17, %s14_s17   ;;  %s639_s16 = sphi %s674_s16, %s755_s16   ;;  %s635_s15 = sphi %s672_s15, %s754_s15  }
   0x3   : > { %p28_p1 = scmp.ge.s32.totalorder %s26_s18, 2  ;;  %p198_p2 = scmp.lt.s32.totalorder %s643_s17, 3 }
   0x5   : > { %s757_s18 = smov (%p28_p1, %s26_s18), 0  ;;  %p199_p3 = pnand %p567_p0, %p198_p2 }
   0x6   : > { %p238_p4 = scmp.lt.s32.totalorder (!%p199_p3), %s635_s15, 1  ;;  %v645_v0 = vmov (!%p199_p3), 0   ;;  %v287_v1 = vld [vmem:[%s752_s3] sm:$0xff] (!%p199_p3)  ;;  %v289_v2 = vld [vmem:[%s752_s3 + $0x10] sm:$0xff] (!%p199_p3)  ;;  %v288_v3 = vld [vmem:[%s752_s3 + $0x8] sm:$0xff] (!%p199_p3)  ;;  %vm267_vm0 = vcmask (!%p199_p3), 261120  }
   0x7   : > { %202 = sbr.rel (%p199_p3) target bundleno = 806 (0x326), region = 36  ;;  %360 = vmatprep.mubr.bf16.mxu0 (!%p199_p3), %v645_v0  ;;  %609 = vset.pattern.permute.xlu0 (!%p199_p3), %v645_v0  ;;  %v290_v4 = vld [vmem:[%s752_s3 + $0x18] sm:$0xff] (!%p199_p3)  ;;  %v611_v17 = vld [vmem:[%s751_s2] sm:$0xff] (!%p199_p3)   ;;  %v612_v18 = vld [vmem:[%s751_s2 + $0x8] sm:$0xff] (!%p199_p3)   ;;  %v646_v22 = vmov (!%p199_p3), 0.0   ;;  %vm269_vm1 = vcmask (!%p199_p3), 257024  }
   0x8   : > { %610 = vset.pattern.permute.xlu1 (!%p199_p3), %v645_v0  ;;  %293 = vperm.xlu0 (!%p199_p3), %609, %v287_v1   ;;  %268 = vst.msk [vmem:[#allocation2] sm:$0xff] (!%p199_p3), %vm267_vm0, %v646_v22 }
   0x9   : > { %303 = vperm.xlu1 (!%p199_p3), %610, %v289_v2   ;;  %270 = vst.msk [vmem:[#allocation2 + $0x8] sm:$0xf] (!%p199_p3), %vm269_vm1, %v646_v22 }
   0xc   : > { %298 = vperm.xlu0 (!%p199_p3), %609, %v288_v3  }
   0xd   : > { %308 = vperm.xlu1 (!%p199_p3), %610, %v290_v4  }
   0xe   : > { %s759_s15 = smov (!%p238_p4, %s635_s15), 1 }
   0xf   : > { %s580_s23 = sshll.u32 %s759_s15, 6  ;;  %s581_s9 = sshll.u32 %s759_s15, 5  ;;  %v389_v58 = vld [vmem:[#allocation2] sm:$0xff] }
  0x10   : > { %s245_s28 = scalar_lea.vmem %s749_s0, %s580_s23  ;;  %s720_s12 = scalar_lea.vmem %s750_s1, %s581_s9  ;;  %v390_v60 = vld [vmem:[#allocation2 + $0x8] sm:$0xf] }
  0x11   : > { %v272_v5 = vld [vmem:[%s245_s28 + $0x8] sm:$0xff]  ;;  %v274_v6 = vld [vmem:[%s245_s28 + $0x18] sm:$0xff]  ;;  %v271_v7 = vld [vmem:[%s245_s28] sm:$0xff]  ;;  %s582_s13 = sshll.u32 %s759_s15, 4 }
  0x12   : > { %v280_v8 = vpack.c.bf16 %v274_v6, %v272_v5  ;;  %v273_v9 = vld [vmem:[%s245_s28 + $0x10] sm:$0xff]  ;;  %v276_v10 = vld [vmem:[%s245_s28 + $0x28] sm:$0xff]  ;;  %v278_v11 = vld [vmem:[%s245_s28 + $0x38] sm:$0xff]  ;;  %s261_s20 = scalar_lea.vmem %s753_s4, %s582_s13 }
  0x13   : > { %v279_v12 = vpack.c.bf16 %v273_v9, %v271_v7  ;;  %v282_v13 = vpack.c.bf16 %v278_v11, %v276_v10  ;;  %v275_v14 = vld [vmem:[%s245_s28 + $0x20] sm:$0xff]  ;;  %v277_v15 = vld [vmem:[%s245_s28 + $0x30] sm:$0xff]  ;;  %v392_v19 = vld [vmem:[%s720_s12 + $0x8] sm:$0xff] }
  0x14   : > { %328 = vmatprep.subr.bf16.mxu0 %v280_v8  ;;  %v281_v16 = vpack.c.bf16 %v277_v15, %v275_v14  ;;  %v394_v20 = vld [vmem:[%s720_s12 + $0x18] sm:$0xf]  ;;  %v391_v55 = vld [vmem:[%s720_s12] sm:$0xff]  ;;  %v393_v56 = vld [vmem:[%s720_s12 + $0x10] sm:$0xf] }
  0x15   : > { %329 = vmatpush1.bf16.msra.mxu0 %v279_v12  ;;  %v396_v21 = vpack.c.bf16 %v394_v20, %v392_v19  ;;  %v395_v57 = vpack.c.bf16 %v393_v56, %v391_v55 }
  0x16   : > { %330 = vmatprep.subr.bf16.mxu0 %v282_v13 }
  0x17   : > { %433 = vmatprep.mubr.bf16.mxu1 %v396_v21 }
  0x19   : > { %331 = vmatpush1.bf16.msra.mxu0 %v281_v16 }
  0x1c   : > { %576 = vmatmul.mubr.msk.bf16.vlgmr.msra.gmra.mrb[0].mxu0 %vm267_vm0, %v611_v17 }
  0x1d   : > { %370 = vmatprep.mubr.bf16.mxu0 %v645_v0 }
  0x24   : > { %577 = vmatmul.mubr.msk.bf16.gmra.mrb[4].mxu0 %vm267_vm0, %v612_v18 }
  0x87   : > { %v294_v23 = vpop.permute.xlu0 %293 }
  0x88   : > { %v304_v32 = vpop.permute.xlu1 %303 }
  0x8b   : > { %v299_v27 = vpop.permute.xlu0 %298 }
  0x8c   : > { %v309_v43 = vpop.permute.xlu1 %308 }
  0xef   : > { %v362_v24 = vpop.f32.mrb[0].mxu0 }
  0xf0   : > { %v363_v25 = vadd.f32 %v362_v24, %v294_v23  ;;  %v364_v26 = vpop.f32.mrb[1].mxu0 }
  0xf1   : > { %v365_v28 = vadd.f32 %v364_v26, %v294_v23  ;;  %v366_v29 = vpop.f32.mrb[2].mxu0 }
  0xf2   : > { %v367_v30 = vadd.f32 %v366_v29, %v299_v27  ;;  %v368_v31 = vpop.f32.mrb[3].mxu0  ;;  %v381_v34 = vmax.f32 %v363_v25, 0.0 }
  0xf3   : > { %v369_v33 = vadd.f32 %v368_v31, %v299_v27  ;;  %v382_v36 = vmax.f32 %v365_v28, 0.0 }
  0xf4   : > { %v383_v35 = vmax.f32 %v367_v30, 0.0 }
  0xf5   : > { %v384_v37 = vmax.f32 %v369_v33, 0.0 }
  0xf6   : > { %v397_v38 = vpack.c.bf16 %v383_v35, %v381_v34 }
  0xf7   : > { %v372_v39 = vpop.f32.mrb[4].mxu0  ;;  %v398_v40 = vpack.c.bf16 %v384_v37, %v382_v36 }
  0xf8   : > { %v373_v41 = vadd.f32 %v372_v39, %v304_v32  ;;  %v374_v42 = vpop.f32.mrb[5].mxu0 }
  0xf9   : > { %v375_v44 = vadd.f32 %v374_v42, %v304_v32  ;;  %v376_v45 = vpop.f32.mrb[6].mxu0  ;;  %401 = vmatprep.subr.bf16.mxu1 %v398_v40 }
  0xfa   : > { %v377_v46 = vadd.f32 %v376_v45, %v309_v43  ;;  %v378_v47 = vpop.f32.mrb[7].mxu0  ;;  %402 = vmatpush1.bf16.xpose.msra.mxu1 %v397_v38  ;;  %v385_v49 = vmax.f32 %v373_v41, 0.0 }
  0xfb   : > { %v379_v48 = vadd.f32 %v378_v47, %v309_v43  ;;  %v386_v51 = vmax.f32 %v375_v44, 0.0 }
  0xfc   : > { %v387_v50 = vmax.f32 %v377_v46, 0.0 }
  0xfd   : > { %v388_v52 = vmax.f32 %v379_v48, 0.0 }
  0xfe   : > { %v399_v53 = vpack.c.bf16 %v387_v50, %v385_v49 }
  0xff   : > { %v400_v54 = vpack.c.bf16 %v388_v52, %v386_v51 }
 0x101   : > { %403 = vmatprep.subr.bf16.mxu1 %v400_v54 }
 0x102   : > { %404 = vmatpush1.bf16.xpose.msra.mxu1 %v399_v53 }
 0x109   : > { %434 = vmatmul.mubr.bf16.vlgmr.msra.gmra.mrb[0].mxu1 %v395_v57 }
 0x1dc   : > { %v435_v59 = vpop.f32.mrb[0].mxu1 }
 0x1dd   : > { %v442_v61 = vadd.f32 %v435_v59, %v389_v58  ;;  %v437_v62 = vpop.f32.mrb[1].mxu1 }
 0x1de   : > { %v438_v63 = vpop.f32.mrb[2].mxu1 }
 0x1df   : > { %444 = vst.msk [vmem:[#allocation2] sm:$0xff] %vm267_vm0, %v442_v61  ;;  %v443_v0 = vadd.f32 %v438_v63, %v390_v60  ;;  %v440_v1 = vpop.f32.mrb[3].mxu1 }
 0x1e1   : > { %446 = vst.msk [vmem:[#allocation2 + $0x8] sm:$0xf] %vm269_vm1, %v443_v0 }
 0x1e6   : > { %v450_v2 = vld [vmem:[#allocation2] sm:$0xff] }
 0x1e7   : > { %v452_v3 = vsel %vm267_vm0, %v450_v2, inf }
 0x1e8   : > { %453 = vmin.xlane.f32.xlu0 %v452_v3  ;;  %v451_v4 = vld [vmem:[#allocation2 + $0x8] sm:$0xf] }
 0x1e9   : > { %v455_v5 = vsel %vm269_vm1, %v451_v4, inf }
 0x1ea   : > { %456 = vmin.xlane.f32.xlu1 %v455_v5 }
 0x275   : > { %v454_v6 = vpop.xlane.xlu0 %453 }
 0x276   : > { %v458_v7 = vsub.f32 %v454_v6, %v450_v2 }
 0x277   : > { %v457_v8 = vpop.xlane.xlu1 %456 }
 0x278   : > { %v460_v9 = vmul.f32 1.442695, %v458_v7  ;;  %v459_v10 = vsub.f32 %v457_v8, %v451_v4 }
 0x27a   : > { %613 = vpow2.f32 %v460_v9  ;;  %v462_v11 = vmul.f32 1.442695, %v459_v10 }
 0x27c   : > { %615 = vpow2.f32 %v462_v11 }
 0x284   : > { %v614_v12 = vpop.eup %613 }
 0x285   : > { %v464_v13 = vsel %vm267_vm0, %v614_v12, 0.0 }
 0x286   : > { %v616_v14 = vpop.eup %615  ;;  %465 = vadd.xlane.f32.xlu0 %v464_v13 }
 0x287   : > { %v467_v15 = vsel %vm269_vm1, %v616_v14, 0.0 }
 0x28a   : > { %468 = vadd.xlane.f32.xlu0 %v467_v15 }
 0x313   : > { %v466_v16 = vpop.xlane.xlu0 %465 }
 0x314   : > { %617 = vrcp.f32 %v466_v16 }
 0x317   : > { %v469_v17 = vpop.xlane.xlu0 %468 }
 0x318   : > { %619 = vrcp.f32 %v469_v17 }
 0x31e   : > { %v618_v18 = vpop.eup %617 }
 0x31f   : > { %v472_v19 = vmul.f32 %v618_v18, %v614_v12 }
 0x321   : > { %474 = vst.msk [vmem:[%s261_s20] sm:$0xff] %vm267_vm0, %v472_v19 }
 0x322   : > { %v620_v20 = vpop.eup %619 }
 0x323   : > { %v473_v21 = vmul.f32 %v620_v20, %v616_v14 }
 0x325   : > { %475 = vst.msk [vmem:[%s261_s20 + $0x8] sm:$0xf] %vm269_vm1, %v473_v21 }
 0x326 PF: > { %s14_s17 = sadd.s32 1, %s643_s17   ;;  %s754_s15 = smov %s639_s16 }
 0x327   : > { %p11_p5 = scmp.ge.s32.totalorder %s14_s17, 4   ;;  %s755_s16 = smov %s757_s18 }
 0x329   :  { %13 = sbr.rel (!%p11_p5) target bundleno = 2 (0x2), region = 77 }

// kernel: depth_aware_fe.7
= control target key start
LH: loop header
LB: loop body
LE: loop exit
PB: predicated region body
PF: predicated region fallthrough
CT: control target
= control target key end

     0   :  { %s766_s18 = smov 0   ;;  %s768_s19 = smov 0   ;;  %s838_s0 = inlined_call_operand.vmem [shape: f32[2,32,256], index: 0, kind: input, shape index: {}, may-alias: {0,5}]   ;;  %s839_s1 = inlined_call_operand.vmem [shape: f32[2,12,256], index: 1, kind: input, shape index: {}]   ;;  %s840_s2 = inlined_call_operand.vmem [shape: f32[2,12,32], index: 2, kind: input, shape index: {}]   ;;  %s841_s3 = inlined_call_operand.vmem [shape: bf16[32,32], index: 3, kind: input, shape index: {}]   ;;  %s842_s4 = inlined_call_operand.vmem [shape: f32[32,1], index: 4, kind: input, shape index: {}]   ;;  %s843_s5 = inlined_call_operand.vmem [shape: f32[2,32,256], index: 5, kind: output, shape index: {}, may-alias: {0,5}]  }
   0x1   :  { %s770_s20 = smov 0  }
   0x2 LB: > { %s27_s21 = sadd.s32 1, %s729_s19  ;;  %p660_p0 = scmp.ge.s32.totalorder %s733_s20, 1  ;;  %s733_s20 = sphi %s770_s20, %s15_s20   ;;  %s729_s19 = sphi %s768_s19, %s845_s19   ;;  %s725_s18 = sphi %s766_s18, %s844_s18  }
   0x3   : > { %p29_p1 = scmp.ge.s32.totalorder %s27_s21, 2  ;;  %p235_p2 = scmp.lt.s32.totalorder %s733_s20, 3 }
   0x5   : > { %s847_s21 = smov (%p29_p1, %s27_s21), 0  ;;  %p236_p3 = pnand %p660_p0, %p235_p2 }
   0x6   : > { %p286_p4 = scmp.lt.s32.totalorder (!%p236_p3), %s725_s18, 1  ;;  %v735_v0 = vmov (!%p236_p3), 0   ;;  %vm353_vm0 = vcmask (!%p236_p3), 1045504   ;;  %vm346_vm1 = vcmask (!%p236_p3), 97280   ;;  %v422_v13 = vld [vmem:[%s842_s4 + $0x8] sm:$0xff] (!%p236_p3)  ;;  %v421_v14 = vld [vmem:[%s842_s4] sm:$0xff] (!%p236_p3) }
   0x7   : > { %239 = sbr.rel (%p236_p3) target bundleno = 580 (0x244), region = 40  ;;  %392 = vmatprep.mubr.bf16.mxu0 (!%p236_p3), %v735_v0  ;;  %494 = vmatprep.mubr.bf16.mxu1 (!%p236_p3), %v735_v0  ;;  %v423_v15 = vld [vmem:[%s842_s4 + $0x10] sm:$0xff] (!%p236_p3)  ;;  %v424_v16 = vld [vmem:[%s842_s4 + $0x18] sm:$0xff] (!%p236_p3)  ;;  %v709_v29 = vld [vmem:[%s841_s3] sm:$0xff] (!%p236_p3)   ;;  %vm455_vm2 = vcmask (!%p236_p3), 261120  }
   0x8   : > { %708 = vset.pattern.permute.xlu1 (!%p236_p3), %v735_v0  ;;  %v710_v30 = vld [vmem:[%s841_s3 + $0x8] sm:$0xff] (!%p236_p3)  }
   0x9   : > { %432 = vperm.xlu1 (!%p236_p3), %708, %v422_v13  }
   0xd   : > { %437 = vperm.xlu1 (!%p236_p3), %708, %v423_v15  }
   0xe   : > { %s849_s18 = smov (!%p286_p4, %s725_s18), 1 }
   0xf   : > { %s680_s22 = sshll.u32 %s849_s18, 4  ;;  %s679_s26 = sshll.u32 %s849_s18, 5 }
  0x10   : > { %s309_s25 = scalar_lea.vmem %s840_s2, %s680_s22  ;;  %s303_s29 = scalar_lea.vmem %s839_s1, %s679_s26 }
  0x11   : > { %v327_v1 = vld [vmem:[%s309_s25] sm:$0xff]  ;;  %v328_v2 = vld [vmem:[%s309_s25 + $0x8] sm:$0xf]  ;;  %v324_v5 = vld [vmem:[%s303_s29 + $0x18] sm:$0xf]  ;;  %442 = vperm.xlu1 %708, %v424_v16   ;;  %s678_s17 = sshll.u32 %s849_s18, 6 }
  0x12   : > { %v329_v3 = vpack.c.bf16 %v328_v2, %v327_v1  ;;  %v322_v4 = vld [vmem:[%s303_s29 + $0x8] sm:$0xff]  ;;  %v321_v6 = vld [vmem:[%s303_s29] sm:$0xff]  ;;  %v323_v8 = vld [vmem:[%s303_s29 + $0x10] sm:$0xf]  ;;  %s293_s24 = scalar_lea.vmem %s838_s0, %s678_s17  ;;  %s819_s27 = scalar_lea.vmem %s843_s5, %s678_s17 }
  0x13   : > { %v326_v7 = vpack.c.bf16 %v324_v5, %v322_v4  ;;  %v325_v9 = vpack.c.bf16 %v323_v8, %v321_v6  ;;  %v515_v34 = vld [vmem:[%s293_s24] sm:$0xff]  ;;  %v516_v35 = vld [vmem:[%s293_s24 + $0x8] sm:$0xff]  ;;  %v517_v38 = vld [vmem:[%s293_s24 + $0x10] sm:$0xff] }
  0x14   : > { %330 = vxpose.xlu0.c.b16.start.end [1/1] (short) (narrow) %v329_v3, 32  ;;  %v518_v39 = vld [vmem:[%s293_s24 + $0x18] sm:$0xff]  ;;  %v519_v40 = vld [vmem:[%s293_s24 + $0x20] sm:$0xff]  ;;  %v520_v43 = vld [vmem:[%s293_s24 + $0x28] sm:$0xff] }
  0x15   : > { %669 = vmatprep.subr.msk.bf16.mxu0 %vm353_vm0, %v326_v7  ;;  %v355_v10 = vsel %vm353_vm0, %v325_v9, 0  ;;  %v521_v44 = vld [vmem:[%s293_s24 + $0x30] sm:$0xff]  ;;  %v522_v45 = vld [vmem:[%s293_s24 + $0x38] sm:$0xff] }
  0x16   : > { %361 = vmatpush1.bf16.msra.mxu0 %v355_v10 }
  0x1d   : > { %707 = vset.pattern.permute.xlu0 %v735_v0 }
  0x21   : > { %427 = vperm.xlu0 %707, %v421_v14  }
  0x7a   : > { %v338_v11 = vpop.trf.xlu0 }
  0x7b   : > { %670 = vmatmul.mubr.msk.bf16.vlgmr.msra.gmra.mrb[0].mxu0 %vm346_vm1, %v338_v11 }
  0x7c   : > { %402 = vmatprep.mubr.bf16.mxu0 %v735_v0 }
  0x7e   : > { %v339_v12 = vpop.trf.xlu0 }
  0x83   : > { %671 = vmatmul.mubr.msk.bf16.gmra.mrb[4].mxu0 %vm346_vm1, %v339_v12 }
  0x88   : > { %v433_v31 = vpop.permute.xlu1 %432 }
  0x8c   : > { %v438_v49 = vpop.permute.xlu1 %437 }
  0x90   : > { %v443_v57 = vpop.permute.xlu1 %442 }
  0xa0   : > { %v428_v32 = vpop.permute.xlu0 %427 }
 0x14e   : > { %v394_v17 = vpop.f32.mrb[0].mxu0 }
 0x14f   : > { %v396_v18 = vpop.f32.mrb[1].mxu0 }
 0x150   : > { %v398_v19 = vpop.f32.mrb[2].mxu0 }
 0x151   : > { %v417_v20 = vpack.c.bf16 %v398_v19, %v394_v17  ;;  %v400_v21 = vpop.f32.mrb[3].mxu0 }
 0x152   : > { %v418_v22 = vpack.c.bf16 %v400_v21, %v396_v18 }
 0x154   : > { %462 = vmatprep.subr.bf16.mxu1 %v418_v22 }
 0x155   : > { %463 = vmatpush1.bf16.msra.mxu1 %v417_v20 }
 0x156   : > { %v404_v23 = vpop.f32.mrb[4].mxu0 }
 0x157   : > { %v406_v24 = vpop.f32.mrb[5].mxu0 }
 0x158   : > { %v408_v25 = vpop.f32.mrb[6].mxu0 }
 0x159   : > { %v419_v26 = vpack.c.bf16 %v408_v25, %v404_v23  ;;  %v410_v27 = vpop.f32.mrb[7].mxu0 }
 0x15a   : > { %v420_v28 = vpack.c.bf16 %v410_v27, %v406_v24 }
 0x15c   : > { %464 = vmatprep.subr.bf16.mxu1 %v420_v28 }
 0x15d   : > { %465 = vmatpush1.bf16.msra.mxu1 %v419_v26 }
 0x160   : > { %674 = vmatmul.mubr.msk.bf16.vlgmr.msra.gmra.mrb[0].mxu1 %vm455_vm2, %v709_v29 }
 0x161   : > { %504 = vmatprep.mubr.bf16.mxu1 %v735_v0 }
 0x168   : > { %675 = vmatmul.mubr.msk.bf16.gmra.mrb[4].mxu1 %vm455_vm2, %v710_v30 }
 0x233   : > { %v496_v33 = vpop.f32.mrb[0].mxu1 }
 0x234   : > { %v497_v36 = vadd.f32 %v496_v33, %v428_v32  ;;  %v498_v37 = vpop.f32.mrb[1].mxu1 }
 0x235   : > { %v499_v41 = vadd.f32 %v498_v37, %v428_v32  ;;  %v500_v42 = vpop.f32.mrb[2].mxu1 }
 0x236   : > { %v523_v46 = vadd.f32 %v515_v34, %v497_v36  ;;  %v501_v47 = vadd.f32 %v500_v42, %v433_v31  ;;  %v502_v48 = vpop.f32.mrb[3].mxu1 }
 0x237   : > { %v524_v50 = vadd.f32 %v516_v35, %v499_v41  ;;  %v503_v51 = vadd.f32 %v502_v48, %v433_v31 }
 0x238   : > { %v525_v52 = vadd.f32 %v517_v38, %v501_v47  ;;  %531 = vst [vmem:[%s819_s27] sm:$0xff] %v523_v46 }
 0x239   : > { %v526_v53 = vadd.f32 %v518_v39, %v503_v51  ;;  %532 = vst [vmem:[%s819_s27 + $0x8] sm:$0xff] %v524_v50 }
 0x23a   : > { %533 = vst [vmem:[%s819_s27 + $0x10] sm:$0xff] %v525_v52 }
 0x23b   : > { %v506_v54 = vpop.f32.mrb[4].mxu1  ;;  %534 = vst [vmem:[%s819_s27 + $0x18] sm:$0xff] %v526_v53 }
 0x23c   : > { %v507_v55 = vadd.f32 %v506_v54, %v438_v49  ;;  %v508_v56 = vpop.f32.mrb[5].mxu1 }
 0x23d   : > { %v509_v58 = vadd.f32 %v508_v56, %v438_v49  ;;  %v510_v59 = vpop.f32.mrb[6].mxu1 }
 0x23e   : > { %v527_v60 = vadd.f32 %v519_v40, %v507_v55  ;;  %v511_v61 = vadd.f32 %v510_v59, %v443_v57  ;;  %v512_v62 = vpop.f32.mrb[7].mxu1 }
 0x23f   : > { %v528_v63 = vadd.f32 %v520_v43, %v509_v58  ;;  %v513_v0 = vadd.f32 %v512_v62, %v443_v57 }
 0x240   : > { %v529_v1 = vadd.f32 %v521_v44, %v511_v61  ;;  %535 = vst [vmem:[%s819_s27 + $0x20] sm:$0xff] %v527_v60 }
 0x241   : > { %v530_v2 = vadd.f32 %v522_v45, %v513_v0  ;;  %536 = vst [vmem:[%s819_s27 + $0x28] sm:$0xff] %v528_v63 }
 0x242   : > { %537 = vst [vmem:[%s819_s27 + $0x30] sm:$0xff] %v529_v1 }
 0x243   : > { %538 = vst [vmem:[%s819_s27 + $0x38] sm:$0xff] %v530_v2 }
 0x244 PF: > { %s15_s20 = sadd.s32 1, %s733_s20   ;;  %s844_s18 = smov %s729_s19 }
 0x245   : > { %p12_p5 = scmp.ge.s32.totalorder %s15_s20, 4   ;;  %s845_s19 = smov %s847_s21 }
 0x247   :  { %14 = sbr.rel (!%p12_p5) target bundleno = 2 (0x2), region = 76 }

</bundles_post_ra>
